<compile_context>
chip_gen: v7x
topology: tpu7x:2x2x1
jax: 0.10.0
libtpu: 0.0.40
codegen_flags: <defaults>
</compile_context>

<pallas_src>
import functools

import jax
import jax.numpy as jnp
from jax.experimental import pallas as pl
from jax.experimental.pallas import tpu as pltpu


# ----------------------------- Pallas kernels ------------------------------ #

def _mm_bias_leaky_kernel(x_ref, w_ref, b_ref, o_ref, acc_ref):
    """Grid (m, k): acc += x @ w ; last K-step: out = LeakyReLU(acc + b, 0.2)."""
    k = pl.program_id(1)

    @pl.when(k == 0)
    def _():
        acc_ref[...] = jnp.zeros_like(acc_ref)

    acc_ref[...] += jnp.dot(x_ref[...], w_ref[...],
                            preferred_element_type=jnp.float32)

    @pl.when(k == pl.num_programs(1) - 1)
    def _():
        y = acc_ref[...] + b_ref[...]
        o_ref[...] = jnp.where(y > 0, y, 0.2 * y).astype(o_ref.dtype)


def _mm_bias_bn_leaky_kernel(x_ref, w_ref, b_ref, g_ref, bt_ref, o_ref, acc_ref):
    """Grid (k,): acc += x @ w ; last K-step: BatchNorm (batch stats over rows,
    eps=1e-5, training mode) + LeakyReLU(0.2) on the f32 accumulator in VMEM."""
    k = pl.program_id(0)

    @pl.when(k == 0)
    def _():
        acc_ref[...] = jnp.zeros_like(acc_ref)

    acc_ref[...] += jnp.dot(x_ref[...], w_ref[...],
                            preferred_element_type=jnp.float32)

    @pl.when(k == pl.num_programs(0) - 1)
    def _():
        y = acc_ref[...] + b_ref[...]
        mean = jnp.mean(y, axis=0, keepdims=True)
        var = jnp.mean(jnp.square(y - mean), axis=0, keepdims=True)
        y = (y - mean) * jax.lax.rsqrt(var + 1e-5)
        y = y * g_ref[...] + bt_ref[...]
        o_ref[...] = jnp.where(y > 0, y, 0.2 * y).astype(o_ref.dtype)


def _fc_bn_head_kernel(x_ref, w1_ref, b1_ref, g_ref, bt_ref, w2_ref, b2_ref,
                       o_ref, acc_ref, *, output_dim, a_col):
    """fc1 + BN + LeakyReLU + fc2 + sigmoid head, fully fused.

    Grid (k,): acc += x @ w1 (K-tiled).  Last K-step: z1 = LeakyReLU(BN(acc+b1))
    stays in VMEM/vregs; logits = z1 @ w2 + b2; sigmoid(logits[:, output_dim])
    is written into padded output column `a_col`.
    """
    k = pl.program_id(0)

    @pl.when(k == 0)
    def _():
        acc_ref[...] = jnp.zeros_like(acc_ref)

    acc_ref[...] += jnp.dot(x_ref[...], w1_ref[...],
                            preferred_element_type=jnp.float32)

    @pl.when(k == pl.num_programs(0) - 1)
    def _():
        y = acc_ref[...] + b1_ref[...]
        mean = jnp.mean(y, axis=0, keepdims=True)
        var = jnp.mean(jnp.square(y - mean), axis=0, keepdims=True)
        y = (y - mean) * jax.lax.rsqrt(var + 1e-5)
        y = y * g_ref[...] + bt_ref[...]
        z1 = jnp.where(y > 0, y, 0.2 * y)

        logits = jnp.dot(z1.astype(w2_ref.dtype), w2_ref[...],
                         preferred_element_type=jnp.float32) + b2_ref[...]
        m, n = logits.shape
        col = jax.lax.broadcasted_iota(jnp.int32, (m, n), 1)
        # Extract the selected logit column, sigmoid only that (M,1) vector.
        a_val = jnp.sum(jnp.where(col == output_dim, logits, 0.0),
                        axis=1, keepdims=True)
        a_sig = jax.nn.sigmoid(a_val)
        out = jnp.where(col == a_col, a_sig, logits)
        o_ref[...] = out.astype(o_ref.dtype)


# ----------------------------- tiling helpers ------------------------------ #

def _round_up(x, m):
    return (x + m - 1) // m * m


def _k_tiling(K, max_tk=512):
    """K tile choice; pads K up (never truncates). tk multiple of 16 (bf16)."""
    if K <= max_tk:
        Kp = _round_up(K, 16)
        return Kp, Kp, 1
    Kp = _round_up(K, max_tk)
    return Kp, max_tk, Kp // max_tk


def _pick_tm(M):
    """M tile for non-BN stages: split for v7x megacore / bound accumulator."""
    for tm in (512, 256, 128, 64):
        if M > tm and M % tm == 0:
            return tm
    return M


def _pad_cols(a, n_to):
    n = a.shape[-1]
    if n_to == n:
        return a
    pad = [(0, 0)] * (a.ndim - 1) + [(0, n_to - n)]
    return jnp.pad(a, pad)


def _pad_k(x, w, Kp):
    K = x.shape[1]
    if Kp == K:
        return x, w
    return (jnp.pad(x, ((0, 0), (0, Kp - K))),
            jnp.pad(w, ((0, Kp - K), (0, 0))))


# ----------------------------- Pallas wrappers ------------------------------ #

def conv_matmul_leaky(x, w, b, *, out_dtype=jnp.bfloat16):
    """LeakyReLU(x @ w + b).  M-tiled ("parallel") x K-tiled ("arbitrary")."""
    M, K = x.shape
    _, N = w.shape
    Np = max(128, _round_up(N, 128))
    w = _pad_cols(w, Np)
    b = _pad_cols(b.reshape(1, -1), Np).astype(jnp.float32)
    Kp, tk, nsteps = _k_tiling(K)
    x, w = _pad_k(x, w, Kp)
    x = x.astype(jnp.bfloat16)
    w = w.astype(jnp.bfloat16)
    tm = _pick_tm(M)

    return pl.pallas_call(
        _mm_bias_leaky_kernel,
        out_shape=jax.ShapeDtypeStruct((M, Np), out_dtype),
        grid=(M // tm, nsteps),
        in_specs=[pl.BlockSpec((tm, tk), lambda m, k: (m, k)),
                  pl.BlockSpec((tk, Np), lambda m, k: (k, 0)),
                  pl.BlockSpec((1, Np), lambda m, k: (0, 0))],
        out_specs=pl.BlockSpec((tm, Np), lambda m, k: (m, 0)),
        scratch_shapes=[pltpu.VMEM((tm, Np), jnp.float32)],
        compiler_params=pltpu.CompilerParams(
            dimension_semantics=("parallel", "arbitrary")),
    )(x, w, b)


def conv_matmul_bn_leaky(x, w, b, gamma, beta, *, out_dtype=jnp.bfloat16):
    """LeakyReLU(BN(x @ w + b)).  Full-M (batch stats over rows), K-tiled."""
    M, K = x.shape
    _, N = w.shape
    Np = max(128, _round_up(N, 128))
    w = _pad_cols(w, Np)
    b = _pad_cols(b.reshape(1, -1), Np).astype(jnp.float32)
    gamma = _pad_cols(gamma.reshape(1, -1), Np).astype(jnp.float32)
    beta = _pad_cols(beta.reshape(1, -1), Np).astype(jnp.float32)
    Kp, tk, nsteps = _k_tiling(K)
    x, w = _pad_k(x, w, Kp)
    x = x.astype(jnp.bfloat16)
    w = w.astype(jnp.bfloat16)

    return pl.pallas_call(
        _mm_bias_bn_leaky_kernel,
        out_shape=jax.ShapeDtypeStruct((M, Np), out_dtype),
        grid=(nsteps,),
        in_specs=[pl.BlockSpec((M, tk), lambda k: (0, k)),
                  pl.BlockSpec((tk, Np), lambda k: (k, 0)),
                  pl.BlockSpec((1, Np), lambda k: (0, 0)),
                  pl.BlockSpec((1, Np), lambda k: (0, 0)),
                  pl.BlockSpec((1, Np), lambda k: (0, 0))],
        out_specs=pl.BlockSpec((M, Np), lambda k: (0, 0)),
        scratch_shapes=[pltpu.VMEM((M, Np), jnp.float32)],
        compiler_params=pltpu.CompilerParams(
            dimension_semantics=("arbitrary",)),
    )(x, w, b, gamma, beta)


def fused_fc_head(x, w1, b1, gamma, beta, w2, b2, *, output_dim, a_col):
    """One pallas_call: fc1 (K-tiled) + BN + LeakyReLU + fc2 + sigmoid head."""
    M, K = x.shape
    K1, N1 = w1.shape
    assert K1 == K
    K2, N2 = w2.shape
    assert K2 == N1
    N1p = max(128, _round_up(N1, 128))
    N2p = max(128, _round_up(N2, 128))
    # Sigmoid result must land in a spare padded output lane.
    assert N2 <= a_col < N2p

    w1 = _pad_cols(w1, N1p)
    b1 = _pad_cols(b1.reshape(1, -1), N1p).astype(jnp.float32)
    gamma = _pad_cols(gamma.reshape(1, -1), N1p).astype(jnp.float32)
    beta = _pad_cols(beta.reshape(1, -1), N1p).astype(jnp.float32)
    if N1p != N1:
        w2 = jnp.pad(w2, ((0, N1p - N1), (0, 0)))  # padded z1 cols are zero
    w2 = _pad_cols(w2, N2p)
    b2 = _pad_cols(b2.reshape(1, -1), N2p).astype(jnp.float32)

    Kp, tk, nsteps = _k_tiling(K)
    x, w1 = _pad_k(x, w1, Kp)
    x = x.astype(jnp.bfloat16)
    w1 = w1.astype(jnp.bfloat16)
    w2 = w2.astype(jnp.bfloat16)

    kernel = functools.partial(_fc_bn_head_kernel,
                               output_dim=output_dim, a_col=a_col)
    return pl.pallas_call(
        kernel,
        out_shape=jax.ShapeDtypeStruct((M, N2p), jnp.float32),
        grid=(nsteps,),
        in_specs=[pl.BlockSpec((M, tk), lambda k: (0, k)),
                  pl.BlockSpec((tk, N1p), lambda k: (k, 0)),
                  pl.BlockSpec((1, N1p), lambda k: (0, 0)),
                  pl.BlockSpec((1, N1p), lambda k: (0, 0)),
                  pl.BlockSpec((1, N1p), lambda k: (0, 0)),
                  pl.BlockSpec((N1p, N2p), lambda k: (0, 0)),
                  pl.BlockSpec((1, N2p), lambda k: (0, 0))],
        out_specs=pl.BlockSpec((M, N2p), lambda k: (0, 0)),
        scratch_shapes=[pltpu.VMEM((M, N1p), jnp.float32)],
        compiler_params=pltpu.CompilerParams(
            dimension_semantics=("arbitrary",)),
    )(x, w1, b1, gamma, beta, w2, b2)


# ------------------------------- JAX glue ----------------------------------- #

def im2col_nhwc(x, k, stride, pad):
    """NHWC x -> (B*Ho*Wo, k*k*C) patch matrix; column order (kh, kw, C)."""
    B, H, W, C = x.shape
    xp = jnp.pad(x, ((0, 0), (pad, pad), (pad, pad), (0, 0)))
    Ho = (H + 2 * pad - k) // stride + 1
    Wo = (W + 2 * pad - k) // stride + 1
    taps = []
    for i in range(k):
        for j in range(k):
            taps.append(
                xp[:, i:i + stride * Ho:stride, j:j + stride * Wo:stride, :])
    cols = jnp.stack(taps, axis=3)                 # (B, Ho, Wo, k*k, C)
    return cols.reshape(B * Ho * Wo, k * k * C), Ho, Wo


def prepare_params(params, input_size):
    """One-time weight permutation / padding / cast to NHWC-kernel layout."""
    H2 = W2 = input_size // 4
    p = {}

    # conv1: (Cout, Cin, kh, kw) -> (kh*kw*Cin, Cout)
    c1w = params["conv1_w"]
    p["conv1_w"] = (c1w.transpose(2, 3, 1, 0)
                    .reshape(-1, c1w.shape[0]).astype(jnp.bfloat16))
    p["conv1_b"] = params["conv1_b"].astype(jnp.float32)

    # conv2: (Cout, Cin, kh, kw) -> (kh, kw, Cin, Cout); zero-pad Cin up to the
    # lane-padded conv1 output width so the post-conv1 channel slice is never
    # materialized (the padded input channels are exactly zero).
    c2w = params["conv2_w"].transpose(2, 3, 1, 0)           # (kh, kw, 64, 128)
    cin = c2w.shape[2]
    cin_p = max(128, _round_up(cin, 128))
    if cin_p != cin:
        c2w = jnp.pad(c2w, ((0, 0), (0, 0), (0, cin_p - cin), (0, 0)))
    p["conv2_w"] = c2w.reshape(-1, c2w.shape[-1]).astype(jnp.bfloat16)
    p["conv2_b"] = params["conv2_b"].astype(jnp.float32)
    p["bn2_gamma"] = params["bn2_gamma"].astype(jnp.float32)
    p["bn2_beta"] = params["bn2_beta"].astype(jnp.float32)

    # fc1: PyTorch flattens NCHW (C,H,W); kernel flattens NHWC (H,W,C) ->
    # permute the weight columns once, then transpose to (fc_in, 1024).
    w = params["fc1_w"]
    nout = w.shape[0]
    c2out = params["conv2_w"].shape[0]                      # 128
    w = w.reshape(nout, c2out, H2, W2).transpose(0, 2, 3, 1).reshape(nout, -1)
    p["fc1_w"] = w.T.astype(jnp.bfloat16)                   # (H2*W2*128, 1024)
    p["fc1_b"] = params["fc1_b"].astype(jnp.float32)
    p["bn3_gamma"] = params["bn3_gamma"].astype(jnp.float32)
    p["bn3_beta"] = params["bn3_beta"].astype(jnp.float32)
    p["fc2_w"] = params["fc2_w"].T.astype(jnp.bfloat16)     # (1024, n_out)
    p["fc2_b"] = params["fc2_b"].astype(jnp.float32)
    return p


def discriminator_forward(prepared, x, input_size,
                          output_dim=1, len_continuous_code=2,
                          len_discrete_code=10):
    B = x.shape[0]
    n_out = output_dim + len_continuous_code + len_discrete_code

    # NCHW -> NHWC once (free for input_dim=1); bf16 activations for the MXU.
    xh = x.transpose(0, 2, 3, 1).astype(jnp.bfloat16)

    # conv1: Conv2d(Cin, 64, 4, 2, 1) + LeakyReLU(0.2)  (fused kernel)
    cols1, H1, W1 = im2col_nhwc(xh, 4, 2, 1)
    y1 = conv_matmul_leaky(cols1, prepared["conv1_w"], prepared["conv1_b"])
    c1p = y1.shape[-1]                      # 128 = 64 real + 64 zero channels
    y1 = y1.reshape(B, H1, W1, c1p)         # free reshape, no channel slice

    # conv2: Conv2d(64, 128, 4, 2, 1) + BatchNorm2d + LeakyReLU(0.2)  (fused)
    cols2, H2, W2 = im2col_nhwc(y1, 4, 2, 1)
    y2 = conv_matmul_bn_leaky(cols2, prepared["conv2_w"], prepared["conv2_b"],
                              prepared["bn2_gamma"], prepared["bn2_beta"])

    # Flatten in NHWC order (fc1 weight columns were permuted to match).
    flat = y2.reshape(B, H2 * W2 * y2.shape[-1])
    assert flat.shape[1] == prepared["fc1_w"].shape[0]

    # fc1 (Linear + BatchNorm1d + LeakyReLU) and fc2 (Linear + sigmoid head)
    # fused into ONE pallas_call; z1 never leaves VMEM.
    out = fused_fc_head(flat, prepared["fc1_w"], prepared["fc1_b"],
                        prepared["bn3_gamma"], prepared["bn3_beta"],
                        prepared["fc2_w"], prepared["fc2_b"],
                        output_dim=output_dim, a_col=n_out)

    a = out[:, n_out]                                            # (B,)
    b = out[:, output_dim:output_dim + len_continuous_code]      # (B, 2)
    c = out[:, output_dim + len_continuous_code:n_out]           # (B, 10)
    return a, b, c


# --------------------------- pure-JAX reference ----------------------------- #

def reference_forward(params, x, input_size,
                      output_dim=1, len_continuous_code=2, len_discrete_code=10):
    """f32 reference matching the PyTorch module (training-mode BatchNorm)."""
    dn = ("NCHW", "OIHW", "NCHW")
    y = jax.lax.conv_general_dilated(x, params["conv1_w"], (2, 2),
                                     ((1, 1), (1, 1)), dimension_numbers=dn)
    y = y + params["conv1_b"][None, :, None, None]
    y = jnp.where(y > 0, y, 0.2 * y)

    y = jax.lax.conv_general_dilated(y, params["conv2_w"], (2, 2),
                                     ((1, 1), (1, 1)), dimension_numbers=dn)
    y = y + params["conv2_b"][None, :, None, None]
    mean = jnp.mean(y, axis=(0, 2, 3), keepdims=True)
    var = jnp.mean(jnp.square(y - mean), axis=(0, 2, 3), keepdims=True)
    y = (y - mean) * jax.lax.rsqrt(var + 1e-5)
    y = (y * params["bn2_gamma"][None, :, None, None]
         + params["bn2_beta"][None, :, None, None])
    y = jnp.where(y > 0, y, 0.2 * y)

    B = x.shape[0]
    flat = y.reshape(B, -1)                                   # NCHW flatten
    z = flat @ params["fc1_w"].T + params["fc1_b"]
    mean = jnp.mean(z, axis=0, keepdims=True)
    var = jnp.mean(jnp.square(z - mean), axis=0, keepdims=True)
    z = (z - mean) * jax.lax.rsqrt(var + 1e-5)
    z = z * params["bn3_gamma"] + params["bn3_beta"]
    z = jnp.where(z > 0, z, 0.2 * z)

    logits = z @ params["fc2_w"].T + params["fc2_b"]
    a = jax.nn.sigmoid(logits[:, output_dim])
    b = logits[:, output_dim:output_dim + len_continuous_code]
    c = logits[:, output_dim + len_continuous_code:]
    return a, b, c


# --------------------------------- main ------------------------------------ #

if __name__ == "__main__":
    key = jax.random.PRNGKey(0)
    ks = jax.random.split(key, 6)

    # Small shapes consistent with the module: B=4, input_dim=1, input_size=16.
    B, C_in, S = 4, 1, 16
    output_dim, len_continuous_code, len_discrete_code = 1, 2, 10
    n_out = output_dim + len_continuous_code + len_discrete_code     # 13
    fc_in = 128 * (S // 4) * (S // 4)                                # 2048

    params = {
        "conv1_w": 0.02 * jax.random.normal(ks[0], (64, C_in, 4, 4), jnp.float32),
        "conv1_b": jnp.zeros((64,), jnp.float32),
        "conv2_w": 0.02 * jax.random.normal(ks[1], (128, 64, 4, 4), jnp.float32),
        "conv2_b": jnp.zeros((128,), jnp.float32),
        "bn2_gamma": jnp.ones((128,), jnp.float32),
        "bn2_beta": jnp.zeros((128,), jnp.float32),
        "fc1_w": 0.02 * jax.random.normal(ks[2], (1024, fc_in), jnp.float32),
        "fc1_b": jnp.zeros((1024,), jnp.float32),
        "bn3_gamma": jnp.ones((1024,), jnp.float32),
        "bn3_beta": jnp.zeros((1024,), jnp.float32),
        "fc2_w": 0.02 * jax.random.normal(ks[3], (n_out, 1024), jnp.float32),
        "fc2_b": jnp.zeros((n_out,), jnp.float32),
    }

    x = jax.random.normal(ks[4], (B, C_in, S, S), jnp.float32)

    prepared = prepare_params(params, S)
    fwd = jax.jit(functools.partial(
        discriminator_forward, input_size=S, output_dim=output_dim,
        len_continuous_code=len_continuous_code,
        len_discrete_code=len_discrete_code))

    a, b, c = jax.block_until_ready(fwd(prepared, x))

    assert a.shape == (B,)
    assert b.shape == (B, len_continuous_code)
    assert c.shape == (B, len_discrete_code)

    # Correctness check vs f32 pure-JAX reference (bf16 MXU operands in the
    # Pallas path -> loose tolerance).
    a_r, b_r, c_r = reference_forward(
        params, x, S, output_dim, len_continuous_code, len_discrete_code)
    max_err = max(float(jnp.max(jnp.abs(a - a_r))),
                  float(jnp.max(jnp.abs(b - b_r))),
                  float(jnp.max(jnp.abs(c - c_r))))
    assert max_err < 0.1, f"max abs error vs reference: {max_err}"

    print("KERNEL_OK")
</pallas_src>

<mosaic_0001>
module attributes {stable_mosaic.version = 11 : i64} {
  func.func @_mm_bias_leaky_kernel(%arg0: i32, %arg1: i32, %arg2: memref<128x16xbf16, #tpu.memory_space<vmem>>, %arg3: memref<16x128xbf16, #tpu.memory_space<vmem>>, %arg4: memref<1x128xf32, #tpu.memory_space<vmem>>, %arg5: memref<128x128xbf16, #tpu.memory_space<vmem>>, %arg6: memref<128x128xf32, #tpu.memory_space<vmem>>) attributes {dimension_semantics = [#tpu.dimension_semantics<parallel>, #tpu.dimension_semantics<arbitrary>], iteration_bounds = array<i64: 2, 1>, scalar_prefetch = 0 : i64, scratch_operands = 1 : i64, tpu.core_type = #tpu.core_type<tc>, window_params = [{transform_indices = @transform_0, window_bounds = array<i64: 128, 16>}, {transform_indices = @transform_1, window_bounds = array<i64: 16, 128>}, {pipeline_mode = #tpu.pipeline_mode<synchronous>, transform_indices = @transform_2, window_bounds = array<i64: 1, 128>}, {transform_indices = @transform_3, window_bounds = array<i64: 128, 128>}]} {
    %c0_i32 = arith.constant 0 : i32
    %0 = arith.cmpi eq, %arg1, %c0_i32 : i32
    %1 = arith.extui %0 : i1 to i32
    %c0_i32_0 = arith.constant 0 : i32
    %2 = arith.cmpi ne, %1, %c0_i32_0 : i32
    scf.if %2 {
      %cst_10 = arith.constant 0.000000e+00 : f32
      %12 = vector.broadcast %cst_10 : f32 to vector<128x128xf32>
      %c0_11 = arith.constant 0 : index
      %c0_12 = arith.constant 0 : index
      %13 = vector.load %arg6[%c0_11, %c0_12] : memref<128x128xf32, #tpu.memory_space<vmem>>, vector<128x128xf32>
      tpu.vector_store %arg6[%c0_11, %c0_12], %12 {strides = array<i32>} : memref<128x128xf32, #tpu.memory_space<vmem>>, vector<128x128xf32>,
    } else {
    }
    %c0 = arith.constant 0 : index
    %c0_1 = arith.constant 0 : index
    %3 = vector.load %arg6[%c0, %c0_1] : memref<128x128xf32, #tpu.memory_space<vmem>>, vector<128x128xf32>
    %c0_2 = arith.constant 0 : index
    %c0_3 = arith.constant 0 : index
    %4 = vector.load %arg2[%c0_2, %c0_3] : memref<128x16xbf16, #tpu.memory_space<vmem>>, vector<128x16xbf16>
    %c0_4 = arith.constant 0 : index
    %c0_5 = arith.constant 0 : index
    %5 = vector.load %arg3[%c0_4, %c0_5] : memref<16x128xbf16, #tpu.memory_space<vmem>>, vector<16x128xbf16>
    %cst = arith.constant dense<0.000000e+00> : vector<128x128xf32>
    %6 = tpu.matmul %4, %5, %cst {dimension_numbers = #tpu.dot_dimension_numbers<[1], [0], [0], [1], [0, 0, 1, 1], [], []>} : vector<128x16xbf16>, vector<16x128xbf16>, vector<128x128xf32> -> vector<128x128xf32>
    %7 = arith.addf %3, %6 : vector<128x128xf32>
    %c0_6 = arith.constant 0 : index
    %c0_7 = arith.constant 0 : index
    %8 = vector.load %arg6[%c0_6, %c0_7] : memref<128x128xf32, #tpu.memory_space<vmem>>, vector<128x128xf32>
    tpu.vector_store %arg6[%c0_6, %c0_7], %7 {strides = array<i32>} : memref<128x128xf32, #tpu.memory_space<vmem>>, vector<128x128xf32>,
    %c0_i32_8 = arith.constant 0 : i32
    %9 = arith.cmpi eq, %arg1, %c0_i32_8 : i32
    %10 = arith.extui %9 : i1 to i32
    %c0_i32_9 = arith.constant 0 : i32
    %11 = arith.cmpi ne, %10, %c0_i32_9 : i32
    scf.if %11 {
      %c0_10 = arith.constant 0 : index
      %c0_11 = arith.constant 0 : index
      %12 = vector.load %arg6[%c0_10, %c0_11] : memref<128x128xf32, #tpu.memory_space<vmem>>, vector<128x128xf32>
      %c0_12 = arith.constant 0 : index
      %c0_13 = arith.constant 0 : index
      %13 = vector.load %arg4[%c0_12, %c0_13] : memref<1x128xf32, #tpu.memory_space<vmem>>, vector<1x128xf32>
      %14 = vector.broadcast %13 : vector<1x128xf32> to vector<128x128xf32>
      %15 = arith.addf %12, %14 : vector<128x128xf32>
      %cst_14 = arith.constant 0.000000e+00 : f32
      %16 = vector.broadcast %cst_14 : f32 to vector<128x128xf32>
      %17 = arith.cmpf ogt, %15, %16 : vector<128x128xf32>
      %cst_15 = arith.constant 2.000000e-01 : f32
      %18 = vector.broadcast %cst_15 : f32 to vector<128x128xf32>
      %19 = arith.mulf %18, %15 : vector<128x128xf32>
      %20 = arith.select %17, %15, %19 : vector<128x128xi1>, vector<128x128xf32>
      %21 = arith.truncf %20 : vector<128x128xf32> to vector<128x128xbf16>
      %c0_16 = arith.constant 0 : index
      %c0_17 = arith.constant 0 : index
      %22 = vector.load %arg5[%c0_16, %c0_17] : memref<128x128xbf16, #tpu.memory_space<vmem>>, vector<128x128xbf16>
      tpu.vector_store %arg5[%c0_16, %c0_17], %21 {strides = array<i32>} : memref<128x128xbf16, #tpu.memory_space<vmem>>, vector<128x128xbf16>,
    } else {
    }
    return
  }
  func.func @transform_0(%arg0: i32, %arg1: i32) -> (i32, i32) {
    %c0_i32 = arith.constant 0 : i32
    return %arg0, %arg1 : i32, i32
  }
  func.func @transform_1(%arg0: i32, %arg1: i32) -> (i32, i32) {
    %c0_i32 = arith.constant 0 : i32
    %c0_i32_0 = arith.constant 0 : i32
    return %arg1, %c0_i32 : i32, i32
  }
  func.func @transform_2(%arg0: i32, %arg1: i32) -> (i32, i32) {
    %c0_i32 = arith.constant 0 : i32
    %c0_i32_0 = arith.constant 0 : i32
    %c0_i32_1 = arith.constant 0 : i32
    return %c0_i32, %c0_i32_0 : i32, i32
  }
  func.func @transform_3(%arg0: i32, %arg1: i32) -> (i32, i32) {
    %c0_i32 = arith.constant 0 : i32
    %c0_i32_0 = arith.constant 0 : i32
    return %arg0, %c0_i32 : i32, i32
  }
}

module attributes {stable_mosaic.version = 11 : i64} {
  func.func @_mm_bias_bn_leaky_kernel(%arg0: i32, %arg1: memref<64x512xbf16, #tpu.memory_space<vmem>>, %arg2: memref<512x128xbf16, #tpu.memory_space<vmem>>, %arg3: memref<1x128xf32, #tpu.memory_space<vmem>>, %arg4: memref<1x128xf32, #tpu.memory_space<vmem>>, %arg5: memref<1x128xf32, #tpu.memory_space<vmem>>, %arg6: memref<64x128xbf16, #tpu.memory_space<vmem>>, %arg7: memref<64x128xf32, #tpu.memory_space<vmem>>) attributes {dimension_semantics = [#tpu.dimension_semantics<arbitrary>], iteration_bounds = array<i64: 4>, scalar_prefetch = 0 : i64, scratch_operands = 1 : i64, tpu.core_type = #tpu.core_type<tc>, window_params = [{transform_indices = @transform_0, window_bounds = array<i64: 64, 512>}, {transform_indices = @transform_1, window_bounds = array<i64: 512, 128>}, {pipeline_mode = #tpu.pipeline_mode<synchronous>, transform_indices = @transform_2, window_bounds = array<i64: 1, 128>}, {pipeline_mode = #tpu.pipeline_mode<synchronous>, transform_indices = @transform_3, window_bounds = array<i64: 1, 128>}, {pipeline_mode = #tpu.pipeline_mode<synchronous>, transform_indices = @transform_4, window_bounds = array<i64: 1, 128>}, {pipeline_mode = #tpu.pipeline_mode<synchronous>, transform_indices = @transform_5, window_bounds = array<i64: 64, 128>}]} {
    %c0_i32 = arith.constant 0 : i32
    %0 = arith.cmpi eq, %arg0, %c0_i32 : i32
    %1 = arith.extui %0 : i1 to i32
    %c0_i32_0 = arith.constant 0 : i32
    %2 = arith.cmpi ne, %1, %c0_i32_0 : i32
    scf.if %2 {
      %cst_9 = arith.constant 0.000000e+00 : f32
      %12 = vector.broadcast %cst_9 : f32 to vector<64x128xf32>
      %c0_10 = arith.constant 0 : index
      %c0_11 = arith.constant 0 : index
      %13 = vector.load %arg7[%c0_10, %c0_11] : memref<64x128xf32, #tpu.memory_space<vmem>>, vector<64x128xf32>
      tpu.vector_store %arg7[%c0_10, %c0_11], %12 {strides = array<i32>} : memref<64x128xf32, #tpu.memory_space<vmem>>, vector<64x128xf32>,
    } else {
    }
    %c0 = arith.constant 0 : index
    %c0_1 = arith.constant 0 : index
    %3 = vector.load %arg7[%c0, %c0_1] : memref<64x128xf32, #tpu.memory_space<vmem>>, vector<64x128xf32>
    %c0_2 = arith.constant 0 : index
    %c0_3 = arith.constant 0 : index
    %4 = vector.load %arg1[%c0_2, %c0_3] : memref<64x512xbf16, #tpu.memory_space<vmem>>, vector<64x512xbf16>
    %c0_4 = arith.constant 0 : index
    %c0_5 = arith.constant 0 : index
    %5 = vector.load %arg2[%c0_4, %c0_5] : memref<512x128xbf16, #tpu.memory_space<vmem>>, vector<512x128xbf16>
    %cst = arith.constant dense<0.000000e+00> : vector<64x128xf32>
    %6 = tpu.matmul %4, %5, %cst {dimension_numbers = #tpu.dot_dimension_numbers<[1], [0], [0], [1], [0, 0, 1, 1], [], []>} : vector<64x512xbf16>, vector<512x128xbf16>, vector<64x128xf32> -> vector<64x128xf32>
    %7 = arith.addf %3, %6 : vector<64x128xf32>
    %c0_6 = arith.constant 0 : index
    %c0_7 = arith.constant 0 : index
    %8 = vector.load %arg7[%c0_6, %c0_7] : memref<64x128xf32, #tpu.memory_space<vmem>>, vector<64x128xf32>
    tpu.vector_store %arg7[%c0_6, %c0_7], %7 {strides = array<i32>} : memref<64x128xf32, #tpu.memory_space<vmem>>, vector<64x128xf32>,
    %c3_i32 = arith.constant 3 : i32
    %9 = arith.cmpi eq, %arg0, %c3_i32 : i32
    %10 = arith.extui %9 : i1 to i32
    %c0_i32_8 = arith.constant 0 : i32
    %11 = arith.cmpi ne, %10, %c0_i32_8 : i32
    scf.if %11 {
      %c0_9 = arith.constant 0 : index
      %c0_10 = arith.constant 0 : index
      %12 = vector.load %arg7[%c0_9, %c0_10] : memref<64x128xf32, #tpu.memory_space<vmem>>, vector<64x128xf32>
      %c0_11 = arith.constant 0 : index
      %c0_12 = arith.constant 0 : index
      %13 = vector.load %arg3[%c0_11, %c0_12] : memref<1x128xf32, #tpu.memory_space<vmem>>, vector<1x128xf32>
      %14 = vector.broadcast %13 : vector<1x128xf32> to vector<64x128xf32>
      %15 = arith.addf %12, %14 : vector<64x128xf32>
      %cst_13 = arith.constant dense<0.000000e+00> : vector<128xf32>
      %16 = vector.multi_reduction <add>, %15, %cst_13 [0] : vector<64x128xf32> to vector<128xf32>
      %17 = vector.shape_cast %16 : vector<128xf32> to vector<1x128xf32>
      %cst_14 = arith.constant 6.400000e+01 : f32
      %18 = vector.broadcast %cst_14 : f32 to vector<1x128xf32>
      %19 = arith.divf %17, %18 : vector<1x128xf32>
      %20 = vector.broadcast %19 : vector<1x128xf32> to vector<64x128xf32>
      %21 = arith.subf %15, %20 : vector<64x128xf32>
      %22 = arith.mulf %21, %21 : vector<64x128xf32>
      %cst_15 = arith.constant dense<0.000000e+00> : vector<128xf32>
      %23 = vector.multi_reduction <add>, %22, %cst_15 [0] : vector<64x128xf32> to vector<128xf32>
      %24 = vector.shape_cast %23 : vector<128xf32> to vector<1x128xf32>
      %cst_16 = arith.constant 6.400000e+01 : f32
      %25 = vector.broadcast %cst_16 : f32 to vector<1x128xf32>
      %26 = arith.divf %24, %25 : vector<1x128xf32>
      %27 = vector.broadcast %19 : vector<1x128xf32> to vector<64x128xf32>
      %28 = arith.subf %15, %27 : vector<64x128xf32>
      %cst_17 = arith.constant 9.99999974E-6 : f32
      %29 = vector.broadcast %cst_17 : f32 to vector<1x128xf32>
      %30 = arith.addf %26, %29 : vector<1x128xf32>
      %31 = math.rsqrt %30 : vector<1x128xf32>
      %32 = vector.broadcast %31 : vector<1x128xf32> to vector<64x128xf32>
      %33 = arith.mulf %28, %32 : vector<64x128xf32>
      %c0_18 = arith.constant 0 : index
      %c0_19 = arith.constant 0 : index
      %34 = vector.load %arg4[%c0_18, %c0_19] : memref<1x128xf32, #tpu.memory_space<vmem>>, vector<1x128xf32>
      %35 = vector.broadcast %34 : vector<1x128xf32> to vector<64x128xf32>
      %36 = arith.mulf %33, %35 : vector<64x128xf32>
      %c0_20 = arith.constant 0 : index
      %c0_21 = arith.constant 0 : index
      %37 = vector.load %arg5[%c0_20, %c0_21] : memref<1x128xf32, #tpu.memory_space<vmem>>, vector<1x128xf32>
      %38 = vector.broadcast %37 : vector<1x128xf32> to vector<64x128xf32>
      %39 = arith.addf %36, %38 : vector<64x128xf32>
      %cst_22 = arith.constant 0.000000e+00 : f32
      %40 = vector.broadcast %cst_22 : f32 to vector<64x128xf32>
      %41 = arith.cmpf ogt, %39, %40 : vector<64x128xf32>
      %cst_23 = arith.constant 2.000000e-01 : f32
      %42 = vector.broadcast %cst_23 : f32 to vector<64x128xf32>
      %43 = arith.mulf %42, %39 : vector<64x128xf32>
      %44 = arith.select %41, %39, %43 : vector<64x128xi1>, vector<64x128xf32>
      %45 = arith.truncf %44 : vector<64x128xf32> to vector<64x128xbf16>
      %c0_24 = arith.constant 0 : index
      %c0_25 = arith.constant 0 : index
      %46 = vector.load %arg6[%c0_24, %c0_25] : memref<64x128xbf16, #tpu.memory_space<vmem>>, vector<64x128xbf16>
      tpu.vector_store %arg6[%c0_24, %c0_25], %45 {strides = array<i32>} : memref<64x128xbf16, #tpu.memory_space<vmem>>, vector<64x128xbf16>,
    } else {
    }
    return
  }
  func.func @transform_0(%arg0: i32) -> (i32, i32) {
    %c0_i32 = arith.constant 0 : i32
    %c0_i32_0 = arith.constant 0 : i32
    return %c0_i32, %arg0 : i32, i32
  }
  func.func @transform_1(%arg0: i32) -> (i32, i32) {
    %c0_i32 = arith.constant 0 : i32
    %c0_i32_0 = arith.constant 0 : i32
    return %arg0, %c0_i32 : i32, i32
  }
  func.func @transform_2(%arg0: i32) -> (i32, i32) {
    %c0_i32 = arith.constant 0 : i32
    %c0_i32_0 = arith.constant 0 : i32
    %c0_i32_1 = arith.constant 0 : i32
    return %c0_i32, %c0_i32_0 : i32, i32
  }
  func.func @transform_3(%arg0: i32) -> (i32, i32) {
    %c0_i32 = arith.constant 0 : i32
    %c0_i32_0 = arith.constant 0 : i32
    %c0_i32_1 = arith.constant 0 : i32
    return %c0_i32, %c0_i32_0 : i32, i32
  }
  func.func @transform_4(%arg0: i32) -> (i32, i32) {
    %c0_i32 = arith.constant 0 : i32
    %c0_i32_0 = arith.constant 0 : i32
    %c0_i32_1 = arith.constant 0 : i32
    return %c0_i32, %c0_i32_0 : i32, i32
  }
  func.func @transform_5(%arg0: i32) -> (i32, i32) {
    %c0_i32 = arith.constant 0 : i32
    %c0_i32_0 = arith.constant 0 : i32
    %c0_i32_1 = arith.constant 0 : i32
    return %c0_i32, %c0_i32_0 : i32, i32
  }
}

module attributes {stable_mosaic.version = 11 : i64} {
  func.func @_fc_bn_head_kernel(%arg0: i32, %arg1: memref<4x512xbf16, #tpu.memory_space<vmem>>, %arg2: memref<512x1024xbf16, #tpu.memory_space<vmem>>, %arg3: memref<1x1024xf32, #tpu.memory_space<vmem>>, %arg4: memref<1x1024xf32, #tpu.memory_space<vmem>>, %arg5: memref<1x1024xf32, #tpu.memory_space<vmem>>, %arg6: memref<1024x128xbf16, #tpu.memory_space<vmem>>, %arg7: memref<1x128xf32, #tpu.memory_space<vmem>>, %arg8: memref<4x128xf32, #tpu.memory_space<vmem>>, %arg9: memref<4x1024xf32, #tpu.memory_space<vmem>>) attributes {dimension_semantics = [#tpu.dimension_semantics<arbitrary>], iteration_bounds = array<i64: 4>, scalar_prefetch = 0 : i64, scratch_operands = 1 : i64, tpu.core_type = #tpu.core_type<tc>, window_params = [{transform_indices = @transform_0, window_bounds = array<i64: 4, 512>}, {transform_indices = @transform_1, window_bounds = array<i64: 512, 1024>}, {pipeline_mode = #tpu.pipeline_mode<synchronous>, transform_indices = @transform_2, window_bounds = array<i64: 1, 1024>}, {pipeline_mode = #tpu.pipeline_mode<synchronous>, transform_indices = @transform_3, window_bounds = array<i64: 1, 1024>}, {pipeline_mode = #tpu.pipeline_mode<synchronous>, transform_indices = @transform_4, window_bounds = array<i64: 1, 1024>}, {pipeline_mode = #tpu.pipeline_mode<synchronous>, transform_indices = @transform_5, window_bounds = array<i64: 1024, 128>}, {pipeline_mode = #tpu.pipeline_mode<synchronous>, transform_indices = @transform_6, window_bounds = array<i64: 1, 128>}, {pipeline_mode = #tpu.pipeline_mode<synchronous>, transform_indices = @transform_7, window_bounds = array<i64: 4, 128>}]} {
    %c0_i32 = arith.constant 0 : i32
    %0 = arith.cmpi eq, %arg0, %c0_i32 : i32
    %1 = arith.extui %0 : i1 to i32
    %c0_i32_0 = arith.constant 0 : i32
    %2 = arith.cmpi ne, %1, %c0_i32_0 : i32
    scf.if %2 {
      %cst_9 = arith.constant 0.000000e+00 : f32
      %12 = vector.broadcast %cst_9 : f32 to vector<4x1024xf32>
      %c0_10 = arith.constant 0 : index
      %c0_11 = arith.constant 0 : index
      %13 = vector.load %arg9[%c0_10, %c0_11] : memref<4x1024xf32, #tpu.memory_space<vmem>>, vector<4x1024xf32>
      tpu.vector_store %arg9[%c0_10, %c0_11], %12 {strides = array<i32>} : memref<4x1024xf32, #tpu.memory_space<vmem>>, vector<4x1024xf32>,
    } else {
    }
    %c0 = arith.constant 0 : index
    %c0_1 = arith.constant 0 : index
    %3 = vector.load %arg9[%c0, %c0_1] : memref<4x1024xf32, #tpu.memory_space<vmem>>, vector<4x1024xf32>
    %c0_2 = arith.constant 0 : index
    %c0_3 = arith.constant 0 : index
    %4 = vector.load %arg1[%c0_2, %c0_3] : memref<4x512xbf16, #tpu.memory_space<vmem>>, vector<4x512xbf16>
    %c0_4 = arith.constant 0 : index
    %c0_5 = arith.constant 0 : index
    %5 = vector.load %arg2[%c0_4, %c0_5] : memref<512x1024xbf16, #tpu.memory_space<vmem>>, vector<512x1024xbf16>
    %cst = arith.constant dense<0.000000e+00> : vector<4x1024xf32>
    %6 = tpu.matmul %4, %5, %cst {dimension_numbers = #tpu.dot_dimension_numbers<[1], [0], [0], [1], [0, 0, 1, 1], [], []>} : vector<4x512xbf16>, vector<512x1024xbf16>, vector<4x1024xf32> -> vector<4x1024xf32>
    %7 = arith.addf %3, %6 : vector<4x1024xf32>
    %c0_6 = arith.constant 0 : index
    %c0_7 = arith.constant 0 : index
    %8 = vector.load %arg9[%c0_6, %c0_7] : memref<4x1024xf32, #tpu.memory_space<vmem>>, vector<4x1024xf32>
    tpu.vector_store %arg9[%c0_6, %c0_7], %7 {strides = array<i32>} : memref<4x1024xf32, #tpu.memory_space<vmem>>, vector<4x1024xf32>,
    %c3_i32 = arith.constant 3 : i32
    %9 = arith.cmpi eq, %arg0, %c3_i32 : i32
    %10 = arith.extui %9 : i1 to i32
    %c0_i32_8 = arith.constant 0 : i32
    %11 = arith.cmpi ne, %10, %c0_i32_8 : i32
    scf.if %11 {
      %c0_9 = arith.constant 0 : index
      %c0_10 = arith.constant 0 : index
      %12 = vector.load %arg9[%c0_9, %c0_10] : memref<4x1024xf32, #tpu.memory_space<vmem>>, vector<4x1024xf32>
      %c0_11 = arith.constant 0 : index
      %c0_12 = arith.constant 0 : index
      %13 = vector.load %arg3[%c0_11, %c0_12] : memref<1x1024xf32, #tpu.memory_space<vmem>>, vector<1x1024xf32>
      %14 = vector.broadcast %13 : vector<1x1024xf32> to vector<4x1024xf32>
      %15 = arith.addf %12, %14 : vector<4x1024xf32>
      %cst_13 = arith.constant dense<0.000000e+00> : vector<1024xf32>
      %16 = vector.multi_reduction <add>, %15, %cst_13 [0] : vector<4x1024xf32> to vector<1024xf32>
      %17 = vector.shape_cast %16 : vector<1024xf32> to vector<1x1024xf32>
      %cst_14 = arith.constant 4.000000e+00 : f32
      %18 = vector.broadcast %cst_14 : f32 to vector<1x1024xf32>
      %19 = arith.divf %17, %18 : vector<1x1024xf32>
      %20 = vector.broadcast %19 : vector<1x1024xf32> to vector<4x1024xf32>
      %21 = arith.subf %15, %20 : vector<4x1024xf32>
      %22 = arith.mulf %21, %21 : vector<4x1024xf32>
      %cst_15 = arith.constant dense<0.000000e+00> : vector<1024xf32>
      %23 = vector.multi_reduction <add>, %22, %cst_15 [0] : vector<4x1024xf32> to vector<1024xf32>
      %24 = vector.shape_cast %23 : vector<1024xf32> to vector<1x1024xf32>
      %cst_16 = arith.constant 4.000000e+00 : f32
      %25 = vector.broadcast %cst_16 : f32 to vector<1x1024xf32>
      %26 = arith.divf %24, %25 : vector<1x1024xf32>
      %27 = vector.broadcast %19 : vector<1x1024xf32> to vector<4x1024xf32>
      %28 = arith.subf %15, %27 : vector<4x1024xf32>
      %cst_17 = arith.constant 9.99999974E-6 : f32
      %29 = vector.broadcast %cst_17 : f32 to vector<1x1024xf32>
      %30 = arith.addf %26, %29 : vector<1x1024xf32>
      %31 = math.rsqrt %30 : vector<1x1024xf32>
      %32 = vector.broadcast %31 : vector<1x1024xf32> to vector<4x1024xf32>
      %33 = arith.mulf %28, %32 : vector<4x1024xf32>
      %c0_18 = arith.constant 0 : index
      %c0_19 = arith.constant 0 : index
      %34 = vector.load %arg4[%c0_18, %c0_19] : memref<1x1024xf32, #tpu.memory_space<vmem>>, vector<1x1024xf32>
      %35 = vector.broadcast %34 : vector<1x1024xf32> to vector<4x1024xf32>
      %36 = arith.mulf %33, %35 : vector<4x1024xf32>
      %c0_20 = arith.constant 0 : index
      %c0_21 = arith.constant 0 : index
      %37 = vector.load %arg5[%c0_20, %c0_21] : memref<1x1024xf32, #tpu.memory_space<vmem>>, vector<1x1024xf32>
      %38 = vector.broadcast %37 : vector<1x1024xf32> to vector<4x1024xf32>
      %39 = arith.addf %36, %38 : vector<4x1024xf32>
      %cst_22 = arith.constant 0.000000e+00 : f32
      %40 = vector.broadcast %cst_22 : f32 to vector<4x1024xf32>
      %41 = arith.cmpf ogt, %39, %40 : vector<4x1024xf32>
      %cst_23 = arith.constant 2.000000e-01 : f32
      %42 = vector.broadcast %cst_23 : f32 to vector<4x1024xf32>
      %43 = arith.mulf %42, %39 : vector<4x1024xf32>
      %44 = arith.select %41, %39, %43 : vector<4x1024xi1>, vector<4x1024xf32>
      %45 = arith.truncf %44 : vector<4x1024xf32> to vector<4x1024xbf16>
      %c0_24 = arith.constant 0 : index
      %c0_25 = arith.constant 0 : index
      %46 = vector.load %arg6[%c0_24, %c0_25] : memref<1024x128xbf16, #tpu.memory_space<vmem>>, vector<1024x128xbf16>
      %cst_26 = arith.constant dense<0.000000e+00> : vector<4x128xf32>
      %47 = tpu.matmul %45, %46, %cst_26 {dimension_numbers = #tpu.dot_dimension_numbers<[1], [0], [0], [1], [0, 0, 1, 1], [], []>} : vector<4x1024xbf16>, vector<1024x128xbf16>, vector<4x128xf32> -> vector<4x128xf32>
      %c0_27 = arith.constant 0 : index
      %c0_28 = arith.constant 0 : index
      %48 = vector.load %arg7[%c0_27, %c0_28] : memref<1x128xf32, #tpu.memory_space<vmem>>, vector<1x128xf32>
      %49 = vector.broadcast %48 : vector<1x128xf32> to vector<4x128xf32>
      %50 = arith.addf %47, %49 : vector<4x128xf32>
      %51 = tpu.iota {dimensions = array<i32: 1>} : vector<4x128xi32>
      %c1_i32 = arith.constant 1 : i32
      %52 = vector.broadcast %c1_i32 : i32 to vector<4x128xi32>
      %53 = arith.cmpi eq, %51, %52 : vector<4x128xi32>
      %cst_29 = arith.constant 0.000000e+00 : f32
      %54 = vector.broadcast %cst_29 : f32 to vector<4x128xf32>
      %55 = arith.select %53, %50, %54 : vector<4x128xi1>, vector<4x128xf32>
      %cst_30 = arith.constant dense<0.000000e+00> : vector<4xf32>
      %56 = vector.multi_reduction <add>, %55, %cst_30 [1] : vector<4x128xf32> to vector<4xf32>
      %57 = vector.shape_cast %56 : vector<4xf32> to vector<4x1xf32>
      %58 = arith.negf %57 : vector<4x1xf32>
      %59 = math.exp %58 : vector<4x1xf32>
      %cst_31 = arith.constant 1.000000e+00 : f32
      %60 = vector.broadcast %cst_31 : f32 to vector<4x1xf32>
      %61 = arith.addf %60, %59 : vector<4x1xf32>
      %62 = arith.divf %60, %61 : vector<4x1xf32>
      %c13_i32 = arith.constant 13 : i32
      %63 = vector.broadcast %c13_i32 : i32 to vector<4x128xi32>
      %64 = arith.cmpi eq, %51, %63 : vector<4x128xi32>
      %65 = vector.shape_cast %62 : vector<4x1xf32> to vector<4x1xf32>
      %66 = vector.broadcast %65 : vector<4x1xf32> to vector<4x128xf32>
      %67 = arith.select %64, %66, %50 : vector<4x128xi1>, vector<4x128xf32>
      %c0_32 = arith.constant 0 : index
      %c0_33 = arith.constant 0 : index
      %68 = vector.load %arg8[%c0_32, %c0_33] : memref<4x128xf32, #tpu.memory_space<vmem>>, vector<4x128xf32>
      tpu.vector_store %arg8[%c0_32, %c0_33], %67 {strides = array<i32>} : memref<4x128xf32, #tpu.memory_space<vmem>>, vector<4x128xf32>,
    } else {
    }
    return
  }
  func.func @transform_0(%arg0: i32) -> (i32, i32) {
    %c0_i32 = arith.constant 0 : i32
    %c0_i32_0 = arith.constant 0 : i32
    return %c0_i32, %arg0 : i32, i32
  }
  func.func @transform_1(%arg0: i32) -> (i32, i32) {
    %c0_i32 = arith.constant 0 : i32
    %c0_i32_0 = arith.constant 0 : i32
    return %arg0, %c0_i32 : i32, i32
  }
  func.func @transform_2(%arg0: i32) -> (i32, i32) {
    %c0_i32 = arith.constant 0 : i32
    %c0_i32_0 = arith.constant 0 : i32
    %c0_i32_1 = arith.constant 0 : i32
    return %c0_i32, %c0_i32_0 : i32, i32
  }
  func.func @transform_3(%arg0: i32) -> (i32, i32) {
    %c0_i32 = arith.constant 0 : i32
    %c0_i32_0 = arith.constant 0 : i32
    %c0_i32_1 = arith.constant 0 : i32
    return %c0_i32, %c0_i32_0 : i32, i32
  }
  func.func @transform_4(%arg0: i32) -> (i32, i32) {
    %c0_i32 = arith.constant 0 : i32
    %c0_i32_0 = arith.constant 0 : i32
    %c0_i32_1 = arith.constant 0 : i32
    return %c0_i32, %c0_i32_0 : i32, i32
  }
  func.func @transform_5(%arg0: i32) -> (i32, i32) {
    %c0_i32 = arith.constant 0 : i32
    %c0_i32_0 = arith.constant 0 : i32
    %c0_i32_1 = arith.constant 0 : i32
    return %c0_i32, %c0_i32_0 : i32, i32
  }
  func.func @transform_6(%arg0: i32) -> (i32, i32) {
    %c0_i32 = arith.constant 0 : i32
    %c0_i32_0 = arith.constant 0 : i32
    %c0_i32_1 = arith.constant 0 : i32
    return %c0_i32, %c0_i32_0 : i32, i32
  }
  func.func @transform_7(%arg0: i32) -> (i32, i32) {
    %c0_i32 = arith.constant 0 : i32
    %c0_i32_0 = arith.constant 0 : i32
    %c0_i32_1 = arith.constant 0 : i32
    return %c0_i32, %c0_i32_0 : i32, i32
  }
}

</mosaic_0001>

<bundles_post_ra>
// kernel: discriminator_forward.3
= control target key start
LH: loop header
LB: loop body
LE: loop exit
PB: predicated region body
PF: predicated region fallthrough
CT: control target
= control target key end

     0   :  { %s942_s12 = smov 0   ;;  %s944_s13 = smov 0   ;;  %s1027_s0 = inlined_call_operand.vmem [shape: bf16[256,16], index: 0, kind: input, shape index: {}]   ;;  %s1028_s1 = inlined_call_operand.vmem [shape: bf16[16,128], index: 1, kind: input, shape index: {}]   ;;  %s1029_s2 = inlined_call_operand.vmem [shape: f32[1,128], index: 2, kind: input, shape index: {}]   ;;  %s1030_s3 = inlined_call_operand.vmem [shape: bf16[256,128], index: 3, kind: output, shape index: {}]  }
   0x1   :  { %s946_s14 = smov 0  }
   0x2 LB: > { %s25_s15 = sadd.s32 1, %s916_s13  ;;  %p732_p0 = scmp.ge.s32.totalorder %s920_s14, 1  ;;  %s920_s14 = sphi %s946_s14, %s13_s14   ;;  %s916_s13 = sphi %s944_s13, %s1032_s13   ;;  %s912_s12 = sphi %s942_s12, %s1031_s12  }
   0x3   : > { %p27_p1 = scmp.ge.s32.totalorder %s25_s15, 2  ;;  %p166_p2 = scmp.lt.s32.totalorder %s920_s14, 3 }
   0x5   : > { %s1034_s15 = smov (%p27_p1, %s25_s15), 0  ;;  %p167_p3 = pnand %p732_p0, %p166_p2 }
   0x6   : > { %v889_v0 = vld [vmem:[%s1028_s1] sm:$0xff] (!%p167_p3)   ;;  %s733_s18 = sshll.u32 (!%p167_p3), %s912_s12, 4  ;;  %vm320_vm0 = vcmask (!%p167_p3), 130048  }
   0x7   : > { %170 = sbr.rel (%p167_p3) target bundleno = 253 (0xfd), region = 32  ;;  %p199_p4 = scmp.lt.s32.totalorder (!%p167_p3), %s733_s18, 31  ;;  %845 = vmatprep.subr.bf16.mxu0 (!%p167_p3), %v889_v0  ;;  %863 = vmatprep.subr.bf16.mxu1 (!%p167_p3), %v889_v0  ;;  %v982_v9 = vld [vmem:[%s1029_s2] ss:$0 sm:$0xff] (!%p167_p3) }
   0x8   : > { %846 = vmatpush3.bf16.msra.mxu0 (!%p167_p3), %v889_v0  ;;  %864 = vmatpush3.bf16.msra.mxu1 (!%p167_p3), %v889_v0 }
   0xe   : > { %s1036_s18 = smov (!%p199_p4, %s733_s18), 31 }
   0xf   : > { %s734_s19 = sshll.u32 %s1036_s18, 2 }
  0x10   : > { %s205_s22 = scalar_lea.vmem %s1027_s0, %s734_s19  ;;  %s997_s27 = scalar_lea.vmem %s1030_s3, %s734_s19 }
  0x11   : > { %v890_v1 = vld [vmem:[%s205_s22] sm:$0xff]   ;;  %v892_v3 = vld [vmem:[%s205_s22 + $0x8] sm:$0xff]   ;;  %v894_v5 = vld [vmem:[%s205_s22 + $0x10] sm:$0xff]  }
  0x12   : > { %v891_v2 = vld [vmem:[%s205_s22 + $0x20] sm:$0xff]   ;;  %847 = vmatprep.mubr.msk.bf16.mxu0 %vm320_vm0, %v890_v1  ;;  %v893_v4 = vld [vmem:[%s205_s22 + $0x28] sm:$0xff]   ;;  %v895_v6 = vld [vmem:[%s205_s22 + $0x30] sm:$0xff]  }
  0x13   : > { %855 = vmatprep.mubr.msk.bf16.mxu1 %vm320_vm0, %v891_v2  ;;  %848 = vmatmul.mubr.msk.bf16.vlgmr.msra.gmra.mrb[0].mxu0 %vm320_vm0, %v892_v3  ;;  %v896_v7 = vld [vmem:[%s205_s22 + $0x18] sm:$0xff]  }
  0x14   : > { %856 = vmatmul.mubr.msk.bf16.vlgmr.msra.gmra.mrb[0].mxu1 %vm320_vm0, %v893_v4  ;;  %851 = vmatprep.mubr.msk.bf16.mxu0 %vm320_vm0, %v894_v5  ;;  %v897_v8 = vld [vmem:[%s205_s22 + $0x38] sm:$0xff]  }
  0x15   : > { %859 = vmatprep.mubr.msk.bf16.mxu1 %vm320_vm0, %v895_v6 }
  0x1b   : > { %852 = vmatmul.mubr.msk.bf16.gmra.mrb[4].mxu0 %vm320_vm0, %v896_v7 }
  0x1c   : > { %860 = vmatmul.mubr.msk.bf16.gmra.mrb[4].mxu1 %vm320_vm0, %v897_v8 }
  0xe6   : > { %v849_v10 = vpop.f32.mrb[0].mxu0 }
  0xe7   : > { %v502_v11 = vadd.f32 %v849_v10, %v982_v9  ;;  %v857_v12 = vpop.f32.mrb[0].mxu1  ;;  %v379_v13 = vpop.f32.mrb[1].mxu0 }
  0xe8   : > { %v510_v14 = vadd.f32 %v857_v12, %v982_v9  ;;  %v500_v15 = vadd.f32 %v982_v9, %v379_v13  ;;  %v411_v16 = vpop.f32.mrb[1].mxu1  ;;  %v850_v17 = vpop.f32.mrb[2].mxu0 }
  0xe9   : > { %vm518_vm1 = vcmp.gt.f32.partialorder %v502_v11, 0.0  ;;  %v534_v18 = vmul.f32 0.2, %v502_v11  ;;  %v508_v19 = vadd.f32 %v982_v9, %v411_v16  ;;  %v503_v20 = vadd.f32 %v850_v17, %v982_v9  ;;  %v858_v21 = vpop.f32.mrb[2].mxu1  ;;  %v382_v22 = vpop.f32.mrb[3].mxu0 }
  0xea   : > { %vm526_vm2 = vcmp.gt.f32.partialorder %v510_v14, 0.0  ;;  %v542_v23 = vmul.f32 0.2, %v510_v14  ;;  %v532_v24 = vmul.f32 0.2, %v500_v15  ;;  %vm516_vm3 = vcmp.gt.f32.partialorder %v500_v15, 0.0 }
  0xeb   : > { %vm519_vm4 = vcmp.gt.f32.partialorder %v503_v20, 0.0  ;;  %v414_v25 = vpop.f32.mrb[3].mxu1  ;;  %v550_v26 = vsel %vm518_vm1, %v502_v11, %v534_v18  ;;  %vm524_vm5 = vcmp.gt.f32.partialorder %v508_v19, 0.0  ;;  %v535_v27 = vmul.f32 0.2, %v503_v20 }
  0xec   : > { %v511_v28 = vadd.f32 %v858_v21, %v982_v9  ;;  %v558_v29 = vsel %vm526_vm2, %v510_v14, %v542_v23  ;;  %v540_v30 = vmul.f32 0.2, %v508_v19  ;;  %v501_v31 = vadd.f32 %v982_v9, %v382_v22 }
  0xed   : > { %v509_v32 = vadd.f32 %v982_v9, %v414_v25  ;;  %v548_v33 = vsel %vm516_vm3, %v500_v15, %v532_v24  ;;  %v551_v34 = vsel %vm519_vm4, %v503_v20, %v535_v27 }
  0xee   : > { %vm527_vm6 = vcmp.gt.f32.partialorder %v511_v28, 0.0  ;;  %v543_v35 = vmul.f32 0.2, %v511_v28  ;;  %v853_v36 = vpop.f32.mrb[4].mxu0  ;;  %v797_v37 = vpack.c.bf16 %v551_v34, %v550_v26  ;;  %vm517_vm7 = vcmp.gt.f32.partialorder %v501_v31, 0.0 }
  0xef   : > { %v533_v38 = vmul.f32 0.2, %v501_v31  ;;  %vm525_vm8 = vcmp.gt.f32.partialorder %v509_v32, 0.0  ;;  %v861_v39 = vpop.f32.mrb[4].mxu1  ;;  %v395_v40 = vpop.f32.mrb[5].mxu0  ;;  %v506_v43 = vadd.f32 %v853_v36, %v982_v9  ;;  %v556_v53 = vsel %vm524_vm5, %v508_v19, %v540_v30 }
  0xf0   : > { %v559_v41 = vsel %vm527_vm6, %v511_v28, %v543_v35  ;;  %v541_v42 = vmul.f32 0.2, %v509_v32  ;;  %v514_v44 = vadd.f32 %v861_v39, %v982_v9  ;;  %v427_v45 = vpop.f32.mrb[5].mxu1  ;;  %v854_v46 = vpop.f32.mrb[6].mxu0  ;;  %829 = vst [vmem:[%s997_s27 + $0x8] sm:$0xff] %v797_v37   ;;  %v504_v49 = vadd.f32 %v982_v9, %v395_v40 }
  0xf1   : > { %v817_v47 = vpack.c.bf16 %v559_v41, %v558_v29  ;;  %v549_v48 = vsel %vm517_vm7, %v501_v31, %v533_v38  ;;  %v512_v50 = vadd.f32 %v982_v9, %v427_v45  ;;  %v862_v51 = vpop.f32.mrb[6].mxu1  ;;  %v398_v52 = vpop.f32.mrb[7].mxu0  ;;  %v538_v56 = vmul.f32 0.2, %v506_v43 }
  0xf2   : > { %v792_v54 = vpack.c.bf16 %v549_v48, %v548_v33  ;;  %v557_v55 = vsel %vm525_vm8, %v509_v32, %v541_v42  ;;  %v430_v57 = vpop.f32.mrb[7].mxu1  ;;  %vm522_vm9 = vcmp.gt.f32.partialorder %v506_v43, 0.0  ;;  %vm530_vm10 = vcmp.gt.f32.partialorder %v514_v44, 0.0 }
  0xf3   : > { %833 = vst [vmem:[%s997_s27 + $0x28] sm:$0xff] %v817_v47   ;;  %v812_v58 = vpack.c.bf16 %v557_v55, %v556_v53  ;;  %v546_v59 = vmul.f32 0.2, %v514_v44  ;;  %vm520_vm11 = vcmp.gt.f32.partialorder %v504_v49, 0.0  ;;  %v536_v60 = vmul.f32 0.2, %v504_v49 }
  0xf4   : > { %793 = vst [vmem:[%s997_s27] sm:$0xff] %v792_v54   ;;  %v544_v61 = vmul.f32 0.2, %v512_v50  ;;  %v507_v62 = vadd.f32 %v854_v46, %v982_v9  ;;  %v515_v63 = vadd.f32 %v862_v51, %v982_v9  ;;  %v505_v0 = vadd.f32 %v982_v9, %v398_v52 }
  0xf5   : > { %832 = vst [vmem:[%s997_s27 + $0x20] sm:$0xff] %v812_v58   ;;  %v554_v1 = vsel %vm522_vm9, %v506_v43, %v538_v56  ;;  %v562_v2 = vsel %vm530_vm10, %v514_v44, %v546_v59  ;;  %vm528_vm12 = vcmp.gt.f32.partialorder %v512_v50, 0.0  ;;  %v513_v3 = vadd.f32 %v982_v9, %v430_v57 }
  0xf6   : > { %vm523_vm13 = vcmp.gt.f32.partialorder %v507_v62, 0.0  ;;  %v539_v4 = vmul.f32 0.2, %v507_v62  ;;  %vm531_vm14 = vcmp.gt.f32.partialorder %v515_v63, 0.0  ;;  %v547_v5 = vmul.f32 0.2, %v515_v63 }
  0xf7   : > { %vm521_vm15 = vcmp.gt.f32.partialorder %v505_v0, 0.0  ;;  %v537_v6 = vmul.f32 0.2, %v505_v0  ;;  %vm529_vm0 = vcmp.gt.f32.partialorder %v513_v3, 0.0  ;;  %v545_v7 = vmul.f32 0.2, %v513_v3 }
  0xf8   : > { %v552_v8 = vsel %vm520_vm11, %v504_v49, %v536_v60  ;;  %v560_v10 = vsel %vm528_vm12, %v512_v50, %v544_v61  ;;  %v555_v11 = vsel %vm523_vm13, %v507_v62, %v539_v4  ;;  %v563_v12 = vsel %vm531_vm14, %v515_v63, %v547_v5 }
  0xf9   : > { %v807_v13 = vpack.c.bf16 %v555_v11, %v554_v1  ;;  %v827_v14 = vpack.c.bf16 %v563_v12, %v562_v2  ;;  %v553_v9 = vsel %vm521_vm15, %v505_v0, %v537_v6  ;;  %v561_v15 = vsel %vm529_vm0, %v513_v3, %v545_v7 }
  0xfa   : > { %v802_v16 = vpack.c.bf16 %v553_v9, %v552_v8  ;;  %v822_v17 = vpack.c.bf16 %v561_v15, %v560_v10 }
  0xfb   : > { %831 = vst [vmem:[%s997_s27 + $0x18] sm:$0xff] %v807_v13   ;;  %835 = vst [vmem:[%s997_s27 + $0x38] sm:$0xff] %v827_v14  }
  0xfc   : > { %830 = vst [vmem:[%s997_s27 + $0x10] sm:$0xff] %v802_v16   ;;  %834 = vst [vmem:[%s997_s27 + $0x30] sm:$0xff] %v822_v17  }
  0xfd PF: > { %s13_s14 = sadd.s32 1, %s920_s14   ;;  %s1031_s12 = smov %s916_s13 }
  0xfe   : > { %p10_p5 = scmp.ge.s32.totalorder %s13_s14, 4   ;;  %s1032_s13 = smov %s1034_s15 }
 0x100   :  { %12 = sbr.rel (!%p10_p5) target bundleno = 2 (0x2), region = 73 }

// kernel: discriminator_forward.4
= control target key start
LH: loop header
LB: loop body
LE: loop exit
PB: predicated region body
PF: predicated region fallthrough
CT: control target
= control target key end

     0   :  { %10 = vsyncpa [#allocation5], 0  ;;  %s1924_s0 = inlined_call_operand.vmem [shape: bf16[64,2048], index: 0, kind: input, shape index: {}]   ;;  %s1925_s1 = inlined_call_operand.hbm [shape: bf16[2048,128], index: 1, kind: input, shape index: {}]   ;;  %s1926_s2 = inlined_call_operand.hbm [shape: f32[1,128], index: 2, kind: input, shape index: {}]   ;;  %s1927_s3 = inlined_call_operand.hbm [shape: f32[1,128], index: 3, kind: input, shape index: {}]   ;;  %s1928_s4 = inlined_call_operand.hbm [shape: f32[1,128], index: 4, kind: input, shape index: {}]   ;;  %s1929_s5 = inlined_call_operand.vmem [shape: bf16[64,128], index: 5, kind: output, shape index: {}]  }
   0x1   :  { %12 = vsyncpa [#allocation5 + $0x1], 0 }
   0x2   :  { %13 = vsyncpa [#allocation7], 0 }
   0x3   :  { %14 = vsyncpa [#allocation10], 0  ;;  %s1634_s18 = smov 0   ;;  %s1636_s19 = smov 0  }
   0x4   :  { %s1638_s20 = smov 0   ;;  %s1640_s21 = smov 0  }
   0x5 LB: > { %s1653_s22 = sadd.s32 4294967295, %s1595_s21   ;;  %s1656_s23 = sadd.s32 1, %s1595_s21   ;;  %s1595_s21 = sphi %s1640_s21, %s1951_s21   ;;  %s1591_s20 = sphi %s1638_s20, %s1950_s20   ;;  %s1587_s19 = sphi %s1636_s19, %s1949_s19   ;;  %s1583_s18 = sphi %s1634_s18, %s1948_s18  }
   0x6   : > { %s24_s24 = ssub.s32 %s1595_s21, %s1656_s23  ;;  %s27_s25 = sadd.s32 1, %s1591_s20 }
   0x7   : > { %p25_p0 = scmp.eq.s32.totalorder %s24_s24, 0  ;;  %p34_p1 = scmp.ne.s32.totalorder %s1591_s20, %s1587_s19 }
   0x8   : > { %p35_p2 = scmp.eq.s32.totalorder %s1595_s21, 0  ;;  %p66_p3 = scmp.ne.s32.totalorder %s1587_s19, %s1583_s18 }
   0x9   : > { %s1666_s26 = scalar_select %p25_p0, %s1591_s20, %s27_s25  }
   0xa   : > { %p1668_p4 = por %p35_p2, %p34_p1  ;;  %p1930_p5 = scmp.eq.s32.totalorder %s1653_s22, 0 }
   0xb   : > { %p1122_p6 = scmp.ge.s32.totalorder %s1595_s21, 1  ;;  %p161_p7 = scmp.lt.s32.totalorder %s1595_s21, 5 }
   0xc   : > { %s1934_s27 = scalar_select %p1668_p4, 1, 0 }
   0xd   : > { %p1677_p8 = por %p1930_p5, %p66_p3  ;;  %p1682_p10 = pnand %p1122_p6, %p161_p7 }
   0xe   : > { %s1597_s30 = smov [#allocation6]   ;;  %s1598_s7 = smov [#allocation8]  }
   0xf   : > { %s1935_s28 = scalar_select %p1677_p8, 1, 0 }
  0x10   : > { %s1936_s29 = scalar_select %p1682_p10, 1, 0 }
  0x11   : > { %s174_s6 = sshll.u32 %s1597_s30, 4  ;;  %p1329_p11 = pneg %p1682_p10  ;;  %s175_s6 = int_to_ptr.vmem [resolvable:$true] %s174_s6 }
  0x12   : > { %s185_s8 = sshll.u32 %s1598_s7, 4  ;;  %s1599_s10 = smov [#allocation9]   ;;  %s1694_s8 = int_to_ptr.vmem [resolvable:$true] %s185_s8 }
  0x13   : > { %p1690_p12 = pnand %p1329_p11, %p1930_p5  ;;  %s196_s11 = sshll.u32 %s1599_s10, 4  ;;  %s1696_s11 = int_to_ptr.vmem [resolvable:$true] %s196_s11 }
  0x14   : > { %s1441_s14 = scalar_lea.hbm %s1926_s2, 16 }
  0x15   : > { %p1442_p13 = scmp.ne.s32.totalorder %s1926_s2, %s1441_s14  ;;  %p1706_p0 = pneg %p1690_p12 }
  0x16   : > { %p1448_p3 = scmp.lt.u32.totalorder %s1441_s14, %s1926_s2 }
  0x17   : > { %p1444_p1 = pnand %p1706_p0, %p1442_p13 }
  0x19   : > { %p1445_p2 = pneg %p1444_p1 }
  0x1b   : > { %p1450_p6 = pnand %p1448_p3, %p1445_p2 }
  0x1d   : > { %1453 = shalt.err (!%p1450_p6)
}
  0x1e   : > { %s1454_s25 = scalar_lea.vmem %s175_s6, 16  ;;  %s1461_s30 = scalar_lea.vmem %s175_s6, 32 }
  0x1f   : > { %p1455_p7 = scmp.ne.s32.totalorder %s175_s6, %s1454_s25  ;;  %p1462_p5 = scmp.lt.s32.totalorder %s175_s6, %s175_s6 }
  0x20   : > { %p1463_p8 = scmp.lt.s32.totalorder %s1461_s30, %s1454_s25 }
  0x21   : > { %p1457_p11 = pnand %p1455_p7, %p1706_p0 }
  0x22   : > { %p1464_p10 = por %p1463_p8, %p1462_p5 }
  0x23   : > { %p1458_p9 = pneg %p1457_p11 }
  0x25   : > { %p1465_p4 = pnand %p1464_p10, %p1458_p9 }
  0x27   : > { %1468 = shalt.err (!%p1465_p4)
}
  0x28   : > { %1332 = dma.hbm_to_vmem [thread:$0]  (!%p1690_p12), %s1926_s2, 16, %s175_s6, [#allocation7]  }
  0x29   : > { %s1469_s14 = scalar_lea.hbm %s1927_s3, 16 }
  0x2a   : > { %p1470_p13 = scmp.ne.s32.totalorder %s1927_s3, %s1469_s14  ;;  %p1476_p4 = scmp.lt.u32.totalorder %s1469_s14, %s1927_s3 }
  0x2c   : > { %p1472_p1 = pnand %p1470_p13, %p1706_p0 }
  0x2e   : > { %p1473_p5 = pneg %p1472_p1 }
  0x30   : > { %p1478_p8 = pnand %p1476_p4, %p1473_p5 }
  0x32   : > { %1481 = shalt.err (!%p1478_p8)
}
  0x33   : > { %s1482_s6 = scalar_lea.vmem %s1694_s8, 16  ;;  %s1489_s25 = scalar_lea.vmem %s1694_s8, 32 }
  0x34   : > { %p1483_p9 = scmp.ne.s32.totalorder %s1694_s8, %s1482_s6  ;;  %p1490_p3 = scmp.lt.s32.totalorder %s1694_s8, %s1694_s8 }
  0x35   : > { %p1491_p6 = scmp.lt.s32.totalorder %s1489_s25, %s1482_s6 }
  0x36   : > { %p1485_p10 = pnand %p1483_p9, %p1706_p0 }
  0x37   : > { %p1492_p7 = por %p1491_p6, %p1490_p3 }
  0x38   : > { %p1486_p2 = pneg %p1485_p10 }
  0x3a   : > { %p1493_p11 = pnand %p1492_p7, %p1486_p2 }
  0x3c   : > { %1496 = shalt.err (!%p1493_p11)
}
  0x3d   : > { %1335 = dma.hbm_to_vmem [thread:$0]  (!%p1690_p12), %s1927_s3, 16, %s1694_s8, [#allocation7]  }
  0x3e   : > { %s1497_s13 = scalar_lea.hbm %s1928_s4, 16 }
  0x3f   : > { %p1498_p13 = scmp.ne.s32.totalorder %s1928_s4, %s1497_s13  ;;  %p1504_p4 = scmp.lt.u32.totalorder %s1497_s13, %s1928_s4 }
  0x41   : > { %p1500_p1 = pnand %p1498_p13, %p1706_p0 }
  0x43   : > { %p1501_p5 = pneg %p1500_p1 }
  0x45   : > { %p1506_p8 = pnand %p1504_p4, %p1501_p5 }
  0x47   : > { %1509 = shalt.err (!%p1506_p8)
}
  0x48   : > { %s1510_s8 = scalar_lea.vmem %s1696_s11, 16  ;;  %s1517_s24 = scalar_lea.vmem %s1696_s11, 32 }
  0x49   : > { %p1511_p9 = scmp.ne.s32.totalorder %s1696_s11, %s1510_s8  ;;  %p1518_p3 = scmp.lt.s32.totalorder %s1696_s11, %s1696_s11 }
  0x4a   : > { %p1519_p6 = scmp.lt.s32.totalorder %s1517_s24, %s1510_s8 }
  0x4b   : > { %p1513_p10 = pnand %p1511_p9, %p1706_p0 }
  0x4c   : > { %p1520_p7 = por %p1519_p6, %p1518_p3 }
  0x4d   : > { %p1514_p2 = pneg %p1513_p10 }
  0x4f   : > { %p1521_p11 = pnand %p1520_p7, %p1514_p2 }
  0x51   : > { %1524 = shalt.err (!%p1521_p11)
}
  0x52   : > { %1338 = dma.hbm_to_vmem [thread:$0]  (!%p1690_p12), %s1928_s4, 16, %s1696_s11, [#allocation10]  }
  0x53   : > { %p1126_p13 = scmp.ge.s32.totalorder %s1595_s21, 4 }
  0x54   : > { %p1939_p0 = scmp.ne.s32.totalorder (!%p1126_p13), %s1934_s27, 0 }
  0x55   : > { %203 = sbr.rel (%p1126_p13) target bundleno = 131 (0x83), region = 28 }
  0x5c   : > { %206 = sbr.rel (!%p1939_p0) target bundleno = 104 (0x68), region = 32  ;;  %s208_s17 = sand.u32 (%p1939_p0), 1, %s1591_s20  }
  0x5d   : > { %s1202_s30 = sshll.u32 (%p1939_p0), %s1595_s21, 4  ;;  %s1127_s7 = sshll.u32 (%p1939_p0), %s208_s17, 7 }
  0x5e   : > { %s1778_s9 = scalar_lea.vmem (%p1939_p0), %s1924_s0, %s1202_s30  ;;  %s210_s11 = scalar_lea.vmem (%p1939_p0), [#allocation3], %s1127_s7 }
  0x5f   : > { %v226_v0 = vld [vmem:[%s1778_s9] sm:$0xff] (%p1939_p0)  ;;  %v228_v1 = vld [vmem:[%s1778_s9 + $0x8] sm:$0xff] (%p1939_p0) }
  0x60   : > { %v230_v2 = vld [vmem:[%s1778_s9 + $0x40] sm:$0xff] (%p1939_p0)  ;;  %227 = vst [vmem:[%s210_s11] sm:$0xff] (%p1939_p0), %v226_v0  ;;  %229 = vst [vmem:[%s210_s11 + $0x8] sm:$0xff] (%p1939_p0), %v228_v1  ;;  %v232_v3 = vld [vmem:[%s1778_s9 + $0x48] sm:$0xff] (%p1939_p0) }
  0x61   : > { %231 = vst [vmem:[%s210_s11 + $0x10] sm:$0xff] (%p1939_p0), %v230_v2  ;;  %v234_v4 = vld [vmem:[%s1778_s9 + $0x80] sm:$0xff] (%p1939_p0)  ;;  %v236_v5 = vld [vmem:[%s1778_s9 + $0x88] sm:$0xff] (%p1939_p0)  ;;  %233 = vst [vmem:[%s210_s11 + $0x18] sm:$0xff] (%p1939_p0), %v232_v3 }
  0x62   : > { %235 = vst [vmem:[%s210_s11 + $0x20] sm:$0xff] (%p1939_p0), %v234_v4  ;;  %237 = vst [vmem:[%s210_s11 + $0x28] sm:$0xff] (%p1939_p0), %v236_v5  ;;  %v238_v6 = vld [vmem:[%s1778_s9 + $0xc0] sm:$0xff] (%p1939_p0)  ;;  %v240_v7 = vld [vmem:[%s1778_s9 + $0xc8] sm:$0xff] (%p1939_p0) }
  0x63   : > { %v242_v8 = vld [vmem:[%s1778_s9 + $0x100] sm:$0xff]  ;;  %239 = vst [vmem:[%s210_s11 + $0x30] sm:$0xff] %v238_v6  ;;  %241 = vst [vmem:[%s210_s11 + $0x38] sm:$0xff] %v240_v7  ;;  %v244_v9 = vld [vmem:[%s1778_s9 + $0x108] sm:$0xff] }
  0x64   : > { %243 = vst [vmem:[%s210_s11 + $0x40] sm:$0xff] %v242_v8  ;;  %v246_v10 = vld [vmem:[%s1778_s9 + $0x140] sm:$0xff]  ;;  %v248_v11 = vld [vmem:[%s1778_s9 + $0x148] sm:$0xff]  ;;  %245 = vst [vmem:[%s210_s11 + $0x48] sm:$0xff] %v244_v9 }
  0x65   : > { %247 = vst [vmem:[%s210_s11 + $0x50] sm:$0xff] %v246_v10  ;;  %249 = vst [vmem:[%s210_s11 + $0x58] sm:$0xff] %v248_v11  ;;  %v250_v12 = vld [vmem:[%s1778_s9 + $0x180] sm:$0xff]  ;;  %v252_v13 = vld [vmem:[%s1778_s9 + $0x188] sm:$0xff] }
  0x66   : > { %v254_v14 = vld [vmem:[%s1778_s9 + $0x1c0] sm:$0xff]  ;;  %251 = vst [vmem:[%s210_s11 + $0x60] sm:$0xff] %v250_v12  ;;  %253 = vst [vmem:[%s210_s11 + $0x68] sm:$0xff] %v252_v13  ;;  %v256_v15 = vld [vmem:[%s1778_s9 + $0x1c8] sm:$0xff] }
  0x67   : > { %255 = vst [vmem:[%s210_s11 + $0x70] sm:$0xff] %v254_v14  ;;  %257 = vst [vmem:[%s210_s11 + $0x78] sm:$0xff] %v256_v15 }
  0x68 PF: > { %s264_s13 = sand.u32 1, %s1591_s20   ;;  %s1203_s14 = sshll.u32 %s1595_s21, 12 }
  0x69   : > { %s1130_s15 = sshll.u32 %s264_s13, 8  ;;  %s1801_s8 = scalar_lea.hbm %s1925_s1, %s1203_s14 }
  0x6a   : > { %s268_s24 = scalar_lea.vmem [#allocation4], %s1130_s15  ;;  %s1805_s25 = scalar_lea.sflag [#allocation5], %s264_s13 }
  0x6b   : > { %s275_s6 = sshll.u32 %s268_s24, 4  ;;  %s1525_s17 = scalar_lea.hbm %s1801_s8, 4096  ;;  %s1803_s6 = int_to_ptr.vmem [resolvable:$true] %s275_s6 }
  0x6c   : > { %p1526_p12 = scmp.ne.s32.totalorder %s1801_s8, %s1525_s17  ;;  %p1940_p1 = scmp.ne.s32.totalorder %s1934_s27, 0 }
  0x6d   : > { %s1529_s7 = scalar_lea.hbm %s1925_s1, 16384  ;;  %p1530_p8 = scmp.lt.u32.totalorder %s1801_s8, %s1925_s1 }
  0x6e   : > { %p1527_p5 = pnand %p1526_p12, %p1940_p1  ;;  %p1531_p9 = scmp.lt.u32.totalorder %s1529_s7, %s1525_s17 }
  0x6f   : > { %p1533_p2 = scmp.lt.u32.totalorder %s1525_s17, %s1801_s8 }
  0x70   : > { %p1528_p4 = pneg %p1527_p5  ;;  %p1532_p10 = por %p1531_p9, %p1530_p8 }
  0x72   : > { %p1534_p3 = por %p1533_p2, %p1532_p10 }
  0x74   : > { %p1535_p6 = pnand %p1534_p3, %p1528_p4 }
  0x76   : > { %1538 = shalt.err (!%p1535_p6)
}
  0x77   : > { %s1539_s9 = scalar_lea.vmem %s1803_s6, 4096  ;;  %s1600_s11 = smov [#allocation4]  }
  0x78   : > { %p1540_p7 = scmp.ne.s32.totalorder %s1803_s6, %s1539_s9  ;;  %s1543_s13 = sshll.u32 %s1600_s11, 4  ;;  %s1544_s13 = int_to_ptr.vmem [resolvable:$false] %s1543_s13 }
  0x79   : > { %s1545_s14 = scalar_lea.vmem %s1544_s13, 8192  ;;  %p1546_p0 = scmp.lt.s32.totalorder %s1803_s6, %s1544_s13 }
  0x7a   : > { %p1541_p11 = pnand %p1540_p7, %p1940_p1  ;;  %p1547_p12 = scmp.lt.s32.totalorder %s1545_s14, %s1539_s9 }
  0x7c   : > { %p1542_p13 = pneg %p1541_p11  ;;  %p1548_p5 = por %p1547_p12, %p1546_p0 }
  0x7e   : > { %p1549_p8 = pnand %p1548_p5, %p1542_p13 }
  0x80   : > { %1552 = shalt.err (!%p1549_p8)
}
  0x81   : > { %s1601_s15 = smov 64   ;;  %s1602_s16 = smov 4  }
  0x82   : > { %1321 = dma.hbm_to_vmem [thread:$0]  (%p1940_p1), %s1801_s8, 4096, %s1803_s6, %s1805_s25, %s1601_s15, %s1601_s15, %s1602_s16  }
  0x83 PF: > { %p1941_p4 = scmp.ne.s32.totalorder %s1936_s29, 0 }
  0x84   : > { %s290_s18 = sand.u32 (!%p1941_p4), 1, %s1587_s19   ;;  %p1942_p9 = scmp.ne.s32.totalorder (!%p1941_p4), %s1935_s28, 0 }
  0x85   : > { %287 = sbr.rel (%p1941_p4) target bundleno = 524 (0x20c), region = 59  ;;  %s1134_s24 = sshll.u32 (!%p1941_p4), %s290_s18, 7 }
  0x86   : > { %s1135_s17 = sshll.u32 (!%p1941_p4), %s290_s18, 8  ;;  %s1832_s21 = scalar_lea.vmem (!%p1941_p4), [#allocation3], %s1134_s24 }
  0x87   : > { %s297_s30 = scalar_lea.sflag (!%p1941_p4), [#allocation5], %s290_s18  ;;  %s1834_s7 = scalar_lea.vmem (!%p1941_p4), [#allocation4], %s1135_s17 }
  0x8c   : > { %1570 = dma.done.wait (%p1942_p9), %s297_s30, 4096  }
  0x8d   : > { %1572 = vsyncadd (%p1942_p9), %s297_s30, 4294963200  ;;  %p1943_p1 = scmp.eq.s32.totalorder %s1653_s22, 0 }
  0x8f   : > { %1574 = dma.done.wait (%p1943_p1), [#allocation7], 32   ;;  %p1944_p10 = pmov %p1943_p1 }
  0x90   : > { %p1945_p2 = pmov %p1943_p1 }
  0x91   : > { %1576 = vsyncadd (%p1944_p10), [#allocation7], 4294967264 }
  0x92   : > { %1578 = dma.done.wait (%p1945_p2), [#allocation10], 16   ;;  %p1946_p3 = pmov %p1943_p1 }
  0x93   : > { %p1947_p6 = scmp.ne.s32.totalorder %s1653_s22, 0 }
  0x94   : > { %1580 = vsyncadd (%p1946_p3), [#allocation10], 4294967280  ;;  %v1603_v16 = vmov (!%p1947_p6), 0.0  }
  0x95   : > { %344 = sbr.rel (%p1947_p6) target bundleno = 156 (0x9c), region = 83  ;;  %345 = vst [vmem:[#allocation2] sm:$0xff] (!%p1947_p6), %v1603_v16  ;;  %346 = vst [vmem:[#allocation2 + $0x8] sm:$0xff] (!%p1947_p6), %v1603_v16 }
  0x96   : > { %347 = vst [vmem:[#allocation2 + $0x10] sm:$0xff] (!%p1947_p6), %v1603_v16  ;;  %348 = vst [vmem:[#allocation2 + $0x18] sm:$0xff] (!%p1947_p6), %v1603_v16 }
  0x97   : > { %349 = vst [vmem:[#allocation2 + $0x20] sm:$0xff] (!%p1947_p6), %v1603_v16  ;;  %350 = vst [vmem:[#allocation2 + $0x28] sm:$0xff] (!%p1947_p6), %v1603_v16 }
  0x98   : > { %351 = vst [vmem:[#allocation2 + $0x30] sm:$0xff] (!%p1947_p6), %v1603_v16  ;;  %352 = vst [vmem:[#allocation2 + $0x38] sm:$0xff] (!%p1947_p6), %v1603_v16 }
  0x9c PF: > { %v1383_v17 = vld [vmem:[%s1834_s7 + $0x40] sm:$0xff]   ;;  %v1387_v21 = vld [vmem:[%s1834_s7 + $0x48] sm:$0xff]   ;;  %v1391_v25 = vld [vmem:[%s1834_s7 + $0x50] sm:$0xff]   ;;  %p1188_p7 = scmp.ne.s32.totalorder %s1653_s22, 3 }
  0x9d   : > { %v1384_v18 = vld [vmem:[%s1834_s7 + $0xc0] sm:$0xff]   ;;  %1235 = vmatprep.subr.bf16.mxu0 %v1383_v17  ;;  %v1388_v22 = vld [vmem:[%s1834_s7 + $0xc8] sm:$0xff]   ;;  %v1392_v26 = vld [vmem:[%s1834_s7 + $0xd0] sm:$0xff]  }
  0x9e   : > { %v1385_v19 = vld [vmem:[%s1834_s7] sm:$0xff]   ;;  %1275 = vmatprep.subr.bf16.mxu1 %v1384_v18  ;;  %v1389_v23 = vld [vmem:[%s1834_s7 + $0x8] sm:$0xff]   ;;  %v1393_v27 = vld [vmem:[%s1834_s7 + $0x10] sm:$0xff]  }
  0x9f   : > { %v1386_v20 = vld [vmem:[%s1834_s7 + $0x80] sm:$0xff]   ;;  %1236 = vmatpush3.bf16.msra.mxu0 %v1385_v19  ;;  %v1390_v24 = vld [vmem:[%s1834_s7 + $0x88] sm:$0xff]   ;;  %v1394_v28 = vld [vmem:[%s1834_s7 + $0x90] sm:$0xff]  }
  0xa0   : > { %1276 = vmatpush3.bf16.msra.mxu1 %v1386_v20  ;;  %1237 = vmatprep.subr.bf16.mxu0 %v1387_v21  ;;  %v1395_v29 = vld [vmem:[%s1834_s7 + $0x58] sm:$0xff]   ;;  %v1399_v33 = vld [vmem:[%s1834_s7 + $0x60] sm:$0xff]   ;;  %v1403_v37 = vld [vmem:[%s1834_s7 + $0x68] sm:$0xff]  }
  0xa1   : > { %1277 = vmatprep.subr.bf16.mxu1 %v1388_v22  ;;  %v1396_v30 = vld [vmem:[%s1834_s7 + $0xd8] sm:$0xff]   ;;  %v1400_v34 = vld [vmem:[%s1834_s7 + $0xe0] sm:$0xff]   ;;  %v1404_v38 = vld [vmem:[%s1834_s7 + $0xe8] sm:$0xff]  }
  0xa2   : > { %v1397_v31 = vld [vmem:[%s1834_s7 + $0x18] sm:$0xff]   ;;  %v1401_v35 = vld [vmem:[%s1834_s7 + $0x20] sm:$0xff]   ;;  %v1405_v39 = vld [vmem:[%s1834_s7 + $0x28] sm:$0xff]  }
  0xa3   : > { %1238 = vmatpush3.bf16.msra.mxu0 %v1389_v23  ;;  %v1398_v32 = vld [vmem:[%s1834_s7 + $0x98] sm:$0xff]   ;;  %v1402_v36 = vld [vmem:[%s1834_s7 + $0xa0] sm:$0xff]   ;;  %v1406_v40 = vld [vmem:[%s1834_s7 + $0xa8] sm:$0xff]  }
  0xa4   : > { %1278 = vmatpush3.bf16.msra.mxu1 %v1390_v24  ;;  %1239 = vmatprep.subr.bf16.mxu0 %v1391_v25  ;;  %v1407_v41 = vld [vmem:[%s1834_s7 + $0x70] sm:$0xff]   ;;  %v1411_v45 = vld [vmem:[%s1834_s7 + $0x78] sm:$0xff]   ;;  %v353_v10 = vld [vmem:[#allocation2] sm:$0xff] }
  0xa5   : > { %1279 = vmatprep.subr.bf16.mxu1 %v1392_v26  ;;  %v1408_v42 = vld [vmem:[%s1834_s7 + $0xf0] sm:$0xff]   ;;  %v1412_v46 = vld [vmem:[%s1834_s7 + $0xf8] sm:$0xff]   ;;  %v354_v15 = vld [vmem:[#allocation2 + $0x8] sm:$0xff] }
  0xa6   : > { %v1409_v43 = vld [vmem:[%s1834_s7 + $0x30] sm:$0xff]   ;;  %v1413_v47 = vld [vmem:[%s1834_s7 + $0x38] sm:$0xff]  }
  0xa7   : > { %1240 = vmatpush3.bf16.msra.mxu0 %v1393_v27  ;;  %v1410_v44 = vld [vmem:[%s1834_s7 + $0xb0] sm:$0xff]   ;;  %v1414_v48 = vld [vmem:[%s1834_s7 + $0xb8] sm:$0xff]  }
  0xa8   : > { %1280 = vmatpush3.bf16.msra.mxu1 %v1394_v28  ;;  %1241 = vmatprep.subr.bf16.mxu0 %v1395_v29  ;;  %v1415_v49 = vld [vmem:[%s1832_s21] ss:$16 sps:$4 sm:$0xff]   ;;  %v1417_v50 = vld [vmem:[%s1832_s21 + $0x4] ss:$16 sps:$4 sm:$0xff]   ;;  %v1418_v51 = vld [vmem:[%s1832_s21 + $0x8] ss:$16 sps:$4 sm:$0xff]  }
  0xa9   : > { %1281 = vmatprep.subr.bf16.mxu1 %v1396_v30  ;;  %v1420_v52 = vld [vmem:[%s1832_s21 + $0xc] ss:$16 sps:$4 sm:$0xff]   ;;  %745 = vmatprep.mubr.bf16.mxu0 %v1417_v50  ;;  %v1421_v53 = vld [vmem:[%s1832_s21 + $0x24] ss:$16 sps:$4 sm:$0xff]   ;;  %v1425_v55 = vld [vmem:[%s1832_s21 + $0x20] ss:$16 sps:$4 sm:$0xff]  }
  0xaa   : > { %810 = vmatprep.mubr.bf16.mxu1 %v1420_v52  ;;  %v1423_v54 = vld [vmem:[%s1832_s21 + $0x2c] ss:$16 sps:$4 sm:$0xff]   ;;  %v1426_v56 = vld [vmem:[%s1832_s21 + $0x28] ss:$16 sps:$4 sm:$0xff]   ;;  %v1427_v57 = vld [vmem:[%s1832_s21 + $0x44] ss:$16 sps:$4 sm:$0xff]  }
  0xab   : > { %1242 = vmatpush3.bf16.msra.mxu0 %v1397_v31  ;;  %v1429_v58 = vld [vmem:[%s1832_s21 + $0x4c] ss:$16 sps:$4 sm:$0xff]   ;;  %v1431_v59 = vld [vmem:[%s1832_s21 + $0x40] ss:$16 sps:$4 sm:$0xff]   ;;  %v1432_v60 = vld [vmem:[%s1832_s21 + $0x48] ss:$16 sps:$4 sm:$0xff]  }
  0xac   : > { %1282 = vmatpush3.bf16.msra.mxu1 %v1398_v32  ;;  %1243 = vmatprep.subr.bf16.mxu0 %v1399_v33  ;;  %v1433_v61 = vld [vmem:[%s1832_s21 + $0x64] ss:$16 sps:$4 sm:$0xff]   ;;  %v1435_v62 = vld [vmem:[%s1832_s21 + $0x6c] ss:$16 sps:$4 sm:$0xff]   ;;  %v1437_v63 = vld [vmem:[%s1832_s21 + $0x60] ss:$16 sps:$4 sm:$0xff]  }
  0xad   : > { %1283 = vmatprep.subr.bf16.mxu1 %v1400_v34  ;;  %v1438_v0 = vld [vmem:[%s1832_s21 + $0x68] ss:$16 sps:$4 sm:$0xff]   ;;  %v355_v28 = vld [vmem:[#allocation2 + $0x10] sm:$0xff] }
  0xae   : > { %v356_v33 = vld [vmem:[#allocation2 + $0x18] sm:$0xff] }
  0xaf   : > { %1244 = vmatpush3.bf16.msra.mxu0 %v1401_v35 }
  0xb0   : > { %1284 = vmatpush3.bf16.msra.mxu1 %v1402_v36  ;;  %1245 = vmatprep.subr.bf16.mxu0 %v1403_v37 }
  0xb1   : > { %1285 = vmatprep.subr.bf16.mxu1 %v1404_v38 }
  0xb3   : > { %1246 = vmatpush3.bf16.msra.mxu0 %v1405_v39 }
  0xb4   : > { %1286 = vmatpush3.bf16.msra.mxu1 %v1406_v40  ;;  %1247 = vmatprep.subr.bf16.mxu0 %v1407_v41 }
  0xb5   : > { %1287 = vmatprep.subr.bf16.mxu1 %v1408_v42 }
  0xb7   : > { %1248 = vmatpush3.bf16.msra.mxu0 %v1409_v43 }
  0xb8   : > { %1288 = vmatpush3.bf16.msra.mxu1 %v1410_v44  ;;  %1249 = vmatprep.subr.bf16.mxu0 %v1411_v45 }
  0xb9   : > { %1289 = vmatprep.subr.bf16.mxu1 %v1412_v46  ;;  %v357_v46 = vld [vmem:[#allocation2 + $0x20] sm:$0xff] }
  0xbb   : > { %1250 = vmatpush3.bf16.msra.mxu0 %v1413_v47 }
  0xbc   : > { %1290 = vmatpush3.bf16.msra.mxu1 %v1414_v48 }
  0xbe   : > { %746 = vmatmul.mubr.bf16.vlgmr.msra.gmra.mrb[0].mxu0 %v1415_v49 }
  0xbf   : > { %811 = vmatmul.mubr.bf16.vlgmr.msra.gmra.mrb[0].mxu1 %v1418_v51  ;;  %753 = vmatprep.mubr.bf16.mxu0 %v1421_v53  ;;  %v358_v51 = vld [vmem:[#allocation2 + $0x28] sm:$0xff] }
  0xc0   : > { %818 = vmatprep.mubr.bf16.mxu1 %v1423_v54 }
  0xc6   : > { %754 = vmatmul.mubr.bf16.gmra.mrb[4].mxu0 %v1425_v55 }
  0xc7   : > { %819 = vmatmul.mubr.bf16.gmra.mrb[4].mxu1 %v1426_v56  ;;  %761 = vmatprep.mubr.bf16.mxu0 %v1427_v57 }
  0xc8   : > { %826 = vmatprep.mubr.bf16.mxu1 %v1429_v58 }
  0xce   : > { %762 = vmatmul.mubr.bf16.gmra.mrb[8].mxu0 %v1431_v59 }
  0xcf   : > { %827 = vmatmul.mubr.bf16.gmra.mrb[8].mxu1 %v1432_v60  ;;  %769 = vmatprep.mubr.bf16.mxu0 %v1433_v61 }
  0xd0   : > { %834 = vmatprep.mubr.bf16.mxu1 %v1435_v62 }
  0xd6   : > { %770 = vmatmul.mubr.bf16.gmra.mrb[12].mxu0 %v1437_v63 }
  0xd7   : > { %835 = vmatmul.mubr.bf16.gmra.mrb[12].mxu1 %v1438_v0  ;;  %v359_v0 = vld [vmem:[#allocation2 + $0x30] sm:$0xff] }
 0x191   : > { %v1251_v1 = vpop.f32.mrb[0].mxu0 }
 0x192   : > { %v1291_v2 = vpop.f32.mrb[0].mxu1  ;;  %v1252_v3 = vpop.f32.mrb[1].mxu0 }
 0x193   : > { %v1253_v4 = vadd.f32 %v1252_v3, %v1251_v1  ;;  %v1292_v5 = vpop.f32.mrb[1].mxu1  ;;  %v1254_v6 = vpop.f32.mrb[2].mxu0 }
 0x194   : > { %v1293_v7 = vadd.f32 %v1292_v5, %v1291_v2  ;;  %v1294_v8 = vpop.f32.mrb[2].mxu1  ;;  %v1255_v9 = vpop.f32.mrb[3].mxu0  ;;  %v360_v5 = vld [vmem:[#allocation2 + $0x38] sm:$0xff] }
 0x195   : > { %v1256_v11 = vadd.f32 %v1255_v9, %v1254_v6  ;;  %v1295_v12 = vpop.f32.mrb[3].mxu1 }
 0x196   : > { %v813_v13 = vadd.f32 %v1293_v7, %v1253_v4  ;;  %v1296_v14 = vadd.f32 %v1295_v12, %v1294_v8 }
 0x198   : > { %v843_v16 = vadd.f32 %v813_v13, %v353_v10  ;;  %v816_v17 = vadd.f32 %v1296_v14, %v1256_v11  ;;  %v1189_v13 = vld [vmem:[#allocation6] ss:$0 sm:$0xff] (!%p1188_p7) }
 0x199   : > { %v1257_v18 = vpop.f32.mrb[4].mxu0 }
 0x19a   : > { %851 = vst [vmem:[#allocation2] sm:$0xff] %v843_v16  ;;  %v844_v19 = vadd.f32 %v816_v17, %v354_v15  ;;  %v1297_v20 = vpop.f32.mrb[4].mxu1  ;;  %v1258_v21 = vpop.f32.mrb[5].mxu0 }
 0x19b   : > { %v1259_v22 = vadd.f32 %v1258_v21, %v1257_v18  ;;  %v1298_v23 = vpop.f32.mrb[5].mxu1  ;;  %v1260_v24 = vpop.f32.mrb[6].mxu0 }
 0x19c   : > { %852 = vst [vmem:[#allocation2 + $0x8] sm:$0xff] %v844_v19  ;;  %v1299_v25 = vadd.f32 %v1298_v23, %v1297_v20  ;;  %v1300_v26 = vpop.f32.mrb[6].mxu1  ;;  %v1261_v27 = vpop.f32.mrb[7].mxu0 }
 0x19d   : > { %v1262_v29 = vadd.f32 %v1261_v27, %v1260_v24  ;;  %v1301_v30 = vpop.f32.mrb[7].mxu1 }
 0x19e   : > { %v821_v31 = vadd.f32 %v1299_v25, %v1259_v22  ;;  %v1302_v32 = vadd.f32 %v1301_v30, %v1300_v26 }
 0x1a0   : > { %v845_v34 = vadd.f32 %v821_v31, %v355_v28  ;;  %v824_v35 = vadd.f32 %v1302_v32, %v1262_v29 }
 0x1a1   : > { %v1263_v36 = vpop.f32.mrb[8].mxu0  ;;  %v863_v9 = vld [vmem:[#allocation2] sm:$0xff] (!%p1188_p7) }
 0x1a2   : > { %853 = vst [vmem:[#allocation2 + $0x10] sm:$0xff] %v845_v34  ;;  %v846_v37 = vadd.f32 %v824_v35, %v356_v33  ;;  %v1303_v38 = vpop.f32.mrb[8].mxu1  ;;  %v1264_v39 = vpop.f32.mrb[9].mxu0  ;;  %v878_v14 = vadd.f32 (!%p1188_p7), %v1189_v13, %v863_v9 }
 0x1a3   : > { %v1265_v40 = vadd.f32 %v1264_v39, %v1263_v36  ;;  %v1304_v41 = vpop.f32.mrb[9].mxu1  ;;  %v1266_v42 = vpop.f32.mrb[10].mxu0  ;;  %v864_v10 = vld [vmem:[#allocation2 + $0x8] sm:$0xff] (!%p1188_p7) }
 0x1a4   : > { %854 = vst [vmem:[#allocation2 + $0x18] sm:$0xff] %v846_v37  ;;  %v1305_v43 = vadd.f32 %v1304_v41, %v1303_v38  ;;  %v1306_v44 = vpop.f32.mrb[10].mxu1  ;;  %v1267_v45 = vpop.f32.mrb[11].mxu0  ;;  %v879_v15 = vadd.f32 (!%p1188_p7), %v1189_v13, %v864_v10 }
 0x1a5   : > { %v1268_v47 = vadd.f32 %v1267_v45, %v1266_v42  ;;  %v1307_v48 = vpop.f32.mrb[11].mxu1 }
 0x1a6   : > { %v829_v49 = vadd.f32 %v1305_v43, %v1265_v40  ;;  %v1308_v50 = vadd.f32 %v1307_v48, %v1306_v44  ;;  %v886_v19 = vadd.f32 (!%p1188_p7), %v879_v15, %v878_v14 }
 0x1a8   : > { %v847_v52 = vadd.f32 %v829_v49, %v357_v46  ;;  %v832_v53 = vadd.f32 %v1308_v50, %v1268_v47 }
 0x1a9   : > { %v1269_v54 = vpop.f32.mrb[12].mxu0  ;;  %v865_v11 = vld [vmem:[#allocation2 + $0x10] sm:$0xff] (!%p1188_p7) }
 0x1aa   : > { %855 = vst [vmem:[#allocation2 + $0x20] sm:$0xff] %v847_v52  ;;  %v848_v55 = vadd.f32 %v832_v53, %v358_v51  ;;  %v1309_v56 = vpop.f32.mrb[12].mxu1  ;;  %v1270_v57 = vpop.f32.mrb[13].mxu0  ;;  %v880_v16 = vadd.f32 (!%p1188_p7), %v1189_v13, %v865_v11 }
 0x1ab   : > { %v1271_v58 = vadd.f32 %v1270_v57, %v1269_v54  ;;  %v1310_v59 = vpop.f32.mrb[13].mxu1  ;;  %v1272_v60 = vpop.f32.mrb[14].mxu0  ;;  %v866_v12 = vld [vmem:[#allocation2 + $0x18] sm:$0xff] (!%p1188_p7) }
 0x1ac   : > { %856 = vst [vmem:[#allocation2 + $0x28] sm:$0xff] %v848_v55  ;;  %v1311_v61 = vadd.f32 %v1310_v59, %v1309_v56  ;;  %v1312_v62 = vpop.f32.mrb[14].mxu1  ;;  %v1273_v63 = vpop.f32.mrb[15].mxu0  ;;  %v881_v18 = vadd.f32 (!%p1188_p7), %v1189_v13, %v866_v12  ;;  %v887_v22 = vadd.f32 (!%p1188_p7), %v886_v19, %v880_v16 }
 0x1ad   : > { %v1274_v1 = vadd.f32 %v1273_v63, %v1272_v60  ;;  %v1313_v2 = vpop.f32.mrb[15].mxu1 }
 0x1ae   : > { %v837_v3 = vadd.f32 %v1311_v61, %v1271_v58  ;;  %v1314_v4 = vadd.f32 %v1313_v2, %v1312_v62  ;;  %862 = sbr.rel (%p1188_p7) target bundleno = 524 (0x20c), region = 87  ;;  %v888_v25 = vadd.f32 (!%p1188_p7), %v887_v22, %v881_v18 }
 0x1b0   : > { %v849_v6 = vadd.f32 %v837_v3, %v359_v0  ;;  %v840_v7 = vadd.f32 %v1314_v4, %v1274_v1 }
 0x1b1   : > { %v867_v17 = vld [vmem:[#allocation2 + $0x20] sm:$0xff] (!%p1188_p7) }
 0x1b2   : > { %857 = vst [vmem:[#allocation2 + $0x30] sm:$0xff] %v849_v6  ;;  %v850_v8 = vadd.f32 %v840_v7, %v360_v5  ;;  %v882_v21 = vadd.f32 (!%p1188_p7), %v1189_v13, %v867_v17 }
 0x1b3   : > { %v868_v20 = vld [vmem:[#allocation2 + $0x28] sm:$0xff] (!%p1188_p7) }
 0x1b4   : > { %858 = vst [vmem:[#allocation2 + $0x38] sm:$0xff] %v850_v8  ;;  %v883_v24 = vadd.f32 (!%p1188_p7), %v1189_v13, %v868_v20  ;;  %v889_v28 = vadd.f32 (!%p1188_p7), %v888_v25, %v882_v21  ;;  %v1190_v8 = vld [vmem:[#allocation8] ss:$0 sm:$0xff] (!%p1188_p7) }
 0x1b6   : > { %v890_v30 = vadd.f32 %v889_v28, %v883_v24 }
 0x1b9   : > { %v869_v23 = vld [vmem:[#allocation2 + $0x30] sm:$0xff] }
 0x1ba   : > { %v884_v27 = vadd.f32 %v1189_v13, %v869_v23 }
 0x1bb   : > { %v870_v26 = vld [vmem:[#allocation2 + $0x38] sm:$0xff] }
 0x1bc   : > { %v885_v29 = vadd.f32 %v1189_v13, %v870_v26  ;;  %v891_v31 = vadd.f32 %v890_v30, %v884_v27  ;;  %v1191_v13 = vld [vmem:[#allocation9] ss:$0 sm:$0xff] }
 0x1be   : > { %v892_v32 = vadd.f32 %v891_v31, %v885_v29 }
 0x1c0   : > { %v893_v33 = vrot.slane %v892_v32, 4 }
 0x1c2   : > { %v894_v34 = vadd.f32 %v893_v33, %v892_v32 }
 0x1c4   : > { %v895_v35 = vrot.slane %v894_v34, 2 }
 0x1c6   : > { %v896_v36 = vadd.f32 %v895_v35, %v894_v34 }
 0x1c8   : > { %v897_v37 = vrot.slane %v896_v36, 1 }
 0x1ca   : > { %v898_v38 = vadd.f32 %v897_v37, %v896_v36 }
 0x1cc   : > { %v900_v39 = vmul.f32 0.015625, %v898_v38 }
 0x1ce   : > { %v901_v40 = vsub.f32 %v878_v14, %v900_v39  ;;  %v902_v41 = vsub.f32 %v879_v15, %v900_v39  ;;  %v903_v42 = vsub.f32 %v880_v16, %v900_v39  ;;  %v904_v43 = vsub.f32 %v881_v18, %v900_v39 }
 0x1cf   : > { %v905_v44 = vsub.f32 %v882_v21, %v900_v39  ;;  %v906_v48 = vsub.f32 %v883_v24, %v900_v39  ;;  %v907_v51 = vsub.f32 %v884_v27, %v900_v39  ;;  %v908_v54 = vsub.f32 %v885_v29, %v900_v39 }
 0x1d0   : > { %v909_v45 = vmul.f32 %v901_v40, %v901_v40  ;;  %v910_v46 = vmul.f32 %v902_v41, %v902_v41  ;;  %v911_v47 = vmul.f32 %v903_v42, %v903_v42  ;;  %v912_v49 = vmul.f32 %v904_v43, %v904_v43 }
 0x1d1   : > { %v913_v52 = vmul.f32 %v905_v44, %v905_v44  ;;  %v914_v55 = vmul.f32 %v906_v48, %v906_v48  ;;  %v915_v57 = vmul.f32 %v907_v51, %v907_v51  ;;  %v916_v59 = vmul.f32 %v908_v54, %v908_v54 }
 0x1d2   : > { %v917_v50 = vadd.f32 %v910_v46, %v909_v45 }
 0x1d4   : > { %v918_v53 = vadd.f32 %v917_v50, %v911_v47 }
 0x1d6   : > { %v919_v56 = vadd.f32 %v918_v53, %v912_v49 }
 0x1d8   : > { %v920_v58 = vadd.f32 %v919_v56, %v913_v52 }
 0x1da   : > { %v921_v60 = vadd.f32 %v920_v58, %v914_v55 }
 0x1dc   : > { %v922_v61 = vadd.f32 %v921_v60, %v915_v57 }
 0x1de   : > { %v923_v62 = vadd.f32 %v922_v61, %v916_v59 }
 0x1e0   : > { %v924_v63 = vrot.slane %v923_v62, 4 }
 0x1e2   : > { %v925_v0 = vadd.f32 %v924_v63, %v923_v62 }
 0x1e4   : > { %v926_v1 = vrot.slane %v925_v0, 2 }
 0x1e6   : > { %v927_v2 = vadd.f32 %v926_v1, %v925_v0 }
 0x1e8   : > { %v928_v3 = vrot.slane %v927_v2, 1 }
 0x1ea   : > { %v929_v4 = vadd.f32 %v928_v3, %v927_v2 }
 0x1ec   : > { %v930_v5 = vmul.f32 0.015625, %v929_v4 }
 0x1ee   : > { %v931_v6 = vadd.f32 1e-05, %v930_v5 }
 0x1f0   : > { %1439 = vrsqrt.f32 %v931_v6 }
 0x1fa   : > { %v1440_v7 = vpop.eup %1439 }
 0x1fb   : > { %v933_v9 = vmul.f32 %v1440_v7, %v901_v40  ;;  %v934_v10 = vmul.f32 %v1440_v7, %v902_v41  ;;  %v935_v11 = vmul.f32 %v1440_v7, %v903_v42  ;;  %v936_v12 = vmul.f32 %v1440_v7, %v904_v43 }
 0x1fc   : > { %v937_v14 = vmul.f32 %v1440_v7, %v905_v44  ;;  %v938_v15 = vmul.f32 %v1440_v7, %v906_v48  ;;  %v939_v16 = vmul.f32 %v1440_v7, %v907_v51  ;;  %v940_v17 = vmul.f32 %v1440_v7, %v908_v54 }
 0x1fd   : > { %v948_v18 = vmul.f32 %v1190_v8, %v933_v9  ;;  %v949_v19 = vmul.f32 %v1190_v8, %v934_v10  ;;  %v950_v20 = vmul.f32 %v1190_v8, %v935_v11  ;;  %v951_v21 = vmul.f32 %v1190_v8, %v936_v12 }
 0x1fe   : > { %v952_v22 = vmul.f32 %v1190_v8, %v937_v14  ;;  %v953_v23 = vmul.f32 %v1190_v8, %v938_v15  ;;  %v954_v24 = vmul.f32 %v1190_v8, %v939_v16  ;;  %v955_v25 = vmul.f32 %v1190_v8, %v940_v17 }
 0x1ff   : > { %v963_v26 = vadd.f32 %v1191_v13, %v948_v18  ;;  %v964_v27 = vadd.f32 %v1191_v13, %v949_v19  ;;  %v965_v28 = vadd.f32 %v1191_v13, %v950_v20  ;;  %v966_v29 = vadd.f32 %v1191_v13, %v951_v21 }
 0x200   : > { %v967_v30 = vadd.f32 %v1191_v13, %v952_v22  ;;  %v968_v31 = vadd.f32 %v1191_v13, %v953_v23  ;;  %v969_v32 = vadd.f32 %v1191_v13, %v954_v24  ;;  %v970_v33 = vadd.f32 %v1191_v13, %v955_v25 }
 0x201   : > { %vm971_vm0 = vcmp.gt.f32.partialorder %v963_v26, 0.0  ;;  %vm972_vm1 = vcmp.gt.f32.partialorder %v964_v27, 0.0  ;;  %v979_v34 = vmul.f32 0.2, %v963_v26  ;;  %v980_v35 = vmul.f32 0.2, %v964_v27 }
 0x202   : > { %vm973_vm2 = vcmp.gt.f32.partialorder %v965_v28, 0.0  ;;  %vm974_vm3 = vcmp.gt.f32.partialorder %v966_v29, 0.0  ;;  %v981_v36 = vmul.f32 0.2, %v965_v28  ;;  %v982_v37 = vmul.f32 0.2, %v966_v29 }
 0x203   : > { %v987_v38 = vsel %vm971_vm0, %v963_v26, %v979_v34  ;;  %v988_v39 = vsel %vm972_vm1, %v964_v27, %v980_v35  ;;  %vm975_vm4 = vcmp.gt.f32.partialorder %v967_v30, 0.0  ;;  %vm976_vm5 = vcmp.gt.f32.partialorder %v968_v31, 0.0 }
 0x204   : > { %v1215_v40 = vpack.c.bf16 %v988_v39, %v987_v38  ;;  %v989_v41 = vsel %vm973_vm2, %v965_v28, %v981_v36  ;;  %v990_v42 = vsel %vm974_vm3, %v966_v29, %v982_v37  ;;  %v983_v43 = vmul.f32 0.2, %v967_v30 }
 0x205   : > { %v1220_v44 = vpack.c.bf16 %v990_v42, %v989_v41  ;;  %v984_v45 = vmul.f32 0.2, %v968_v31  ;;  %vm977_vm6 = vcmp.gt.f32.partialorder %v969_v32, 0.0  ;;  %vm978_vm7 = vcmp.gt.f32.partialorder %v970_v33, 0.0 }
 0x206   : > { %1216 = vst [vmem:[%s1929_s5] sm:$0xff] %v1215_v40   ;;  %v991_v46 = vsel %vm975_vm4, %v967_v30, %v983_v43  ;;  %v985_v47 = vmul.f32 0.2, %v969_v32  ;;  %v986_v48 = vmul.f32 0.2, %v970_v33 }
 0x207   : > { %1232 = vst [vmem:[%s1929_s5 + $0x8] sm:$0xff] %v1220_v44   ;;  %v992_v49 = vsel %vm976_vm5, %v968_v31, %v984_v45 }
 0x208   : > { %v1225_v50 = vpack.c.bf16 %v992_v49, %v991_v46  ;;  %v993_v51 = vsel %vm977_vm6, %v969_v32, %v985_v47  ;;  %v994_v52 = vsel %vm978_vm7, %v970_v33, %v986_v48 }
 0x209   : > { %v1230_v53 = vpack.c.bf16 %v994_v52, %v993_v51 }
 0x20a   : > { %1233 = vst [vmem:[%s1929_s5 + $0x10] sm:$0xff] %v1225_v50  }
 0x20b   : > { %1234 = vst [vmem:[%s1929_s5 + $0x18] sm:$0xff] %v1230_v53  }
 0x20c PF: > { %p17_p11 = scmp.ge.s32.totalorder %s1656_s23, 6   ;;  %s1948_s18 = smov %s1587_s19 }
 0x20d   : > { %s1949_s19 = smov %s1591_s20  ;;  %s1950_s20 = smov %s1666_s26 }
 0x20e   : > { %s1951_s21 = smov %s1656_s23  ;;  %19 = sbr.rel (!%p17_p11) target bundleno = 5 (0x5), region = 127 }
 0x215   :  { %1046 = vsyncpa [#allocation5], 1 }
 0x216   :  { %1048 = vsyncpa [#allocation5 + $0x1], 1 }
 0x217   :  { %1049 = vsyncpa [#allocation7], 1 }
 0x218   :  { %1050 = vsyncpa [#allocation10], 1 }

// kernel: discriminator_forward.5
= control target key start
LH: loop header
LB: loop body
LE: loop exit
PB: predicated region body
PF: predicated region fallthrough
CT: control target
= control target key end

     0   :  { %s3927_s24 = smov 0   ;;  %s4587_s0 = inlined_call_operand.vmem [shape: bf16[4,2048], index: 0, kind: input, shape index: {}]   ;;  %s4588_s1 = inlined_call_operand.vmem [shape: bf16[2048,1024], index: 1, kind: input, shape index: {}]   ;;  %s4589_s2 = inlined_call_operand.vmem [shape: f32[1,1024], index: 2, kind: input, shape index: {}]   ;;  %s4590_s3 = inlined_call_operand.vmem [shape: f32[1,1024], index: 3, kind: input, shape index: {}]   ;;  %s4591_s4 = inlined_call_operand.vmem [shape: f32[1,1024], index: 4, kind: input, shape index: {}]   ;;  %s4592_s5 = inlined_call_operand.vmem [shape: bf16[1024,128], index: 5, kind: input, shape index: {}]   ;;  %s4593_s6 = inlined_call_operand.vmem [shape: f32[1,128], index: 6, kind: input, shape index: {}]   ;;  %s4594_s7 = inlined_call_operand.vmem [shape: f32[4,128], index: 7, kind: output, shape index: {}]  }
   0x1 LB: > { %s3933_s25 = sadd.s32 4294967295, %s3883_s24   ;;  %p3345_p0 = scmp.ge.s32.totalorder %s3883_s24, 1  ;;  %s3883_s24 = sphi %s3927_s24, %s17_s24  }
   0x2   : > { %p245_p1 = scmp.lt.s32.totalorder %s3883_s24, 5 }
   0x4   : > { %p246_p2 = pnand %p3345_p0, %p245_p1 }
   0x5   : > { %s3346_s26 = sshll.u32 (!%p246_p2), %s3933_s25, 2  ;;  %s3348_s27 = sshll.u32 (!%p246_p2), %s3933_s25, 6 }
   0x6   : > { %249 = sbr.rel (%p246_p2) target bundleno = 989 (0x3dd), region = 48  ;;  %p279_p3 = scmp.lt.s32.totalorder (!%p246_p2), %s3346_s26, 15 }
   0x7   : > { %p285_p4 = scmp.lt.s32.totalorder (!%p246_p2), %s3348_s27, 255  ;;  %p3351_p5 = scmp.ne.s32.totalorder (!%p246_p2), %s3933_s25, 0 }
   0xd   : > { %s4596_s26 = smov (!%p279_p3, %s3346_s26), 15  ;;  %s4598_s27 = smov (!%p285_p4, %s3348_s27), 255 }
   0xe   : > { %s3347_s28 = sshll.u32 %s4596_s26, 1  ;;  %s3677_s9 = sshll.u32 %s4598_s27, 5  ;;  %v3885_v0 = vmov (!%p3351_p5), 0.0  }
   0xf   : > { %s3942_s8 = scalar_lea.vmem %s4587_s0, %s3347_s28  ;;  %s3947_s12 = scalar_lea.vmem %s4588_s1, %s3677_s9  ;;  %296 = vst [vmem:[#allocation2] sm:$0xff] (!%p3351_p5), %v3885_v0  ;;  %297 = vst [vmem:[#allocation2 + $0x8] sm:$0xff] (!%p3351_p5), %v3885_v0 }
  0x10   : > { %295 = sbr.rel (%p3351_p5) target bundleno = 23 (0x17), region = 52  ;;  %298 = vst [vmem:[#allocation2 + $0x10] sm:$0xff] (!%p3351_p5), %v3885_v0  ;;  %299 = vst [vmem:[#allocation2 + $0x18] sm:$0xff] (!%p3351_p5), %v3885_v0 }
  0x17 PF: > { %v305_v1 = vld [vmem:[%s3947_s12] sm:$0xff]  ;;  %v306_v3 = vld [vmem:[%s3947_s12 + $0x8] sm:$0xff]  ;;  %v3886_v33 = vmov 1983009808   ;;  %v566_v35 = vlaneseq  ;;  %p3608_p6 = scmp.ne.s32.totalorder %s3933_s25, 3 }
  0x18   : > { %v309_v2 = vld [vmem:[%s3947_s12 + $0x20] sm:$0xff]  ;;  %v310_v5 = vld [vmem:[%s3947_s12 + $0x28] sm:$0xff]  ;;  %v564_v34 = vunpack.c.l.s4 %v3886_v33  ;;  %vm2281_vm0 = vcmask (!%p3608_p6), 1043456  }
  0x19   : > { %v3353_v4 = vcombine.high %v305_v1, %v309_v2  ;;  %v3352_v6 = vcombine.low %v305_v1, %v309_v2  ;;  %v313_v7 = vld [vmem:[%s3947_s12 + $0x40] sm:$0xff]  ;;  %v3355_v9 = vcombine.high %v306_v3, %v310_v5  ;;  %v3354_v10 = vcombine.low %v306_v3, %v310_v5  ;;  %v314_v12 = vld [vmem:[%s3947_s12 + $0x48] sm:$0xff] }
  0x1a   : > { %v317_v8 = vld [vmem:[%s3947_s12 + $0x60] sm:$0xff]  ;;  %v318_v13 = vld [vmem:[%s3947_s12 + $0x68] sm:$0xff]  ;;  %v565_v44 = vunpack.c.0.s8 %v564_v34  ;;  %v3973_v45 = vshrl.u32 %v566_v35, 7 }
  0x1b   : > { %v3361_v11 = vcombine.high %v313_v7, %v317_v8  ;;  %v321_v14 = vld [vmem:[%s3947_s12 + $0x80] sm:$0xff]  ;;  %1863 = vmatprep.subr.bf16.mxu0 %v3353_v4  ;;  %v3363_v15 = vcombine.high %v314_v12, %v318_v13  ;;  %v322_v17 = vld [vmem:[%s3947_s12 + $0x88] sm:$0xff]  ;;  %1945 = vmatprep.subr.bf16.mxu1 %v3355_v9  ;;  %v3360_v19 = vcombine.low %v313_v7, %v317_v8 }
  0x1c   : > { %v325_v16 = vld [vmem:[%s3947_s12 + $0xa0] sm:$0xff]  ;;  %v326_v18 = vld [vmem:[%s3947_s12 + $0xa8] sm:$0xff]  ;;  %1864 = vmatpush1.bf16.msra.mxu0 %v3352_v6  ;;  %1946 = vmatpush1.bf16.msra.mxu1 %v3354_v10  ;;  %v3362_v20 = vcombine.low %v314_v12, %v318_v13  ;;  %v3980_v54 = vsub.s32 %v565_v44, %v3973_v45 }
  0x1d   : > { %1865 = vmatprep.subr.bf16.mxu0 %v3361_v11  ;;  %v3369_v21 = vcombine.high %v321_v14, %v325_v16  ;;  %1947 = vmatprep.subr.bf16.mxu1 %v3363_v15  ;;  %v3371_v22 = vcombine.high %v322_v17, %v326_v18  ;;  %v329_v23 = vld [vmem:[%s3947_s12 + $0xc0] sm:$0xff]  ;;  %v330_v25 = vld [vmem:[%s3947_s12 + $0xc8] sm:$0xff]  ;;  %v3368_v27 = vcombine.low %v321_v14, %v325_v16 }
  0x1e   : > { %v333_v24 = vld [vmem:[%s3947_s12 + $0xe0] sm:$0xff]  ;;  %v334_v26 = vld [vmem:[%s3947_s12 + $0xe8] sm:$0xff]  ;;  %v3370_v28 = vcombine.low %v322_v17, %v326_v18 }
  0x1f   : > { %v3377_v29 = vcombine.high %v329_v23, %v333_v24  ;;  %v3379_v30 = vcombine.high %v330_v25, %v334_v26  ;;  %v337_v31 = vld [vmem:[%s3947_s12 + $0x100] sm:$0xff]  ;;  %v338_v36 = vld [vmem:[%s3947_s12 + $0x108] sm:$0xff]  ;;  %v3376_v38 = vcombine.low %v329_v23, %v333_v24  ;;  %v3378_v39 = vcombine.low %v330_v25, %v334_v26 }
  0x20   : > { %1866 = vmatpush1.bf16.msra.mxu0 %v3360_v19  ;;  %1948 = vmatpush1.bf16.msra.mxu1 %v3362_v20  ;;  %v341_v32 = vld [vmem:[%s3947_s12 + $0x120] sm:$0xff]  ;;  %v342_v37 = vld [vmem:[%s3947_s12 + $0x128] sm:$0xff] }
  0x21   : > { %1867 = vmatprep.subr.bf16.mxu0 %v3369_v21  ;;  %1949 = vmatprep.subr.bf16.mxu1 %v3371_v22  ;;  %v3385_v40 = vcombine.high %v337_v31, %v341_v32  ;;  %v3387_v41 = vcombine.high %v338_v36, %v342_v37  ;;  %v345_v42 = vld [vmem:[%s3947_s12 + $0x140] sm:$0xff]  ;;  %v346_v46 = vld [vmem:[%s3947_s12 + $0x148] sm:$0xff]  ;;  %v3384_v48 = vcombine.low %v337_v31, %v341_v32 }
  0x22   : > { %v349_v43 = vld [vmem:[%s3947_s12 + $0x160] sm:$0xff]  ;;  %v350_v47 = vld [vmem:[%s3947_s12 + $0x168] sm:$0xff]  ;;  %v3386_v49 = vcombine.low %v338_v36, %v342_v37 }
  0x23   : > { %v3393_v50 = vcombine.high %v345_v42, %v349_v43  ;;  %v3395_v51 = vcombine.high %v346_v46, %v350_v47  ;;  %v353_v52 = vld [vmem:[%s3947_s12 + $0x180] sm:$0xff]  ;;  %v354_v55 = vld [vmem:[%s3947_s12 + $0x188] sm:$0xff]  ;;  %v3392_v57 = vcombine.low %v345_v42, %v349_v43  ;;  %v3394_v58 = vcombine.low %v346_v46, %v350_v47 }
  0x24   : > { %1868 = vmatpush1.bf16.msra.mxu0 %v3368_v27  ;;  %1950 = vmatpush1.bf16.msra.mxu1 %v3370_v28  ;;  %v357_v53 = vld [vmem:[%s3947_s12 + $0x1a0] sm:$0xff]  ;;  %v358_v56 = vld [vmem:[%s3947_s12 + $0x1a8] sm:$0xff] }
  0x25   : > { %1869 = vmatprep.subr.bf16.mxu0 %v3377_v29  ;;  %1951 = vmatprep.subr.bf16.mxu1 %v3379_v30  ;;  %v3401_v59 = vcombine.high %v353_v52, %v357_v53  ;;  %v3985_v60 = vld [vmem:[%s3942_s8] sm:$0xff]  ;;  %v3403_v61 = vcombine.high %v354_v55, %v358_v56  ;;  %v362_v1 = vld [vmem:[%s3947_s12 + $0x1c8] sm:$0xff]  ;;  %v3400_v3 = vcombine.low %v353_v52, %v357_v53 }
  0x26   : > { %v361_v62 = vld [vmem:[%s3947_s12 + $0x1c0] sm:$0xff]  ;;  %v3991_v0 = vrot.slane %v3985_v60, %v3980_v54  ;;  %v366_v2 = vld [vmem:[%s3947_s12 + $0x1e8] sm:$0xff]  ;;  %v3402_v5 = vcombine.low %v354_v55, %v358_v56 }
  0x27   : > { %v365_v63 = vld [vmem:[%s3947_s12 + $0x1e0] sm:$0xff]  ;;  %v3411_v7 = vcombine.high %v362_v1, %v366_v2  ;;  %v370_v10 = vld [vmem:[%s3947_s12 + $0x208] sm:$0xff]  ;;  %v3410_v13 = vcombine.low %v362_v1, %v366_v2 }
  0x28   : > { %1870 = vmatpush1.bf16.msra.mxu0 %v3376_v38  ;;  %1952 = vmatpush1.bf16.msra.mxu1 %v3378_v39  ;;  %v3997_v4 = vcombine.high %v3991_v0, %v3991_v0  ;;  %v3409_v6 = vcombine.high %v361_v62, %v365_v63  ;;  %v369_v8 = vld [vmem:[%s3947_s12 + $0x200] sm:$0xff]  ;;  %v374_v11 = vld [vmem:[%s3947_s12 + $0x228] sm:$0xff]  ;;  %v3408_v12 = vcombine.low %v361_v62, %v365_v63 }
  0x29   : > { %1871 = vmatprep.subr.bf16.mxu0 %v3385_v40  ;;  %1953 = vmatprep.subr.bf16.mxu1 %v3387_v41  ;;  %v373_v9 = vld [vmem:[%s3947_s12 + $0x220] sm:$0xff]  ;;  %v3419_v15 = vcombine.high %v370_v10, %v374_v11  ;;  %v378_v18 = vld [vmem:[%s3947_s12 + $0x248] sm:$0xff]  ;;  %v3418_v21 = vcombine.low %v370_v10, %v374_v11 }
  0x2a   : > { %1895 = vmatprep.mubr.bf16.mxu0 %v3997_v4  ;;  %1977 = vmatprep.mubr.bf16.mxu1 %v3997_v4  ;;  %v3417_v14 = vcombine.high %v369_v8, %v373_v9  ;;  %v377_v16 = vld [vmem:[%s3947_s12 + $0x240] sm:$0xff]  ;;  %v382_v19 = vld [vmem:[%s3947_s12 + $0x268] sm:$0xff]  ;;  %v3416_v20 = vcombine.low %v369_v8, %v373_v9 }
  0x2b   : > { %v381_v17 = vld [vmem:[%s3947_s12 + $0x260] sm:$0xff]  ;;  %v3427_v23 = vcombine.high %v378_v18, %v382_v19  ;;  %v386_v26 = vld [vmem:[%s3947_s12 + $0x288] sm:$0xff]  ;;  %v3426_v29 = vcombine.low %v378_v18, %v382_v19 }
  0x2c   : > { %1872 = vmatpush1.bf16.msra.mxu0 %v3384_v48  ;;  %1954 = vmatpush1.bf16.msra.mxu1 %v3386_v49  ;;  %v3425_v22 = vcombine.high %v377_v16, %v381_v17  ;;  %v385_v24 = vld [vmem:[%s3947_s12 + $0x280] sm:$0xff]  ;;  %v390_v27 = vld [vmem:[%s3947_s12 + $0x2a8] sm:$0xff]  ;;  %v3424_v28 = vcombine.low %v377_v16, %v381_v17  ;;  %v562_v16 = vcombine.high %v3985_v60, %v3985_v60 }
  0x2d   : > { %1873 = vmatprep.subr.bf16.mxu0 %v3393_v50  ;;  %1955 = vmatprep.subr.bf16.mxu1 %v3395_v51  ;;  %v389_v25 = vld [vmem:[%s3947_s12 + $0x2a0] sm:$0xff]  ;;  %v3435_v31 = vcombine.high %v386_v26, %v390_v27  ;;  %v394_v34 = vld [vmem:[%s3947_s12 + $0x2c8] sm:$0xff]  ;;  %v3434_v38 = vcombine.low %v386_v26, %v390_v27 }
  0x2e   : > { %v3433_v30 = vcombine.high %v385_v24, %v389_v25  ;;  %v393_v32 = vld [vmem:[%s3947_s12 + $0x2c0] sm:$0xff]  ;;  %v398_v36 = vld [vmem:[%s3947_s12 + $0x2e8] sm:$0xff]  ;;  %v3432_v37 = vcombine.low %v385_v24, %v389_v25  ;;  %v4042_v25 = vrot.slane %v562_v16, %v3980_v54 }
  0x2f   : > { %v397_v33 = vld [vmem:[%s3947_s12 + $0x2e0] sm:$0xff]  ;;  %v3443_v40 = vcombine.high %v394_v34, %v398_v36  ;;  %v402_v43 = vld [vmem:[%s3947_s12 + $0x308] sm:$0xff]  ;;  %v3442_v47 = vcombine.low %v394_v34, %v398_v36 }
  0x30   : > { %1874 = vmatpush1.bf16.msra.mxu0 %v3392_v57  ;;  %1956 = vmatpush1.bf16.msra.mxu1 %v3394_v58  ;;  %v3441_v39 = vcombine.high %v393_v32, %v397_v33  ;;  %v401_v41 = vld [vmem:[%s3947_s12 + $0x300] sm:$0xff]  ;;  %v406_v44 = vld [vmem:[%s3947_s12 + $0x328] sm:$0xff]  ;;  %v3440_v46 = vcombine.low %v393_v32, %v397_v33  ;;  %v4050_v33 = vcombine.high %v4042_v25, %v4042_v25 }
  0x31   : > { %1875 = vmatprep.subr.bf16.mxu0 %v3401_v59  ;;  %1957 = vmatprep.subr.bf16.mxu1 %v3403_v61  ;;  %v405_v42 = vld [vmem:[%s3947_s12 + $0x320] sm:$0xff]  ;;  %v3451_v49 = vcombine.high %v402_v43, %v406_v44  ;;  %v410_v52 = vld [vmem:[%s3947_s12 + $0x348] sm:$0xff]  ;;  %v3450_v56 = vcombine.low %v402_v43, %v406_v44 }
  0x32   : > { %v3449_v48 = vcombine.high %v401_v41, %v405_v42  ;;  %v409_v50 = vld [vmem:[%s3947_s12 + $0x340] sm:$0xff]  ;;  %v414_v53 = vld [vmem:[%s3947_s12 + $0x368] sm:$0xff]  ;;  %v3448_v55 = vcombine.low %v401_v41, %v405_v42 }
  0x33   : > { %v413_v51 = vld [vmem:[%s3947_s12 + $0x360] sm:$0xff]  ;;  %v3459_v58 = vcombine.high %v410_v52, %v414_v53  ;;  %v418_v62 = vld [vmem:[%s3947_s12 + $0x388] sm:$0xff]  ;;  %v3458_v2 = vcombine.low %v410_v52, %v414_v53 }
  0x34   : > { %1876 = vmatpush1.bf16.msra.mxu0 %v3400_v3  ;;  %1958 = vmatpush1.bf16.msra.mxu1 %v3402_v5  ;;  %v3457_v57 = vcombine.high %v409_v50, %v413_v51  ;;  %v417_v59 = vld [vmem:[%s3947_s12 + $0x380] sm:$0xff]  ;;  %v422_v63 = vld [vmem:[%s3947_s12 + $0x3a8] sm:$0xff]  ;;  %v3456_v1 = vcombine.low %v409_v50, %v413_v51 }
  0x35   : > { %1877 = vmatprep.subr.bf16.mxu0 %v3409_v6  ;;  %1959 = vmatprep.subr.bf16.mxu1 %v3411_v7  ;;  %v421_v61 = vld [vmem:[%s3947_s12 + $0x3a0] sm:$0xff]  ;;  %v3467_v5 = vcombine.high %v418_v62, %v422_v63  ;;  %v426_v8 = vld [vmem:[%s3947_s12 + $0x3c8] sm:$0xff]  ;;  %v3466_v11 = vcombine.low %v418_v62, %v422_v63 }
  0x36   : > { %v3465_v3 = vcombine.high %v417_v59, %v421_v61  ;;  %v425_v6 = vld [vmem:[%s3947_s12 + $0x3c0] sm:$0xff]  ;;  %v430_v9 = vld [vmem:[%s3947_s12 + $0x3e8] sm:$0xff]  ;;  %v3464_v10 = vcombine.low %v417_v59, %v421_v61 }
  0x37   : > { %v429_v7 = vld [vmem:[%s3947_s12 + $0x3e0] sm:$0xff]  ;;  %v434_v17 = vld [vmem:[%s3947_s12 + $0x408] sm:$0xff] }
  0x38   : > { %1878 = vmatpush1.bf16.msra.mxu0 %v3408_v12  ;;  %1960 = vmatpush1.bf16.msra.mxu1 %v3410_v13  ;;  %v3473_v12 = vcombine.high %v425_v6, %v429_v7  ;;  %v3475_v13 = vcombine.high %v426_v8, %v430_v9  ;;  %v438_v18 = vld [vmem:[%s3947_s12 + $0x428] sm:$0xff]  ;;  %v3472_v19 = vcombine.low %v425_v6, %v429_v7  ;;  %v445_v24 = vld [vmem:[%s3947_s12 + $0x460] sm:$0xff] }
  0x39   : > { %1879 = vmatprep.subr.bf16.mxu0 %v3417_v14  ;;  %1961 = vmatprep.subr.bf16.mxu1 %v3419_v15  ;;  %v433_v14 = vld [vmem:[%s3947_s12 + $0x400] sm:$0xff]  ;;  %v442_v60 = vld [vmem:[%s3947_s12 + $0x448] sm:$0xff] }
  0x3a   : > { %v437_v15 = vld [vmem:[%s3947_s12 + $0x420] sm:$0xff]  ;;  %v446_v26 = vld [vmem:[%s3947_s12 + $0x468] sm:$0xff] }
  0x3b   : > { %v3480_v27 = vcombine.low %v433_v14, %v437_v15  ;;  %v453_v32 = vld [vmem:[%s3947_s12 + $0x4a0] sm:$0xff]  ;;  %v450_v54 = vld [vmem:[%s3947_s12 + $0x488] sm:$0xff] }
  0x3c   : > { %1880 = vmatpush1.bf16.msra.mxu0 %v3416_v20  ;;  %1962 = vmatpush1.bf16.msra.mxu1 %v3418_v21  ;;  %v3474_v20 = vcombine.low %v426_v8, %v430_v9  ;;  %v3481_v21 = vcombine.high %v433_v14, %v437_v15  ;;  %v454_v34 = vld [vmem:[%s3947_s12 + $0x4a8] sm:$0xff]  ;;  %v461_v41 = vld [vmem:[%s3947_s12 + $0x4e0] sm:$0xff] }
  0x3d   : > { %1881 = vmatprep.subr.bf16.mxu0 %v3425_v22  ;;  %1963 = vmatprep.subr.bf16.mxu1 %v3427_v23  ;;  %v3483_v22 = vcombine.high %v434_v17, %v438_v18  ;;  %v441_v23 = vld [vmem:[%s3947_s12 + $0x440] sm:$0xff]  ;;  %v458_v42 = vld [vmem:[%s3947_s12 + $0x4c8] sm:$0xff] }
  0x3e   : > { %v3488_v36 = vcombine.low %v441_v23, %v445_v24  ;;  %v462_v43 = vld [vmem:[%s3947_s12 + $0x4e8] sm:$0xff]  ;;  %v469_v50 = vld [vmem:[%s3947_s12 + $0x520] sm:$0xff] }
  0x3f   : > { %v466_v51 = vld [vmem:[%s3947_s12 + $0x508] sm:$0xff]  ;;  %v477_v59 = vld [vmem:[%s3947_s12 + $0x560] sm:$0xff] }
  0x40   : > { %1882 = vmatpush1.bf16.msra.mxu0 %v3424_v28  ;;  %1964 = vmatpush1.bf16.msra.mxu1 %v3426_v29  ;;  %v3482_v28 = vcombine.low %v434_v17, %v438_v18  ;;  %v3489_v29 = vcombine.high %v441_v23, %v445_v24  ;;  %v470_v52 = vld [vmem:[%s3947_s12 + $0x528] sm:$0xff]  ;;  %v485_v6 = vld [vmem:[%s3947_s12 + $0x5a0] sm:$0xff] }
  0x41   : > { %1883 = vmatprep.subr.bf16.mxu0 %v3433_v30  ;;  %1965 = vmatprep.subr.bf16.mxu1 %v3435_v31  ;;  %v3491_v30 = vcombine.high %v442_v60, %v446_v26  ;;  %v449_v31 = vld [vmem:[%s3947_s12 + $0x480] sm:$0xff]  ;;  %v474_v61 = vld [vmem:[%s3947_s12 + $0x548] sm:$0xff] }
  0x42   : > { %v3496_v44 = vcombine.low %v449_v31, %v453_v32  ;;  %v478_v62 = vld [vmem:[%s3947_s12 + $0x568] sm:$0xff]  ;;  %v493_v14 = vld [vmem:[%s3947_s12 + $0x5e0] sm:$0xff] }
  0x43   : > { %v482_v7 = vld [vmem:[%s3947_s12 + $0x588] sm:$0xff] }
  0x44   : > { %1884 = vmatpush1.bf16.msra.mxu0 %v3432_v37  ;;  %1966 = vmatpush1.bf16.msra.mxu1 %v3434_v38  ;;  %v3490_v37 = vcombine.low %v442_v60, %v446_v26  ;;  %v3497_v38 = vcombine.high %v449_v31, %v453_v32  ;;  %v486_v8 = vld [vmem:[%s3947_s12 + $0x5a8] sm:$0xff] }
  0x45   : > { %1885 = vmatprep.subr.bf16.mxu0 %v3441_v39  ;;  %1967 = vmatprep.subr.bf16.mxu1 %v3443_v40  ;;  %v3499_v39 = vcombine.high %v450_v54, %v454_v34  ;;  %v457_v40 = vld [vmem:[%s3947_s12 + $0x4c0] sm:$0xff]  ;;  %v490_v15 = vld [vmem:[%s3947_s12 + $0x5c8] sm:$0xff]  ;;  %v3530_v18 = vcombine.low %v482_v7, %v486_v8 }
  0x46   : > { %v3504_v53 = vcombine.low %v457_v40, %v461_v41  ;;  %v494_v16 = vld [vmem:[%s3947_s12 + $0x5e8] sm:$0xff] }
  0x47   : > { %v498_v23 = vld [vmem:[%s3947_s12 + $0x608] sm:$0xff]  ;;  %v3538_v26 = vcombine.low %v490_v15, %v494_v16 }
  0x48   : > { %1886 = vmatpush1.bf16.msra.mxu0 %v3440_v46  ;;  %1968 = vmatpush1.bf16.msra.mxu1 %v3442_v47  ;;  %v3498_v46 = vcombine.low %v450_v54, %v454_v34  ;;  %v3505_v47 = vcombine.high %v457_v40, %v461_v41  ;;  %v502_v24 = vld [vmem:[%s3947_s12 + $0x628] sm:$0xff] }
  0x49   : > { %1887 = vmatprep.subr.bf16.mxu0 %v3449_v48  ;;  %1969 = vmatprep.subr.bf16.mxu1 %v3451_v49  ;;  %v3507_v48 = vcombine.high %v458_v42, %v462_v43  ;;  %v465_v49 = vld [vmem:[%s3947_s12 + $0x500] sm:$0xff]  ;;  %v506_v31 = vld [vmem:[%s3947_s12 + $0x648] sm:$0xff]  ;;  %v3546_v34 = vcombine.low %v498_v23, %v502_v24 }
  0x4a   : > { %v3512_v63 = vcombine.low %v465_v49, %v469_v50  ;;  %v510_v32 = vld [vmem:[%s3947_s12 + $0x668] sm:$0xff] }
  0x4b   : > { %v514_v40 = vld [vmem:[%s3947_s12 + $0x688] sm:$0xff] }
  0x4c   : > { %1888 = vmatpush1.bf16.msra.mxu0 %v3448_v55  ;;  %1970 = vmatpush1.bf16.msra.mxu1 %v3450_v56  ;;  %v3506_v55 = vcombine.low %v458_v42, %v462_v43  ;;  %v3513_v56 = vcombine.high %v465_v49, %v469_v50  ;;  %v518_v41 = vld [vmem:[%s3947_s12 + $0x6a8] sm:$0xff]  ;;  %v3554_v43 = vcombine.low %v506_v31, %v510_v32 }
  0x4d   : > { %1889 = vmatprep.subr.bf16.mxu0 %v3457_v57  ;;  %1971 = vmatprep.subr.bf16.mxu1 %v3459_v58  ;;  %v3515_v57 = vcombine.high %v466_v51, %v470_v52  ;;  %v473_v58 = vld [vmem:[%s3947_s12 + $0x540] sm:$0xff]  ;;  %v522_v49 = vld [vmem:[%s3947_s12 + $0x6c8] sm:$0xff] }
  0x4e   : > { %v3520_v9 = vcombine.low %v473_v58, %v477_v59  ;;  %v526_v50 = vld [vmem:[%s3947_s12 + $0x6e8] sm:$0xff] }
  0x50   : > { %1890 = vmatpush1.bf16.msra.mxu0 %v3456_v1  ;;  %1972 = vmatpush1.bf16.msra.mxu1 %v3458_v2  ;;  %v3514_v1 = vcombine.low %v466_v51, %v470_v52  ;;  %v3521_v2 = vcombine.high %v473_v58, %v477_v59  ;;  %v3562_v52 = vcombine.low %v514_v40, %v518_v41  ;;  %v530_v58 = vld [vmem:[%s3947_s12 + $0x708] sm:$0xff] }
  0x51   : > { %1891 = vmatprep.subr.bf16.mxu0 %v3465_v3  ;;  %1973 = vmatprep.subr.bf16.mxu1 %v3467_v5  ;;  %v3523_v3 = vcombine.high %v474_v61, %v478_v62  ;;  %v481_v5 = vld [vmem:[%s3947_s12 + $0x580] sm:$0xff]  ;;  %v534_v59 = vld [vmem:[%s3947_s12 + $0x728] sm:$0xff] }
  0x52   : > { %v3528_v17 = vcombine.low %v481_v5, %v485_v6 }
  0x54   : > { %1892 = vmatpush1.bf16.msra.mxu0 %v3464_v10  ;;  %1974 = vmatpush1.bf16.msra.mxu1 %v3466_v11  ;;  %v3522_v10 = vcombine.low %v474_v61, %v478_v62  ;;  %v3529_v11 = vcombine.high %v481_v5, %v485_v6  ;;  %v3570_v62 = vcombine.low %v522_v49, %v526_v50  ;;  %v538_v5 = vld [vmem:[%s3947_s12 + $0x748] sm:$0xff] }
  0x55   : > { %1893 = vmatprep.subr.bf16.mxu0 %v3473_v12  ;;  %1975 = vmatprep.subr.bf16.mxu1 %v3475_v13  ;;  %v3531_v12 = vcombine.high %v482_v7, %v486_v8  ;;  %v489_v13 = vld [vmem:[%s3947_s12 + $0x5c0] sm:$0xff]  ;;  %v542_v6 = vld [vmem:[%s3947_s12 + $0x768] sm:$0xff]  ;;  %v3578_v8 = vcombine.low %v530_v58, %v534_v59 }
  0x56   : > { %v3536_v60 = vcombine.low %v489_v13, %v493_v14 }
  0x58   : > { %1894 = vmatpush1.bf16.msra.mxu0 %v3472_v19  ;;  %1976 = vmatpush1.bf16.msra.mxu1 %v3474_v20  ;;  %v3537_v19 = vcombine.high %v489_v13, %v493_v14  ;;  %v3539_v20 = vcombine.high %v490_v15, %v494_v16  ;;  %v546_v13 = vld [vmem:[%s3947_s12 + $0x788] sm:$0xff]  ;;  %v3586_v16 = vcombine.low %v538_v5, %v542_v6 }
  0x59   : > { %1904 = vmatprep.subr.bf16.mxu0 %v3481_v21  ;;  %1986 = vmatprep.subr.bf16.mxu1 %v3483_v22  ;;  %v497_v21 = vld [vmem:[%s3947_s12 + $0x600] sm:$0xff]  ;;  %v550_v14 = vld [vmem:[%s3947_s12 + $0x7a8] sm:$0xff] }
  0x5a   : > { %v501_v22 = vld [vmem:[%s3947_s12 + $0x620] sm:$0xff] }
  0x5b   : > { %1896 = vmatmul.mubr.bf16.vlgmr.msra.gmra.mrb[0].mxu0 %v3991_v0  ;;  %1978 = vmatmul.mubr.bf16.vlgmr.msra.gmra.mrb[0].mxu1 %v3991_v0  ;;  %v3544_v54 = vcombine.low %v497_v21, %v501_v22 }
  0x5c   : > { %1905 = vmatpush1.bf16.msra.mxu0 %v3480_v27  ;;  %1987 = vmatpush1.bf16.msra.mxu1 %v3482_v28  ;;  %v3545_v27 = vcombine.high %v497_v21, %v501_v22  ;;  %v3547_v28 = vcombine.high %v498_v23, %v502_v24  ;;  %v554_v21 = vld [vmem:[%s3947_s12 + $0x7c8] sm:$0xff]  ;;  %v3594_v24 = vcombine.low %v546_v13, %v550_v14 }
  0x5d   : > { %1906 = vmatprep.subr.bf16.mxu0 %v3489_v29  ;;  %1988 = vmatprep.subr.bf16.mxu1 %v3491_v30  ;;  %v505_v29 = vld [vmem:[%s3947_s12 + $0x640] sm:$0xff]  ;;  %v558_v22 = vld [vmem:[%s3947_s12 + $0x7e8] sm:$0xff] }
  0x5e   : > { %1936 = vmatprep.mubr.bf16.mxu0 %v4050_v33  ;;  %2018 = vmatprep.mubr.bf16.mxu1 %v4050_v33  ;;  %v509_v30 = vld [vmem:[%s3947_s12 + $0x660] sm:$0xff] }
  0x5f   : > { %v3552_v42 = vcombine.low %v505_v29, %v509_v30 }
  0x60   : > { %1907 = vmatpush1.bf16.msra.mxu0 %v3488_v36  ;;  %1989 = vmatpush1.bf16.msra.mxu1 %v3490_v37  ;;  %v3553_v36 = vcombine.high %v505_v29, %v509_v30  ;;  %v3555_v37 = vcombine.high %v506_v31, %v510_v32  ;;  %v308_v29 = vld [vmem:[%s3947_s12 + $0x18] sm:$0xff]  ;;  %v3602_v32 = vcombine.low %v554_v21, %v558_v22 }
  0x61   : > { %1908 = vmatprep.subr.bf16.mxu0 %v3497_v38  ;;  %1990 = vmatprep.subr.bf16.mxu1 %v3499_v39  ;;  %v513_v38 = vld [vmem:[%s3947_s12 + $0x680] sm:$0xff]  ;;  %v312_v30 = vld [vmem:[%s3947_s12 + $0x38] sm:$0xff] }
  0x62   : > { %v517_v39 = vld [vmem:[%s3947_s12 + $0x6a0] sm:$0xff] }
  0x63   : > { %v3560_v51 = vcombine.low %v513_v38, %v517_v39 }
  0x64   : > { %1909 = vmatpush1.bf16.msra.mxu0 %v3496_v44  ;;  %1991 = vmatpush1.bf16.msra.mxu1 %v3498_v46  ;;  %v3561_v44 = vcombine.high %v513_v38, %v517_v39  ;;  %v3563_v46 = vcombine.high %v514_v40, %v518_v41  ;;  %v316_v38 = vld [vmem:[%s3947_s12 + $0x58] sm:$0xff]  ;;  %v3358_v41 = vcombine.low %v308_v29, %v312_v30 }
  0x65   : > { %1910 = vmatprep.subr.bf16.mxu0 %v3505_v47  ;;  %1992 = vmatprep.subr.bf16.mxu1 %v3507_v48  ;;  %v521_v47 = vld [vmem:[%s3947_s12 + $0x6c0] sm:$0xff]  ;;  %v320_v39 = vld [vmem:[%s3947_s12 + $0x78] sm:$0xff] }
  0x66   : > { %v525_v48 = vld [vmem:[%s3947_s12 + $0x6e0] sm:$0xff] }
  0x67   : > { %v3568_v61 = vcombine.low %v521_v47, %v525_v48 }
  0x68   : > { %1911 = vmatpush1.bf16.msra.mxu0 %v3504_v53  ;;  %1993 = vmatpush1.bf16.msra.mxu1 %v3506_v55  ;;  %v3569_v53 = vcombine.high %v521_v47, %v525_v48  ;;  %v3571_v55 = vcombine.high %v522_v49, %v526_v50  ;;  %v324_v47 = vld [vmem:[%s3947_s12 + $0x98] sm:$0xff]  ;;  %v3366_v50 = vcombine.low %v316_v38, %v320_v39 }
  0x69   : > { %1912 = vmatprep.subr.bf16.mxu0 %v3513_v56  ;;  %1994 = vmatprep.subr.bf16.mxu1 %v3515_v57  ;;  %v529_v56 = vld [vmem:[%s3947_s12 + $0x700] sm:$0xff]  ;;  %v328_v48 = vld [vmem:[%s3947_s12 + $0xb8] sm:$0xff] }
  0x6a   : > { %v533_v57 = vld [vmem:[%s3947_s12 + $0x720] sm:$0xff] }
  0x6b   : > { %v3576_v7 = vcombine.low %v529_v56, %v533_v57 }
  0x6c   : > { %1913 = vmatpush1.bf16.msra.mxu0 %v3512_v63  ;;  %1995 = vmatpush1.bf16.msra.mxu1 %v3514_v1  ;;  %v3577_v63 = vcombine.high %v529_v56, %v533_v57  ;;  %v3579_v1 = vcombine.high %v530_v58, %v534_v59  ;;  %v332_v56 = vld [vmem:[%s3947_s12 + $0xd8] sm:$0xff]  ;;  %v3374_v59 = vcombine.low %v324_v47, %v328_v48 }
  0x6d   : > { %1914 = vmatprep.subr.bf16.mxu0 %v3521_v2  ;;  %1996 = vmatprep.subr.bf16.mxu1 %v3523_v3  ;;  %v537_v2 = vld [vmem:[%s3947_s12 + $0x740] sm:$0xff]  ;;  %v336_v57 = vld [vmem:[%s3947_s12 + $0xf8] sm:$0xff] }
  0x6e   : > { %v541_v3 = vld [vmem:[%s3947_s12 + $0x760] sm:$0xff] }
  0x6f   : > { %v3584_v15 = vcombine.low %v537_v2, %v541_v3 }
  0x70   : > { %1915 = vmatpush1.bf16.msra.mxu0 %v3520_v9  ;;  %1997 = vmatpush1.bf16.msra.mxu1 %v3522_v10  ;;  %v3585_v9 = vcombine.high %v537_v2, %v541_v3  ;;  %v3587_v10 = vcombine.high %v538_v5, %v542_v6  ;;  %v340_v2 = vld [vmem:[%s3947_s12 + $0x118] sm:$0xff] }
  0x71   : > { %1916 = vmatprep.subr.bf16.mxu0 %v3529_v11  ;;  %1998 = vmatprep.subr.bf16.mxu1 %v3531_v12  ;;  %v545_v11 = vld [vmem:[%s3947_s12 + $0x780] sm:$0xff]  ;;  %v344_v3 = vld [vmem:[%s3947_s12 + $0x138] sm:$0xff] }
  0x72   : > { %v549_v12 = vld [vmem:[%s3947_s12 + $0x7a0] sm:$0xff] }
  0x73   : > { %v3592_v23 = vcombine.low %v545_v11, %v549_v12 }
  0x74   : > { %1917 = vmatpush1.bf16.msra.mxu0 %v3528_v17  ;;  %1999 = vmatpush1.bf16.msra.mxu1 %v3530_v18  ;;  %v3593_v17 = vcombine.high %v545_v11, %v549_v12  ;;  %v3595_v18 = vcombine.high %v546_v13, %v550_v14  ;;  %v352_v11 = vld [vmem:[%s3947_s12 + $0x178] sm:$0xff]  ;;  %v3390_v13 = vcombine.low %v340_v2, %v344_v3 }
  0x75   : > { %1918 = vmatprep.subr.bf16.mxu0 %v3537_v19  ;;  %2000 = vmatprep.subr.bf16.mxu1 %v3539_v20  ;;  %v553_v19 = vld [vmem:[%s3947_s12 + $0x7c0] sm:$0xff] }
  0x76   : > { %v557_v20 = vld [vmem:[%s3947_s12 + $0x7e0] sm:$0xff] }
  0x77   : > { %v3600_v31 = vcombine.low %v553_v19, %v557_v20 }
  0x78   : > { %1919 = vmatpush1.bf16.msra.mxu0 %v3536_v60  ;;  %2001 = vmatpush1.bf16.msra.mxu1 %v3538_v26  ;;  %v3601_v60 = vcombine.high %v553_v19, %v557_v20  ;;  %v3603_v26 = vcombine.high %v554_v21, %v558_v22  ;;  %v360_v19 = vld [vmem:[%s3947_s12 + $0x1b8] sm:$0xff] }
  0x79   : > { %1920 = vmatprep.subr.bf16.mxu0 %v3545_v27  ;;  %2002 = vmatprep.subr.bf16.mxu1 %v3547_v28  ;;  %v307_v27 = vld [vmem:[%s3947_s12 + $0x10] sm:$0xff] }
  0x7a   : > { %v311_v28 = vld [vmem:[%s3947_s12 + $0x30] sm:$0xff] }
  0x7b   : > { %v3356_v40 = vcombine.low %v307_v27, %v311_v28 }
  0x7c   : > { %1921 = vmatpush1.bf16.msra.mxu0 %v3544_v54  ;;  %2003 = vmatpush1.bf16.msra.mxu1 %v3546_v34  ;;  %v3357_v54 = vcombine.high %v307_v27, %v311_v28  ;;  %v3359_v34 = vcombine.high %v308_v29, %v312_v30  ;;  %v368_v27 = vld [vmem:[%s3947_s12 + $0x1f8] sm:$0xff] }
  0x7d   : > { %1922 = vmatprep.subr.bf16.mxu0 %v3553_v36  ;;  %2004 = vmatprep.subr.bf16.mxu1 %v3555_v37  ;;  %v315_v36 = vld [vmem:[%s3947_s12 + $0x50] sm:$0xff] }
  0x7e   : > { %v319_v37 = vld [vmem:[%s3947_s12 + $0x70] sm:$0xff] }
  0x7f   : > { %v3364_v49 = vcombine.low %v315_v36, %v319_v37 }
  0x80   : > { %1923 = vmatpush1.bf16.msra.mxu0 %v3552_v42  ;;  %2005 = vmatpush1.bf16.msra.mxu1 %v3554_v43  ;;  %v3365_v42 = vcombine.high %v315_v36, %v319_v37  ;;  %v3367_v43 = vcombine.high %v316_v38, %v320_v39  ;;  %v376_v36 = vld [vmem:[%s3947_s12 + $0x238] sm:$0xff] }
  0x81   : > { %1924 = vmatprep.subr.bf16.mxu0 %v3561_v44  ;;  %2006 = vmatprep.subr.bf16.mxu1 %v3563_v46  ;;  %v323_v44 = vld [vmem:[%s3947_s12 + $0x90] sm:$0xff] }
  0x82   : > { %v327_v46 = vld [vmem:[%s3947_s12 + $0xb0] sm:$0xff] }
  0x83   : > { %v3372_v58 = vcombine.low %v323_v44, %v327_v46 }
  0x84   : > { %1925 = vmatpush1.bf16.msra.mxu0 %v3560_v51  ;;  %2007 = vmatpush1.bf16.msra.mxu1 %v3562_v52  ;;  %v3373_v51 = vcombine.high %v323_v44, %v327_v46  ;;  %v3375_v52 = vcombine.high %v324_v47, %v328_v48  ;;  %v384_v44 = vld [vmem:[%s3947_s12 + $0x278] sm:$0xff] }
  0x85   : > { %1926 = vmatprep.subr.bf16.mxu0 %v3569_v53  ;;  %2008 = vmatprep.subr.bf16.mxu1 %v3571_v55  ;;  %v331_v53 = vld [vmem:[%s3947_s12 + $0xd0] sm:$0xff] }
  0x86   : > { %v335_v55 = vld [vmem:[%s3947_s12 + $0xf0] sm:$0xff] }
  0x87   : > { %v3380_v5 = vcombine.low %v331_v53, %v335_v55 }
  0x88   : > { %1927 = vmatpush1.bf16.msra.mxu0 %v3568_v61  ;;  %2009 = vmatpush1.bf16.msra.mxu1 %v3570_v62  ;;  %v3381_v61 = vcombine.high %v331_v53, %v335_v55  ;;  %v3383_v62 = vcombine.high %v332_v56, %v336_v57  ;;  %v392_v53 = vld [vmem:[%s3947_s12 + $0x2b8] sm:$0xff] }
  0x89   : > { %1928 = vmatprep.subr.bf16.mxu0 %v3577_v63  ;;  %2010 = vmatprep.subr.bf16.mxu1 %v3579_v1  ;;  %v339_v63 = vld [vmem:[%s3947_s12 + $0x110] sm:$0xff] }
  0x8a   : > { %v343_v1 = vld [vmem:[%s3947_s12 + $0x130] sm:$0xff] }
  0x8b   : > { %v3389_v6 = vcombine.high %v339_v63, %v343_v1  ;;  %v3388_v12 = vcombine.low %v339_v63, %v343_v1  ;;  %v400_v63 = vld [vmem:[%s3947_s12 + $0x2f8] sm:$0xff] }
  0x8c   : > { %1929 = vmatpush1.bf16.msra.mxu0 %v3576_v7  ;;  %2011 = vmatpush1.bf16.msra.mxu1 %v3578_v8  ;;  %v3391_v7 = vcombine.high %v340_v2, %v344_v3  ;;  %v347_v8 = vld [vmem:[%s3947_s12 + $0x150] sm:$0xff] }
  0x8d   : > { %1930 = vmatprep.subr.bf16.mxu0 %v3585_v9  ;;  %2012 = vmatprep.subr.bf16.mxu1 %v3587_v10  ;;  %v351_v9 = vld [vmem:[%s3947_s12 + $0x170] sm:$0xff]  ;;  %v348_v10 = vld [vmem:[%s3947_s12 + $0x158] sm:$0xff] }
  0x8e   : > { %v3397_v14 = vcombine.high %v347_v8, %v351_v9  ;;  %v3396_v20 = vcombine.low %v347_v8, %v351_v9  ;;  %v3398_v21 = vcombine.low %v348_v10, %v352_v11  ;;  %v408_v8 = vld [vmem:[%s3947_s12 + $0x338] sm:$0xff] }
  0x90   : > { %1931 = vmatpush1.bf16.msra.mxu0 %v3584_v15  ;;  %2013 = vmatpush1.bf16.msra.mxu1 %v3586_v16  ;;  %v3399_v15 = vcombine.high %v348_v10, %v352_v11  ;;  %v355_v16 = vld [vmem:[%s3947_s12 + $0x190] sm:$0xff] }
  0x91   : > { %1932 = vmatprep.subr.bf16.mxu0 %v3593_v17  ;;  %2014 = vmatprep.subr.bf16.mxu1 %v3595_v18  ;;  %v359_v17 = vld [vmem:[%s3947_s12 + $0x1b0] sm:$0xff]  ;;  %v356_v18 = vld [vmem:[%s3947_s12 + $0x198] sm:$0xff] }
  0x92   : > { %v3405_v22 = vcombine.high %v355_v16, %v359_v17  ;;  %v3404_v28 = vcombine.low %v355_v16, %v359_v17  ;;  %v3406_v29 = vcombine.low %v356_v18, %v360_v19  ;;  %v416_v16 = vld [vmem:[%s3947_s12 + $0x378] sm:$0xff] }
  0x94   : > { %1933 = vmatpush1.bf16.msra.mxu0 %v3592_v23  ;;  %2015 = vmatpush1.bf16.msra.mxu1 %v3594_v24  ;;  %v3407_v23 = vcombine.high %v356_v18, %v360_v19  ;;  %v363_v24 = vld [vmem:[%s3947_s12 + $0x1d0] sm:$0xff] }
  0x95   : > { %1934 = vmatprep.subr.bf16.mxu0 %v3601_v60  ;;  %2016 = vmatprep.subr.bf16.mxu1 %v3603_v26  ;;  %v367_v60 = vld [vmem:[%s3947_s12 + $0x1f0] sm:$0xff]  ;;  %v364_v26 = vld [vmem:[%s3947_s12 + $0x1d8] sm:$0xff] }
  0x96   : > { %v3413_v30 = vcombine.high %v363_v24, %v367_v60  ;;  %v3412_v37 = vcombine.low %v363_v24, %v367_v60  ;;  %v3414_v38 = vcombine.low %v364_v26, %v368_v27  ;;  %v424_v24 = vld [vmem:[%s3947_s12 + $0x3b8] sm:$0xff] }
  0x98   : > { %1935 = vmatpush1.bf16.msra.mxu0 %v3600_v31  ;;  %2017 = vmatpush1.bf16.msra.mxu1 %v3602_v32  ;;  %v3415_v31 = vcombine.high %v364_v26, %v368_v27  ;;  %v371_v32 = vld [vmem:[%s3947_s12 + $0x210] sm:$0xff] }
  0x99   : > { %2027 = vmatprep.subr.bf16.mxu0 %v3357_v54  ;;  %2109 = vmatprep.subr.bf16.mxu1 %v3359_v34  ;;  %v375_v54 = vld [vmem:[%s3947_s12 + $0x230] sm:$0xff]  ;;  %v372_v34 = vld [vmem:[%s3947_s12 + $0x218] sm:$0xff] }
  0x9a   : > { %v3421_v39 = vcombine.high %v371_v32, %v375_v54  ;;  %v3420_v46 = vcombine.low %v371_v32, %v375_v54  ;;  %v3422_v47 = vcombine.low %v372_v34, %v376_v36  ;;  %v432_v32 = vld [vmem:[%s3947_s12 + $0x3f8] sm:$0xff] }
  0x9b   : > { %1937 = vmatmul.mubr.bf16.vlgmr.msra.gmra.mrb[0].mxu0 %v4042_v25  ;;  %2019 = vmatmul.mubr.bf16.vlgmr.msra.gmra.mrb[0].mxu1 %v4042_v25 }
  0x9c   : > { %2028 = vmatpush1.bf16.msra.mxu0 %v3356_v40  ;;  %2110 = vmatpush1.bf16.msra.mxu1 %v3358_v41  ;;  %v3423_v40 = vcombine.high %v372_v34, %v376_v36  ;;  %v379_v41 = vld [vmem:[%s3947_s12 + $0x250] sm:$0xff] }
  0x9d   : > { %2029 = vmatprep.subr.bf16.mxu0 %v3365_v42  ;;  %2111 = vmatprep.subr.bf16.mxu1 %v3367_v43  ;;  %v383_v42 = vld [vmem:[%s3947_s12 + $0x270] sm:$0xff]  ;;  %v380_v43 = vld [vmem:[%s3947_s12 + $0x258] sm:$0xff] }
  0x9e   : > { %2059 = vmatprep.mubr.bf16.mxu0 %v3997_v4  ;;  %2141 = vmatprep.mubr.bf16.mxu1 %v3997_v4  ;;  %v3382_v4 = vcombine.low %v332_v56, %v336_v57  ;;  %v3429_v48 = vcombine.high %v379_v41, %v383_v42  ;;  %v3428_v55 = vcombine.low %v379_v41, %v383_v42  ;;  %v440_v41 = vld [vmem:[%s3947_s12 + $0x438] sm:$0xff] }
  0x9f   : > { %v3430_v56 = vcombine.low %v380_v43, %v384_v44 }
  0xa0   : > { %2030 = vmatpush1.bf16.msra.mxu0 %v3364_v49  ;;  %2112 = vmatpush1.bf16.msra.mxu1 %v3366_v50  ;;  %v3431_v49 = vcombine.high %v380_v43, %v384_v44  ;;  %v387_v50 = vld [vmem:[%s3947_s12 + $0x290] sm:$0xff] }
  0xa1   : > { %2031 = vmatprep.subr.bf16.mxu0 %v3373_v51  ;;  %2113 = vmatprep.subr.bf16.mxu1 %v3375_v52  ;;  %v391_v51 = vld [vmem:[%s3947_s12 + $0x2b0] sm:$0xff]  ;;  %v388_v52 = vld [vmem:[%s3947_s12 + $0x298] sm:$0xff] }
  0xa2   : > { %v3437_v57 = vcombine.high %v387_v50, %v391_v51  ;;  %v3436_v1 = vcombine.low %v387_v50, %v391_v51  ;;  %v3438_v2 = vcombine.low %v388_v52, %v392_v53  ;;  %v448_v50 = vld [vmem:[%s3947_s12 + $0x478] sm:$0xff] }
  0xa4   : > { %2032 = vmatpush1.bf16.msra.mxu0 %v3372_v58  ;;  %2114 = vmatpush1.bf16.msra.mxu1 %v3374_v59  ;;  %v3439_v58 = vcombine.high %v388_v52, %v392_v53  ;;  %v395_v59 = vld [vmem:[%s3947_s12 + $0x2d0] sm:$0xff] }
  0xa5   : > { %2033 = vmatprep.subr.bf16.mxu0 %v3381_v61  ;;  %2115 = vmatprep.subr.bf16.mxu1 %v3383_v62  ;;  %v399_v61 = vld [vmem:[%s3947_s12 + $0x2f0] sm:$0xff]  ;;  %v396_v62 = vld [vmem:[%s3947_s12 + $0x2d8] sm:$0xff] }
  0xa6   : > { %v3445_v3 = vcombine.high %v395_v59, %v399_v61  ;;  %v3444_v9 = vcombine.low %v395_v59, %v399_v61  ;;  %v3446_v10 = vcombine.low %v396_v62, %v400_v63  ;;  %v456_v59 = vld [vmem:[%s3947_s12 + $0x4b8] sm:$0xff] }
  0xa8   : > { %2034 = vmatpush1.bf16.msra.mxu0 %v3380_v5  ;;  %2116 = vmatpush1.bf16.msra.mxu1 %v3382_v4  ;;  %v3447_v5 = vcombine.high %v396_v62, %v400_v63  ;;  %v403_v4 = vld [vmem:[%s3947_s12 + $0x310] sm:$0xff] }
  0xa9   : > { %2035 = vmatprep.subr.bf16.mxu0 %v3389_v6  ;;  %2117 = vmatprep.subr.bf16.mxu1 %v3391_v7  ;;  %v407_v6 = vld [vmem:[%s3947_s12 + $0x330] sm:$0xff]  ;;  %v404_v7 = vld [vmem:[%s3947_s12 + $0x318] sm:$0xff] }
  0xaa   : > { %v3453_v11 = vcombine.high %v403_v4, %v407_v6  ;;  %v3452_v17 = vcombine.low %v403_v4, %v407_v6  ;;  %v3454_v18 = vcombine.low %v404_v7, %v408_v8  ;;  %v464_v4 = vld [vmem:[%s3947_s12 + $0x4f8] sm:$0xff] }
  0xac   : > { %2036 = vmatpush1.bf16.msra.mxu0 %v3388_v12  ;;  %2118 = vmatpush1.bf16.msra.mxu1 %v3390_v13  ;;  %v3455_v12 = vcombine.high %v404_v7, %v408_v8  ;;  %v411_v13 = vld [vmem:[%s3947_s12 + $0x350] sm:$0xff] }
  0xad   : > { %2037 = vmatprep.subr.bf16.mxu0 %v3397_v14  ;;  %2119 = vmatprep.subr.bf16.mxu1 %v3399_v15  ;;  %v415_v14 = vld [vmem:[%s3947_s12 + $0x370] sm:$0xff]  ;;  %v412_v15 = vld [vmem:[%s3947_s12 + $0x358] sm:$0xff] }
  0xae   : > { %v3461_v19 = vcombine.high %v411_v13, %v415_v14  ;;  %v3460_v60 = vcombine.low %v411_v13, %v415_v14  ;;  %v3462_v26 = vcombine.low %v412_v15, %v416_v16 }
  0xb0   : > { %2038 = vmatpush1.bf16.msra.mxu0 %v3396_v20  ;;  %2120 = vmatpush1.bf16.msra.mxu1 %v3398_v21  ;;  %v3463_v20 = vcombine.high %v412_v15, %v416_v16  ;;  %v419_v21 = vld [vmem:[%s3947_s12 + $0x390] sm:$0xff] }
  0xb1   : > { %2039 = vmatprep.subr.bf16.mxu0 %v3405_v22  ;;  %2121 = vmatprep.subr.bf16.mxu1 %v3407_v23  ;;  %v423_v22 = vld [vmem:[%s3947_s12 + $0x3b0] sm:$0xff]  ;;  %v420_v23 = vld [vmem:[%s3947_s12 + $0x398] sm:$0xff] }
  0xb2   : > { %v3469_v27 = vcombine.high %v419_v21, %v423_v22  ;;  %v3468_v54 = vcombine.low %v419_v21, %v423_v22  ;;  %v3470_v34 = vcombine.low %v420_v23, %v424_v24  ;;  %v475_v16 = vld [vmem:[%s3947_s12 + $0x550] sm:$0xff] }
  0xb4   : > { %2040 = vmatpush1.bf16.msra.mxu0 %v3404_v28  ;;  %2122 = vmatpush1.bf16.msra.mxu1 %v3406_v29  ;;  %v3471_v28 = vcombine.high %v420_v23, %v424_v24  ;;  %v427_v29 = vld [vmem:[%s3947_s12 + $0x3d0] sm:$0xff] }
  0xb5   : > { %2041 = vmatprep.subr.bf16.mxu0 %v3413_v30  ;;  %2123 = vmatprep.subr.bf16.mxu1 %v3415_v31  ;;  %v431_v30 = vld [vmem:[%s3947_s12 + $0x3f0] sm:$0xff]  ;;  %v428_v31 = vld [vmem:[%s3947_s12 + $0x3d8] sm:$0xff] }
  0xb6   : > { %v3477_v36 = vcombine.high %v427_v29, %v431_v30  ;;  %v3476_v42 = vcombine.low %v427_v29, %v431_v30  ;;  %v3478_v43 = vcombine.low %v428_v31, %v432_v32  ;;  %v483_v24 = vld [vmem:[%s3947_s12 + $0x590] sm:$0xff] }
  0xb8   : > { %2042 = vmatpush1.bf16.msra.mxu0 %v3412_v37  ;;  %2124 = vmatpush1.bf16.msra.mxu1 %v3414_v38  ;;  %v3479_v37 = vcombine.high %v428_v31, %v432_v32  ;;  %v435_v38 = vld [vmem:[%s3947_s12 + $0x410] sm:$0xff] }
  0xb9   : > { %2043 = vmatprep.subr.bf16.mxu0 %v3421_v39  ;;  %2125 = vmatprep.subr.bf16.mxu1 %v3423_v40  ;;  %v439_v39 = vld [vmem:[%s3947_s12 + $0x430] sm:$0xff]  ;;  %v436_v40 = vld [vmem:[%s3947_s12 + $0x418] sm:$0xff] }
  0xba   : > { %v3485_v44 = vcombine.high %v435_v38, %v439_v39  ;;  %v3484_v51 = vcombine.low %v435_v38, %v439_v39  ;;  %v3486_v52 = vcombine.low %v436_v40, %v440_v41  ;;  %v491_v32 = vld [vmem:[%s3947_s12 + $0x5d0] sm:$0xff] }
  0xbc   : > { %2044 = vmatpush1.bf16.msra.mxu0 %v3420_v46  ;;  %2126 = vmatpush1.bf16.msra.mxu1 %v3422_v47  ;;  %v3487_v46 = vcombine.high %v436_v40, %v440_v41  ;;  %v443_v47 = vld [vmem:[%s3947_s12 + $0x450] sm:$0xff] }
  0xbd   : > { %2045 = vmatprep.subr.bf16.mxu0 %v3429_v48  ;;  %2127 = vmatprep.subr.bf16.mxu1 %v3431_v49  ;;  %v447_v48 = vld [vmem:[%s3947_s12 + $0x470] sm:$0xff]  ;;  %v444_v49 = vld [vmem:[%s3947_s12 + $0x458] sm:$0xff] }
  0xbe   : > { %v3493_v53 = vcombine.high %v443_v47, %v447_v48  ;;  %v3492_v61 = vcombine.low %v443_v47, %v447_v48  ;;  %v3494_v62 = vcombine.low %v444_v49, %v448_v50  ;;  %v499_v41 = vld [vmem:[%s3947_s12 + $0x610] sm:$0xff] }
  0xc0   : > { %2046 = vmatpush1.bf16.msra.mxu0 %v3428_v55  ;;  %2128 = vmatpush1.bf16.msra.mxu1 %v3430_v56  ;;  %v3495_v55 = vcombine.high %v444_v49, %v448_v50  ;;  %v451_v56 = vld [vmem:[%s3947_s12 + $0x490] sm:$0xff] }
  0xc1   : > { %2047 = vmatprep.subr.bf16.mxu0 %v3437_v57  ;;  %2129 = vmatprep.subr.bf16.mxu1 %v3439_v58  ;;  %v455_v57 = vld [vmem:[%s3947_s12 + $0x4b0] sm:$0xff]  ;;  %v452_v58 = vld [vmem:[%s3947_s12 + $0x498] sm:$0xff] }
  0xc2   : > { %v3501_v63 = vcombine.high %v451_v56, %v455_v57  ;;  %v3502_v6 = vcombine.low %v452_v58, %v456_v59  ;;  %v507_v50 = vld [vmem:[%s3947_s12 + $0x650] sm:$0xff] }
  0xc4   : > { %2048 = vmatpush1.bf16.msra.mxu0 %v3436_v1  ;;  %2130 = vmatpush1.bf16.msra.mxu1 %v3438_v2  ;;  %v3503_v1 = vcombine.high %v452_v58, %v456_v59  ;;  %v459_v2 = vld [vmem:[%s3947_s12 + $0x4d0] sm:$0xff] }
  0xc5   : > { %2049 = vmatprep.subr.bf16.mxu0 %v3445_v3  ;;  %2131 = vmatprep.subr.bf16.mxu1 %v3447_v5  ;;  %v463_v3 = vld [vmem:[%s3947_s12 + $0x4f0] sm:$0xff]  ;;  %v460_v5 = vld [vmem:[%s3947_s12 + $0x4d8] sm:$0xff] }
  0xc6   : > { %v3509_v7 = vcombine.high %v459_v2, %v463_v3  ;;  %v3511_v8 = vcombine.high %v460_v5, %v464_v4  ;;  %v3508_v13 = vcombine.low %v459_v2, %v463_v3  ;;  %v515_v59 = vld [vmem:[%s3947_s12 + $0x690] sm:$0xff] }
  0xc8   : > { %2050 = vmatpush1.bf16.msra.mxu0 %v3444_v9  ;;  %2132 = vmatpush1.bf16.msra.mxu1 %v3446_v10  ;;  %v467_v9 = vld [vmem:[%s3947_s12 + $0x510] sm:$0xff] }
  0xc9   : > { %2051 = vmatprep.subr.bf16.mxu0 %v3453_v11  ;;  %2133 = vmatprep.subr.bf16.mxu1 %v3455_v12  ;;  %v471_v10 = vld [vmem:[%s3947_s12 + $0x530] sm:$0xff]  ;;  %v468_v11 = vld [vmem:[%s3947_s12 + $0x518] sm:$0xff] }
  0xca   : > { %v472_v12 = vld [vmem:[%s3947_s12 + $0x538] sm:$0xff]  ;;  %v3517_v14 = vcombine.high %v467_v9, %v471_v10 }
  0xcb   : > { %v3519_v15 = vcombine.high %v468_v11, %v472_v12  ;;  %v3518_v21 = vcombine.low %v468_v11, %v472_v12  ;;  %v531_v12 = vld [vmem:[%s3947_s12 + $0x710] sm:$0xff] }
  0xcc   : > { %2052 = vmatpush1.bf16.msra.mxu0 %v3452_v17  ;;  %2134 = vmatpush1.bf16.msra.mxu1 %v3454_v18  ;;  %v479_v17 = vld [vmem:[%s3947_s12 + $0x570] sm:$0xff]  ;;  %v476_v18 = vld [vmem:[%s3947_s12 + $0x558] sm:$0xff] }
  0xcd   : > { %2053 = vmatprep.subr.bf16.mxu0 %v3461_v19  ;;  %2135 = vmatprep.subr.bf16.mxu1 %v3463_v20  ;;  %v480_v19 = vld [vmem:[%s3947_s12 + $0x578] sm:$0xff]  ;;  %v3516_v20 = vcombine.low %v467_v9, %v471_v10  ;;  %v3525_v22 = vcombine.high %v475_v16, %v479_v17 }
  0xce   : > { %v3527_v23 = vcombine.high %v476_v18, %v480_v19  ;;  %v3526_v29 = vcombine.low %v476_v18, %v480_v19  ;;  %v539_v19 = vld [vmem:[%s3947_s12 + $0x750] sm:$0xff] }
  0xd0   : > { %2054 = vmatpush1.bf16.msra.mxu0 %v3460_v60  ;;  %2136 = vmatpush1.bf16.msra.mxu1 %v3462_v26  ;;  %v487_v60 = vld [vmem:[%s3947_s12 + $0x5b0] sm:$0xff]  ;;  %v484_v26 = vld [vmem:[%s3947_s12 + $0x598] sm:$0xff] }
  0xd1   : > { %2055 = vmatprep.subr.bf16.mxu0 %v3469_v27  ;;  %2137 = vmatprep.subr.bf16.mxu1 %v3471_v28  ;;  %v488_v27 = vld [vmem:[%s3947_s12 + $0x5b8] sm:$0xff]  ;;  %v3524_v28 = vcombine.low %v475_v16, %v479_v17  ;;  %v3533_v30 = vcombine.high %v483_v24, %v487_v60 }
  0xd2   : > { %v3535_v31 = vcombine.high %v484_v26, %v488_v27  ;;  %v3534_v38 = vcombine.low %v484_v26, %v488_v27  ;;  %v547_v27 = vld [vmem:[%s3947_s12 + $0x790] sm:$0xff] }
  0xd4   : > { %2056 = vmatpush1.bf16.msra.mxu0 %v3468_v54  ;;  %2138 = vmatpush1.bf16.msra.mxu1 %v3470_v34  ;;  %v495_v54 = vld [vmem:[%s3947_s12 + $0x5f0] sm:$0xff]  ;;  %v492_v34 = vld [vmem:[%s3947_s12 + $0x5d8] sm:$0xff] }
  0xd5   : > { %2057 = vmatprep.subr.bf16.mxu0 %v3477_v36  ;;  %2139 = vmatprep.subr.bf16.mxu1 %v3479_v37  ;;  %v496_v36 = vld [vmem:[%s3947_s12 + $0x5f8] sm:$0xff]  ;;  %v3532_v37 = vcombine.low %v483_v24, %v487_v60  ;;  %v3541_v39 = vcombine.high %v491_v32, %v495_v54 }
  0xd6   : > { %v3543_v40 = vcombine.high %v492_v34, %v496_v36  ;;  %v3542_v47 = vcombine.low %v492_v34, %v496_v36  ;;  %v555_v36 = vld [vmem:[%s3947_s12 + $0x7d0] sm:$0xff] }
  0xd8   : > { %2058 = vmatpush1.bf16.msra.mxu0 %v3476_v42  ;;  %2140 = vmatpush1.bf16.msra.mxu1 %v3478_v43  ;;  %v503_v42 = vld [vmem:[%s3947_s12 + $0x630] sm:$0xff]  ;;  %v500_v43 = vld [vmem:[%s3947_s12 + $0x618] sm:$0xff] }
  0xd9   : > { %2068 = vmatprep.subr.bf16.mxu0 %v3485_v44  ;;  %2150 = vmatprep.subr.bf16.mxu1 %v3487_v46  ;;  %v504_v44 = vld [vmem:[%s3947_s12 + $0x638] sm:$0xff]  ;;  %v3540_v46 = vcombine.low %v491_v32, %v495_v54  ;;  %v3549_v48 = vcombine.high %v499_v41, %v503_v42 }
  0xda   : > { %v3551_v49 = vcombine.high %v500_v43, %v504_v44 }
  0xdb   : > { %2060 = vmatmul.mubr.bf16.vlgmr.msra.gmra.mrb[4].mxu0 %v3991_v0  ;;  %2142 = vmatmul.mubr.bf16.vlgmr.msra.gmra.mrb[4].mxu1 %v3991_v0  ;;  %v3500_v0 = vcombine.low %v451_v56, %v455_v57  ;;  %v3550_v56 = vcombine.low %v500_v43, %v504_v44 }
  0xdc   : > { %2069 = vmatpush1.bf16.msra.mxu0 %v3484_v51  ;;  %2151 = vmatpush1.bf16.msra.mxu1 %v3486_v52  ;;  %v511_v51 = vld [vmem:[%s3947_s12 + $0x670] sm:$0xff]  ;;  %v508_v52 = vld [vmem:[%s3947_s12 + $0x658] sm:$0xff] }
  0xdd   : > { %2070 = vmatprep.subr.bf16.mxu0 %v3493_v53  ;;  %2152 = vmatprep.subr.bf16.mxu1 %v3495_v55  ;;  %v512_v53 = vld [vmem:[%s3947_s12 + $0x678] sm:$0xff]  ;;  %v3548_v55 = vcombine.low %v499_v41, %v503_v42  ;;  %v3557_v57 = vcombine.high %v507_v50, %v511_v51 }
  0xde   : > { %2100 = vmatprep.mubr.bf16.mxu0 %v4050_v33  ;;  %2182 = vmatprep.mubr.bf16.mxu1 %v4050_v33  ;;  %v3510_v33 = vcombine.low %v460_v5, %v464_v4  ;;  %v3559_v58 = vcombine.high %v508_v52, %v512_v53  ;;  %v3558_v2 = vcombine.low %v508_v52, %v512_v53  ;;  %v523_v4 = vld [vmem:[%s3947_s12 + $0x6d0] sm:$0xff]  ;;  %v301_v52 = vld [vmem:[#allocation2 + $0x8] sm:$0xff] }
  0xe0   : > { %2071 = vmatpush1.bf16.msra.mxu0 %v3492_v61  ;;  %2153 = vmatpush1.bf16.msra.mxu1 %v3494_v62  ;;  %v519_v61 = vld [vmem:[%s3947_s12 + $0x6b0] sm:$0xff]  ;;  %v516_v62 = vld [vmem:[%s3947_s12 + $0x698] sm:$0xff] }
  0xe1   : > { %2072 = vmatprep.subr.bf16.mxu0 %v3501_v63  ;;  %2154 = vmatprep.subr.bf16.mxu1 %v3503_v1  ;;  %v520_v63 = vld [vmem:[%s3947_s12 + $0x6b8] sm:$0xff]  ;;  %v3556_v1 = vcombine.low %v507_v50, %v511_v51  ;;  %v3565_v3 = vcombine.high %v515_v59, %v519_v61 }
  0xe2   : > { %v3567_v5 = vcombine.high %v516_v62, %v520_v63  ;;  %v3566_v9 = vcombine.low %v516_v62, %v520_v63 }
  0xe4   : > { %2073 = vmatpush1.bf16.msra.mxu0 %v3500_v0  ;;  %2155 = vmatpush1.bf16.msra.mxu1 %v3502_v6  ;;  %v527_v0 = vld [vmem:[%s3947_s12 + $0x6f0] sm:$0xff]  ;;  %v524_v6 = vld [vmem:[%s3947_s12 + $0x6d8] sm:$0xff] }
  0xe5   : > { %2074 = vmatprep.subr.bf16.mxu0 %v3509_v7  ;;  %2156 = vmatprep.subr.bf16.mxu1 %v3511_v8  ;;  %v528_v7 = vld [vmem:[%s3947_s12 + $0x6f8] sm:$0xff]  ;;  %v3564_v8 = vcombine.low %v515_v59, %v519_v61  ;;  %v3573_v10 = vcombine.high %v523_v4, %v527_v0 }
  0xe6   : > { %v3575_v11 = vcombine.high %v524_v6, %v528_v7  ;;  %v3574_v16 = vcombine.low %v524_v6, %v528_v7 }
  0xe8   : > { %2075 = vmatpush1.bf16.msra.mxu0 %v3508_v13  ;;  %2157 = vmatpush1.bf16.msra.mxu1 %v3510_v33  ;;  %v535_v13 = vld [vmem:[%s3947_s12 + $0x730] sm:$0xff]  ;;  %v532_v33 = vld [vmem:[%s3947_s12 + $0x718] sm:$0xff] }
  0xe9   : > { %2076 = vmatprep.subr.bf16.mxu0 %v3517_v14  ;;  %2158 = vmatprep.subr.bf16.mxu1 %v3519_v15  ;;  %v536_v14 = vld [vmem:[%s3947_s12 + $0x738] sm:$0xff]  ;;  %v3572_v15 = vcombine.low %v523_v4, %v527_v0  ;;  %v3581_v17 = vcombine.high %v531_v12, %v535_v13 }
  0xea   : > { %v3583_v18 = vcombine.high %v532_v33, %v536_v14  ;;  %v3582_v24 = vcombine.low %v532_v33, %v536_v14  ;;  %v3795_v33 = vld [vmem:[%s4592_s5] sm:$0xff] (!%p3608_p6)  }
  0xeb   : > { %v3796_v14 = vld [vmem:[%s4592_s5 + $0x80] sm:$0xff] (!%p3608_p6)  }
  0xec   : > { %2077 = vmatpush1.bf16.msra.mxu0 %v3516_v20  ;;  %2159 = vmatpush1.bf16.msra.mxu1 %v3518_v21  ;;  %v543_v20 = vld [vmem:[%s3947_s12 + $0x770] sm:$0xff]  ;;  %v540_v21 = vld [vmem:[%s3947_s12 + $0x758] sm:$0xff] }
  0xed   : > { %2078 = vmatprep.subr.bf16.mxu0 %v3525_v22  ;;  %2160 = vmatprep.subr.bf16.mxu1 %v3527_v23  ;;  %v544_v22 = vld [vmem:[%s3947_s12 + $0x778] sm:$0xff]  ;;  %v3580_v23 = vcombine.low %v531_v12, %v535_v13  ;;  %v3589_v60 = vcombine.high %v539_v19, %v543_v20  ;;  %v3793_v12 = vld [vmem:[%s4592_s5 + $0x40] sm:$0xff] (!%p3608_p6)  }
  0xee   : > { %v3591_v26 = vcombine.high %v540_v21, %v544_v22  ;;  %v3590_v32 = vcombine.low %v540_v21, %v544_v22  ;;  %v3794_v13 = vld [vmem:[%s4592_s5 + $0xc0] sm:$0xff] (!%p3608_p6)   ;;  %v3803_v21 = vld [vmem:[%s4592_s5 + $0x10] sm:$0xff] (!%p3608_p6)  }
  0xef   : > { %v3804_v22 = vld [vmem:[%s4592_s5 + $0x90] sm:$0xff] (!%p3608_p6)  }
  0xf0   : > { %2079 = vmatpush1.bf16.msra.mxu0 %v3524_v28  ;;  %2161 = vmatpush1.bf16.msra.mxu1 %v3526_v29  ;;  %v551_v28 = vld [vmem:[%s3947_s12 + $0x7b0] sm:$0xff]  ;;  %v548_v29 = vld [vmem:[%s3947_s12 + $0x798] sm:$0xff] }
  0xf1   : > { %2080 = vmatprep.subr.bf16.mxu0 %v3533_v30  ;;  %2162 = vmatprep.subr.bf16.mxu1 %v3535_v31  ;;  %v552_v30 = vld [vmem:[%s3947_s12 + $0x7b8] sm:$0xff]  ;;  %v3588_v31 = vcombine.low %v539_v19, %v543_v20  ;;  %v3597_v54 = vcombine.high %v547_v27, %v551_v28  ;;  %v3801_v19 = vld [vmem:[%s4592_s5 + $0x50] sm:$0xff] (!%p3608_p6)  }
  0xf2   : > { %v3599_v34 = vcombine.high %v548_v29, %v552_v30  ;;  %v3598_v41 = vcombine.low %v548_v29, %v552_v30  ;;  %v3802_v20 = vld [vmem:[%s4592_s5 + $0xd0] sm:$0xff] (!%p3608_p6)   ;;  %v3811_v29 = vld [vmem:[%s4592_s5 + $0x20] sm:$0xff] (!%p3608_p6)  }
  0xf3   : > { %v3812_v30 = vld [vmem:[%s4592_s5 + $0xa0] sm:$0xff] (!%p3608_p6)  }
  0xf4   : > { %2081 = vmatpush1.bf16.msra.mxu0 %v3532_v37  ;;  %2163 = vmatpush1.bf16.msra.mxu1 %v3534_v38  ;;  %v559_v37 = vld [vmem:[%s3947_s12 + $0x7f0] sm:$0xff]  ;;  %v556_v38 = vld [vmem:[%s3947_s12 + $0x7d8] sm:$0xff] }
  0xf5   : > { %2082 = vmatprep.subr.bf16.mxu0 %v3541_v39  ;;  %2164 = vmatprep.subr.bf16.mxu1 %v3543_v40  ;;  %v560_v39 = vld [vmem:[%s3947_s12 + $0x7f8] sm:$0xff]  ;;  %v3596_v40 = vcombine.low %v547_v27, %v551_v28  ;;  %v3605_v42 = vcombine.high %v555_v36, %v559_v37  ;;  %v3604_v44 = vcombine.low %v555_v36, %v559_v37  ;;  %v3809_v27 = vld [vmem:[%s4592_s5 + $0x60] sm:$0xff] (!%p3608_p6)   ;;  %v3817_v36 = vld [vmem:[%s4592_s5 + $0x70] sm:$0xff] (!%p3608_p6)  }
  0xf6   : > { %v3607_v43 = vcombine.high %v556_v38, %v560_v39  ;;  %v3810_v28 = vld [vmem:[%s4592_s5 + $0xe0] sm:$0xff] (!%p3608_p6)   ;;  %v3818_v37 = vld [vmem:[%s4592_s5 + $0xf0] sm:$0xff] (!%p3608_p6)  }
  0xf8   : > { %2083 = vmatpush1.bf16.msra.mxu0 %v3540_v46  ;;  %2165 = vmatpush1.bf16.msra.mxu1 %v3542_v47  ;;  %v3606_v46 = vcombine.low %v556_v38, %v560_v39  ;;  %v3819_v38 = vld [vmem:[%s4592_s5 + $0x30] sm:$0xff] (!%p3608_p6)  }
  0xf9   : > { %2084 = vmatprep.subr.bf16.mxu0 %v3549_v48  ;;  %2166 = vmatprep.subr.bf16.mxu1 %v3551_v49  ;;  %v300_v49 = vld [vmem:[#allocation2] sm:$0xff]  ;;  %v3820_v39 = vld [vmem:[%s4592_s5 + $0xb0] sm:$0xff] (!%p3608_p6)  }
  0xfc   : > { %2085 = vmatpush1.bf16.msra.mxu0 %v3548_v55  ;;  %2167 = vmatpush1.bf16.msra.mxu1 %v3550_v56 }
  0xfd   : > { %2086 = vmatprep.subr.bf16.mxu0 %v3557_v57  ;;  %2168 = vmatprep.subr.bf16.mxu1 %v3559_v58 }
 0x100   : > { %2087 = vmatpush1.bf16.msra.mxu0 %v3556_v1  ;;  %2169 = vmatpush1.bf16.msra.mxu1 %v3558_v2  ;;  %v302_v2 = vld [vmem:[#allocation2 + $0x10] sm:$0xff] }
 0x101   : > { %2088 = vmatprep.subr.bf16.mxu0 %v3565_v3  ;;  %2170 = vmatprep.subr.bf16.mxu1 %v3567_v5  ;;  %v303_v5 = vld [vmem:[#allocation2 + $0x18] sm:$0xff] }
 0x104   : > { %2089 = vmatpush1.bf16.msra.mxu0 %v3564_v8  ;;  %2171 = vmatpush1.bf16.msra.mxu1 %v3566_v9 }
 0x105   : > { %2090 = vmatprep.subr.bf16.mxu0 %v3573_v10  ;;  %2172 = vmatprep.subr.bf16.mxu1 %v3575_v11 }
 0x108   : > { %2091 = vmatpush1.bf16.msra.mxu0 %v3572_v15  ;;  %2173 = vmatpush1.bf16.msra.mxu1 %v3574_v16  ;;  %v3797_v15 = vld [vmem:[%s4592_s5 + $0x48] sm:$0xff] (!%p3608_p6)  }
 0x109   : > { %2092 = vmatprep.subr.bf16.mxu0 %v3581_v17  ;;  %2174 = vmatprep.subr.bf16.mxu1 %v3583_v18  ;;  %v3798_v16 = vld [vmem:[%s4592_s5 + $0xc8] sm:$0xff] (!%p3608_p6)  }
 0x10a   : > { %v3799_v17 = vld [vmem:[%s4592_s5 + $0x8] sm:$0xff] (!%p3608_p6)  }
 0x10b   : > { %v3800_v18 = vld [vmem:[%s4592_s5 + $0x88] sm:$0xff] (!%p3608_p6)  }
 0x10c   : > { %2093 = vmatpush1.bf16.msra.mxu0 %v3580_v23  ;;  %2175 = vmatpush1.bf16.msra.mxu1 %v3582_v24  ;;  %v3805_v23 = vld [vmem:[%s4592_s5 + $0x58] sm:$0xff] (!%p3608_p6)  }
 0x10d   : > { %2094 = vmatprep.subr.bf16.mxu0 %v3589_v60  ;;  %2176 = vmatprep.subr.bf16.mxu1 %v3591_v26  ;;  %v3806_v24 = vld [vmem:[%s4592_s5 + $0xd8] sm:$0xff] (!%p3608_p6)  }
 0x10e   : > { %v3807_v60 = vld [vmem:[%s4592_s5 + $0x18] sm:$0xff] (!%p3608_p6)  }
 0x10f   : > { %v3808_v26 = vld [vmem:[%s4592_s5 + $0x98] sm:$0xff] (!%p3608_p6)  }
 0x110   : > { %2095 = vmatpush1.bf16.msra.mxu0 %v3588_v31  ;;  %2177 = vmatpush1.bf16.msra.mxu1 %v3590_v32  ;;  %v3813_v31 = vld [vmem:[%s4592_s5 + $0x68] sm:$0xff] (!%p3608_p6)  }
 0x111   : > { %2096 = vmatprep.subr.bf16.mxu0 %v3597_v54  ;;  %2178 = vmatprep.subr.bf16.mxu1 %v3599_v34  ;;  %v3814_v32 = vld [vmem:[%s4592_s5 + $0xe8] sm:$0xff] (!%p3608_p6)  }
 0x112   : > { %v3815_v54 = vld [vmem:[%s4592_s5 + $0x28] sm:$0xff] (!%p3608_p6)  }
 0x113   : > { %v3816_v34 = vld [vmem:[%s4592_s5 + $0xa8] sm:$0xff] (!%p3608_p6)  }
 0x114   : > { %2097 = vmatpush1.bf16.msra.mxu0 %v3596_v40  ;;  %2179 = vmatpush1.bf16.msra.mxu1 %v3598_v41  ;;  %v4334_v40 = vsub.s32 (!%p3608_p6), 0, %v3973_v45  ;;  %v3821_v41 = vld [vmem:[%s4592_s5 + $0x78] sm:$0xff] (!%p3608_p6)  }
 0x115   : > { %2098 = vmatprep.subr.bf16.mxu0 %v3605_v42  ;;  %2180 = vmatprep.subr.bf16.mxu1 %v3607_v43  ;;  %v4340_v42 = vsub.s32 (!%p3608_p6), 1, %v3973_v45  ;;  %v3822_v43 = vld [vmem:[%s4592_s5 + $0xf8] sm:$0xff] (!%p3608_p6)  }
 0x118   : > { %2099 = vmatpush1.bf16.msra.mxu0 %v3604_v44  ;;  %2181 = vmatpush1.bf16.msra.mxu1 %v3606_v46  ;;  %v4346_v44 = vsub.s32 (!%p3608_p6), 2, %v3973_v45  ;;  %v3823_v46 = vld [vmem:[%s4592_s5 + $0x38] sm:$0xff] (!%p3608_p6)  }
 0x119   : > { %3678 = vmatprep.subr.bf16.mxu0 (!%p3608_p6), %v3793_v12  ;;  %3700 = vmatprep.subr.bf16.mxu1 (!%p3608_p6), %v3794_v13 }
 0x11b   : > { %2101 = vmatmul.mubr.bf16.vlgmr.msra.gmra.mrb[4].mxu0 %v4042_v25  ;;  %2183 = vmatmul.mubr.bf16.vlgmr.msra.gmra.mrb[4].mxu1 %v4042_v25 }
 0x11c   : > { %3679 = vmatpush3.bf16.msra.mxu0 (!%p3608_p6), %v3795_v33  ;;  %3701 = vmatpush3.bf16.msra.mxu1 (!%p3608_p6), %v3796_v14 }
 0x11d   : > { %3680 = vmatprep.subr.bf16.mxu0 (!%p3608_p6), %v3797_v15  ;;  %3702 = vmatprep.subr.bf16.mxu1 (!%p3608_p6), %v3798_v16 }
 0x120   : > { %3681 = vmatpush3.bf16.msra.mxu0 (!%p3608_p6), %v3799_v17  ;;  %3703 = vmatpush3.bf16.msra.mxu1 (!%p3608_p6), %v3800_v18 }
 0x121   : > { %3682 = vmatprep.subr.bf16.mxu0 (!%p3608_p6), %v3801_v19  ;;  %3704 = vmatprep.subr.bf16.mxu1 (!%p3608_p6), %v3802_v20 }
 0x124   : > { %3683 = vmatpush3.bf16.msra.mxu0 (!%p3608_p6), %v3803_v21  ;;  %3705 = vmatpush3.bf16.msra.mxu1 (!%p3608_p6), %v3804_v22 }
 0x125   : > { %3684 = vmatprep.subr.bf16.mxu0 (!%p3608_p6), %v3805_v23  ;;  %3706 = vmatprep.subr.bf16.mxu1 (!%p3608_p6), %v3806_v24 }
 0x128   : > { %3685 = vmatpush3.bf16.msra.mxu0 (!%p3608_p6), %v3807_v60  ;;  %3707 = vmatpush3.bf16.msra.mxu1 (!%p3608_p6), %v3808_v26 }
 0x129   : > { %3686 = vmatprep.subr.bf16.mxu0 (!%p3608_p6), %v3809_v27  ;;  %3708 = vmatprep.subr.bf16.mxu1 (!%p3608_p6), %v3810_v28 }
 0x12c   : > { %3687 = vmatpush3.bf16.msra.mxu0 (!%p3608_p6), %v3811_v29  ;;  %3709 = vmatpush3.bf16.msra.mxu1 (!%p3608_p6), %v3812_v30 }
 0x12d   : > { %3688 = vmatprep.subr.bf16.mxu0 (!%p3608_p6), %v3813_v31  ;;  %3710 = vmatprep.subr.bf16.mxu1 (!%p3608_p6), %v3814_v32  ;;  %v4381_v31 = vsub.s32 (!%p3608_p6), 4, %v3973_v45 }
 0x130   : > { %3689 = vmatpush3.bf16.msra.mxu0 (!%p3608_p6), %v3815_v54  ;;  %3711 = vmatpush3.bf16.msra.mxu1 (!%p3608_p6), %v3816_v34  ;;  %v4384_v54 = vsub.s32 (!%p3608_p6), 5, %v3973_v45 }
 0x131   : > { %3690 = vmatprep.subr.bf16.mxu0 (!%p3608_p6), %v3817_v36  ;;  %3712 = vmatprep.subr.bf16.mxu1 (!%p3608_p6), %v3818_v37  ;;  %v4387_v36 = vsub.s32 (!%p3608_p6), 6, %v3973_v45  ;;  %v4390_v37 = vsub.s32 (!%p3608_p6), 7, %v3973_v45 }
 0x134   : > { %3691 = vmatpush3.bf16.msra.mxu0 (!%p3608_p6), %v3819_v38  ;;  %3713 = vmatpush3.bf16.msra.mxu1 (!%p3608_p6), %v3820_v39 }
 0x135   : > { %3692 = vmatprep.subr.bf16.mxu0 (!%p3608_p6), %v3821_v41  ;;  %3714 = vmatprep.subr.bf16.mxu1 (!%p3608_p6), %v3822_v43 }
 0x138   : > { %3693 = vmatpush3.bf16.msra.mxu0 (!%p3608_p6), %v3823_v46 }
 0x16e   : > { %v1938_v47 = vpop.f32.mrb[0].mxu0  ;;  %v2020_v48 = vpop.f32.mrb[0].mxu1 }
 0x16f   : > { %v1940_v50 = vpop.f32.mrb[1].mxu0  ;;  %v2022_v53 = vpop.f32.mrb[1].mxu1 }
 0x170   : > { %v2199_v51 = vcombine.low %v1938_v47, %v1940_v50  ;;  %v1942_v55 = vpop.f32.mrb[2].mxu0  ;;  %v2200_v56 = vcombine.low %v2020_v48, %v2022_v53  ;;  %v2024_v57 = vpop.f32.mrb[2].mxu1  ;;  %v4352_v47 = vsub.s32 (!%p3608_p6), 3, %v3973_v45  ;;  %v3824_v48 = vld [vmem:[%s4592_s5 + $0xb8] sm:$0xff] (!%p3608_p6)  }
 0x171   : > { %v1943_v58 = vpop.f32.mrb[3].mxu0  ;;  %v2025_v61 = vpop.f32.mrb[3].mxu1  ;;  %3715 = vmatpush3.bf16.msra.mxu1 (!%p3608_p6), %v3824_v48  ;;  %v3825_v57 = vld [vmem:[%s4592_s5 + $0x140] sm:$0xff] (!%p3608_p6)  }
 0x172   : > { %v2207_v59 = vadd.f32 %v2199_v51, %v300_v49  ;;  %v2208_v62 = vadd.f32 %v2200_v56, %v301_v52  ;;  %v4360_v49 = vld [vmem:[%s4589_s2] sm:$0xff] (!%p3608_p6)  ;;  %3722 = vmatprep.subr.bf16.mxu0 (!%p3608_p6), %v3825_v57 }
 0x173   : > { %v2228_v51 = vrot.slane (!%p3608_p6), %v4360_v49, %v4334_v40  ;;  %v2232_v52 = vrot.slane (!%p3608_p6), %v4360_v49, %v4340_v42  ;;  %v2236_v55 = vrot.slane (!%p3608_p6), %v4360_v49, %v4346_v44  ;;  %v2240_v56 = vrot.slane (!%p3608_p6), %v4360_v49, %v4352_v47 }
 0x174   : > { %2211 = vst [vmem:[#allocation2] sm:$0xff] %v2207_v59  ;;  %2212 = vst [vmem:[#allocation2 + $0x8] sm:$0xff] %v2208_v62  ;;  %v3826_v59 = vld [vmem:[%s4592_s5 + $0x1c0] sm:$0xff] (!%p3608_p6)   ;;  %v2244_v43 = vrot.slane (!%p3608_p6), %v4360_v49, %v4381_v31  ;;  %v2248_v46 = vrot.slane (!%p3608_p6), %v4360_v49, %v4384_v54  ;;  %v2256_v45 = vrot.slane (!%p3608_p6), %v4360_v49, %v4390_v37 }
 0x175   : > { %v2257_v58 = vcombine.low (!%p3608_p6), %v2228_v51, %v2232_v52  ;;  %v2258_v61 = vcombine.low (!%p3608_p6), %v2236_v55, %v2240_v56  ;;  %3744 = vmatprep.subr.bf16.mxu1 (!%p3608_p6), %v3826_v59 }
 0x17b   : > { %v2219_v50 = vld [vmem:[#allocation2] sm:$0xff] (!%p3608_p6)  ;;  %v2220_v53 = vld [vmem:[#allocation2 + $0x8] sm:$0xff] (!%p3608_p6) }
 0x17c   : > { %v2265_v62 = vadd.f32 (!%p3608_p6), %v2257_v58, %v2219_v50  ;;  %v2252_v50 = vrot.slane (!%p3608_p6), %v4360_v49, %v4387_v36  ;;  %v2259_v58 = vcombine.low (!%p3608_p6), %v2244_v43, %v2248_v46 }
 0x1ee   : > { %v2102_v63 = vpop.f32.mrb[4].mxu0  ;;  %v2184_v1 = vpop.f32.mrb[4].mxu1  ;;  %2218 = sbr.rel (%p3608_p6) target bundleno = 989 (0x3dd), region = 56 }
 0x1ef   : > { %v2104_v25 = vpop.f32.mrb[5].mxu0  ;;  %v2186_v4 = vpop.f32.mrb[5].mxu1 }
 0x1f0   : > { %v2201_v3 = vcombine.low %v2102_v63, %v2104_v25  ;;  %v2106_v0 = vpop.f32.mrb[6].mxu0  ;;  %v2202_v6 = vcombine.low %v2184_v1, %v2186_v4  ;;  %v2188_v7 = vpop.f32.mrb[6].mxu1  ;;  %v2266_v63 = vadd.f32 (!%p3608_p6), %v2258_v61, %v2220_v53  ;;  %v2273_v1 = vcombine.high (!%p3608_p6), %v2265_v62, %v2265_v62 }
 0x1f1   : > { %v2107_v8 = vpop.f32.mrb[7].mxu0  ;;  %v2189_v10 = vpop.f32.mrb[7].mxu1 }
 0x1f2   : > { %v2209_v9 = vadd.f32 %v2201_v3, %v302_v2  ;;  %v2210_v11 = vadd.f32 %v2202_v6, %v303_v5  ;;  %v2282_v2 = vsel (!%p3608_p6), %vm2281_vm0, %v2265_v62, 0.0  ;;  %v2274_v3 = vcombine.high (!%p3608_p6), %v2266_v63, %v2266_v63 }
 0x1f3   : > { %v2283_v25 = vrot.slane (!%p3608_p6), %v2282_v2, 4  ;;  %v2296_v5 = vsel (!%p3608_p6), %vm2281_vm0, %v2266_v63, 0.0  ;;  %v2289_v4 = vsel (!%p3608_p6), %vm2281_vm0, %v2273_v1, 0.0 }
 0x1f4   : > { %2213 = vst [vmem:[#allocation2 + $0x10] sm:$0xff] %v2209_v9  ;;  %2214 = vst [vmem:[#allocation2 + $0x18] sm:$0xff] %v2210_v11  ;;  %v2297_v0 = vrot.slane (!%p3608_p6), %v2296_v5, 4  ;;  %v2290_v7 = vrot.slane (!%p3608_p6), %v2289_v4, 4  ;;  %v2303_v8 = vsel (!%p3608_p6), %vm2281_vm0, %v2274_v3, 0.0 }
 0x1f5   : > { %v2284_v6 = vadd.f32 %v2283_v25, %v2282_v2  ;;  %v2304_v10 = vrot.slane %v2303_v8, 4 }
 0x1f6   : > { %v2298_v9 = vadd.f32 %v2297_v0, %v2296_v5  ;;  %v2291_v12 = vadd.f32 %v2290_v7, %v2289_v4 }
 0x1f7   : > { %v2285_v11 = vrot.slane %v2284_v6, 2  ;;  %v2305_v33 = vadd.f32 %v2304_v10, %v2303_v8 }
 0x1f8   : > { %v2299_v13 = vrot.slane %v2298_v9, 2  ;;  %v2292_v15 = vrot.slane %v2291_v12, 2 }
 0x1f9   : > { %v2286_v14 = vadd.f32 %v2285_v11, %v2284_v6  ;;  %v2306_v17 = vrot.slane %v2305_v33, 2 }
 0x1fa   : > { %v2300_v16 = vadd.f32 %v2299_v13, %v2298_v9  ;;  %v2293_v19 = vadd.f32 %v2292_v15, %v2291_v12 }
 0x1fb   : > { %v2287_v18 = vrot.slane %v2286_v14, 1  ;;  %v2307_v21 = vadd.f32 %v2306_v17, %v2305_v33  ;;  %v2221_v3 = vld [vmem:[#allocation2 + $0x10] sm:$0xff]  ;;  %v2222_v6 = vld [vmem:[#allocation2 + $0x18] sm:$0xff] }
 0x1fc   : > { %v2301_v20 = vrot.slane %v2300_v16, 1  ;;  %v2294_v23 = vrot.slane %v2293_v19, 1  ;;  %v4412_v0 = vadd.f32 %v2259_v58, %v2221_v3 }
 0x1fd   : > { %v2288_v22 = vadd.f32 %v2287_v18, %v2286_v14  ;;  %v2308_v60 = vrot.slane %v2307_v21, 1 }
 0x1fe   : > { %v2302_v24 = vadd.f32 %v2301_v20, %v2300_v16  ;;  %v2295_v26 = vadd.f32 %v2294_v23, %v2293_v19  ;;  %v2275_v12 = vcombine.high %v4412_v0, %v4412_v0  ;;  %v2310_v13 = vsel %vm2281_vm0, %v4412_v0, 0.0 }
 0x1ff   : > { %v2339_v27 = vmul.f32 0.25, %v2288_v22  ;;  %v2309_v28 = vadd.f32 %v2308_v60, %v2307_v21  ;;  %v2311_v15 = vrot.slane %v2310_v13, 4 }
 0x200   : > { %v2341_v29 = vmul.f32 0.25, %v2302_v24  ;;  %v2340_v30 = vmul.f32 0.25, %v2295_v26  ;;  %v2317_v19 = vsel %vm2281_vm0, %v2275_v12, 0.0  ;;  %v4429_v12 = vld [vmem:[%s4590_s3] sm:$0xff] }
 0x201   : > { %v2342_v32 = vmul.f32 0.25, %v2309_v28  ;;  %v2312_v23 = vadd.f32 %v2311_v15, %v2310_v13  ;;  %v2318_v24 = vrot.slane %v2317_v19, 4 }
 0x202   : > { %v2355_v34 = vcombine.low %v2339_v27, %v2340_v30 }
 0x203   : > { %v2356_v38 = vcombine.low %v2341_v29, %v2342_v32  ;;  %v2313_v32 = vrot.slane %v2312_v23, 2 }
 0x204   : > { %v4392_v39 = vsub.f32 %v2265_v62, %v2355_v34  ;;  %v2260_v62 = vcombine.low %v2252_v50, %v2256_v45  ;;  %v2319_v34 = vadd.f32 %v2318_v24, %v2317_v19 }
 0x205   : > { %v4394_v41 = vsub.f32 %v2266_v63, %v2356_v38 }
 0x206   : > { %v2367_v48 = vmul.f32 %v4392_v39, %v4392_v39  ;;  %v4414_v9 = vadd.f32 %v2260_v62, %v2222_v6 }
 0x207   : > { %v2368_v51 = vmul.f32 %v4394_v41, %v4394_v41 }
 0x208   : > { %v2375_v52 = vcombine.high %v2367_v48, %v2367_v48  ;;  %v2383_v53 = vsel %vm2281_vm0, %v2367_v48, 0.0  ;;  %v2276_v16 = vcombine.high %v4414_v9, %v4414_v9  ;;  %v2324_v20 = vsel %vm2281_vm0, %v4414_v9, 0.0 }
 0x209   : > { %v2384_v55 = vrot.slane %v2383_v53, 4  ;;  %v2376_v56 = vcombine.high %v2368_v51, %v2368_v51  ;;  %v2397_v57 = vsel %vm2281_vm0, %v2368_v51, 0.0  ;;  %v2325_v27 = vrot.slane %v2324_v20, 4 }
 0x20a   : > { %v2390_v59 = vsel %vm2281_vm0, %v2375_v52, 0.0  ;;  %v2398_v61 = vrot.slane %v2397_v57, 4  ;;  %v2331_v28 = vsel %vm2281_vm0, %v2276_v16, 0.0  ;;  %v2314_v51 = vadd.f32 %v2313_v32, %v2312_v23 }
 0x20b   : > { %v2385_v63 = vadd.f32 %v2384_v55, %v2383_v53  ;;  %v2391_v1 = vrot.slane %v2390_v59, 4  ;;  %v2404_v2 = vsel %vm2281_vm0, %v2376_v56, 0.0  ;;  %v2326_v46 = vadd.f32 %v2325_v27, %v2324_v20 }
 0x20c   : > { %v2399_v49 = vadd.f32 %v2398_v61, %v2397_v57  ;;  %v2405_v25 = vrot.slane %v2404_v2, 4  ;;  %v2332_v48 = vrot.slane %v2331_v28, 4  ;;  %v2320_v52 = vrot.slane %v2319_v34, 2 }
 0x20d   : > { %v2386_v5 = vrot.slane %v2385_v63, 2  ;;  %v2392_v4 = vadd.f32 %v2391_v1, %v2390_v59  ;;  %v2327_v56 = vrot.slane %v2326_v46, 2  ;;  %v2315_v61 = vrot.slane %v2314_v51, 1 }
 0x20e   : > { %v2400_v7 = vrot.slane %v2399_v49, 2  ;;  %v2406_v8 = vadd.f32 %v2405_v25, %v2404_v2  ;;  %v2333_v57 = vadd.f32 %v2332_v48, %v2331_v28  ;;  %v2321_v62 = vadd.f32 %v2320_v52, %v2319_v34 }
 0x20f   : > { %v2387_v10 = vadd.f32 %v2386_v5, %v2385_v63  ;;  %v2393_v11 = vrot.slane %v2392_v4, 2  ;;  %v2328_v1 = vadd.f32 %v2327_v56, %v2326_v46  ;;  %v2316_v25 = vadd.f32 %v2315_v61, %v2314_v51 }
 0x210   : > { %v2401_v33 = vadd.f32 %v2400_v7, %v2399_v49  ;;  %v2407_v14 = vrot.slane %v2406_v8, 2  ;;  %v2334_v2 = vrot.slane %v2333_v57, 2  ;;  %v2322_v3 = vrot.slane %v2321_v62, 1 }
 0x211   : > { %v2388_v17 = vrot.slane %v2387_v10, 1  ;;  %v2394_v18 = vadd.f32 %v2393_v11, %v2392_v4  ;;  %v2329_v5 = vrot.slane %v2328_v1, 1  ;;  %v2343_v7 = vmul.f32 0.25, %v2316_v25 }
 0x212   : > { %v2402_v21 = vrot.slane %v2401_v33, 1  ;;  %v2408_v22 = vadd.f32 %v2407_v14, %v2406_v8  ;;  %v2335_v4 = vadd.f32 %v2334_v2, %v2333_v57  ;;  %v2323_v6 = vadd.f32 %v2322_v3, %v2321_v62  ;;  %v4434_v14 = vld [vmem:[%s4591_s4] sm:$0xff] }
 0x213   : > { %v2389_v60 = vadd.f32 %v2388_v17, %v2387_v10  ;;  %v2395_v26 = vrot.slane %v2394_v18, 1  ;;  %v2330_v8 = vadd.f32 %v2329_v5, %v2328_v1  ;;  %v2488_v17 = vrot.slane %v4429_v12, %v4334_v40 }
 0x214   : > { %v2403_v29 = vadd.f32 %v2402_v21, %v2401_v33  ;;  %v2409_v30 = vrot.slane %v2408_v22, 1  ;;  %v2336_v10 = vrot.slane %v2335_v4, 1  ;;  %v2344_v11 = vmul.f32 0.25, %v2323_v6 }
 0x215   : > { %v2396_v38 = vadd.f32 %v2395_v26, %v2394_v18  ;;  %v2439_v43 = vmul.f32 0.25, %v2389_v60  ;;  %v2345_v33 = vmul.f32 0.25, %v2330_v8  ;;  %v2492_v18 = vrot.slane %v4429_v12, %v4340_v42 }
 0x216   : > { %v2410_v50 = vadd.f32 %v2409_v30, %v2408_v22  ;;  %v2441_v45 = vmul.f32 0.25, %v2403_v29  ;;  %v2337_v13 = vadd.f32 %v2336_v10, %v2335_v4  ;;  %v2357_v15 = vcombine.low %v2343_v7, %v2344_v11 }
 0x217   : > { %v2440_v53 = vmul.f32 0.25, %v2396_v38  ;;  %v2447_v55 = vadd.f32 1e-05, %v2439_v43  ;;  %v2534_v21 = vrot.slane %v4434_v14, %v4334_v40  ;;  %v2496_v22 = vrot.slane %v4429_v12, %v4346_v44 }
 0x218   : > { %v2442_v58 = vmul.f32 0.25, %v2410_v50  ;;  %v2449_v59 = vadd.f32 1e-05, %v2441_v45  ;;  %v2346_v16 = vmul.f32 0.25, %v2337_v13  ;;  %v4441_v19 = vsub.f32 %v4412_v0, %v2357_v15 }
 0x219   : > { %v2448_v63 = vadd.f32 1e-05, %v2440_v53  ;;  %3857 = vrsqrt.f32 %v2447_v55  ;;  %v2500_v23 = vrot.slane %v4429_v12, %v4352_v47  ;;  %v2538_v26 = vrot.slane %v4434_v14, %v4340_v42 }
 0x21a   : > { %v2450_v49 = vadd.f32 1e-05, %v2442_v58  ;;  %3859 = vrsqrt.f32 %v2449_v59  ;;  %v2358_v24 = vcombine.low %v2345_v33, %v2346_v16  ;;  %v2542_v27 = vrot.slane %v4434_v14, %v4346_v44 }
 0x21b   : > { %3861 = vrsqrt.f32 %v2448_v63  ;;  %v2546_v0 = vrot.slane %v4434_v14, %v4352_v47  ;;  %v2369_v40 = vmul.f32 %v4441_v19, %v4441_v19  ;;  %v2517_v34 = vcombine.low %v2488_v17, %v2492_v18 }
 0x21c   : > { %3863 = vrsqrt.f32 %v2450_v49  ;;  %v4458_v29 = vsub.f32 %v4414_v9, %v2358_v24  ;;  %v2518_v46 = vcombine.low %v2496_v22, %v2500_v23  ;;  %v2563_v50 = vcombine.low %v2534_v21, %v2538_v26  ;;  %v3827_v22 = vld [vmem:[%s4592_s5 + $0x100] sm:$0xff]  }
 0x21d   : > { %v2377_v38 = vcombine.high %v2369_v40, %v2369_v40  ;;  %v2411_v43 = vsel %vm2281_vm0, %v2369_v40, 0.0  ;;  %v2564_v45 = vcombine.low %v2542_v27, %v2546_v0  ;;  %v3828_v26 = vld [vmem:[%s4592_s5 + $0x180] sm:$0xff]   ;;  %v3829_v27 = vld [vmem:[%s4592_s5 + $0x148] sm:$0xff]  }
 0x21e   : > { %v2412_v48 = vrot.slane %v2411_v43, 4  ;;  %v2370_v44 = vmul.f32 %v4458_v29, %v4458_v29 }
 0x21f   : > { %v2418_v51 = vsel %vm2281_vm0, %v2377_v38, 0.0 }
 0x220   : > { %v2413_v52 = vadd.f32 %v2412_v48, %v2411_v43  ;;  %v2419_v53 = vrot.slane %v2418_v51, 4  ;;  %v2378_v55 = vcombine.high %v2370_v44, %v2370_v44  ;;  %v2425_v57 = vsel %vm2281_vm0, %v2370_v44, 0.0  ;;  %v3831_v43 = vld [vmem:[%s4592_s5 + $0x108] sm:$0xff]   ;;  %v3833_v48 = vld [vmem:[%s4592_s5 + $0x150] sm:$0xff]  }
 0x221   : > { %v2426_v62 = vrot.slane %v2425_v57, 4 }
 0x222   : > { %v2414_v59 = vrot.slane %v2413_v52, 2  ;;  %v2420_v61 = vadd.f32 %v2419_v53, %v2418_v51  ;;  %v2432_v1 = vsel %vm2281_vm0, %v2378_v55, 0.0  ;;  %v3836_v53 = vld [vmem:[%s4592_s5 + $0x190] sm:$0xff]   ;;  %v3837_v55 = vld [vmem:[%s4592_s5 + $0x158] sm:$0xff]  }
 0x223   : > { %v3858_v20 = vpop.eup %3857  ;;  %v2427_v25 = vadd.f32 %v2426_v62, %v2425_v57  ;;  %v3842_v62 = vld [vmem:[%s4592_s5 + $0x1e0] sm:$0xff]  }
 0x224   : > { %v3860_v60 = vpop.eup %3859  ;;  %v2415_v2 = vadd.f32 %v2414_v59, %v2413_v52  ;;  %v2421_v49 = vrot.slane %v2420_v61, 2  ;;  %v3840_v59 = vld [vmem:[%s4592_s5 + $0x198] sm:$0xff]  }
 0x225   : > { %v3862_v28 = vpop.eup %3861  ;;  %v2428_v8 = vrot.slane %v2427_v25, 2 }
 0x226   : > { %v3864_v30 = vpop.eup %3863  ;;  %v2471_v32 = vcombine.low %v3858_v20, %v3862_v28  ;;  %v2416_v4 = vrot.slane %v2415_v2, 1  ;;  %v2422_v6 = vadd.f32 %v2421_v49, %v2420_v61  ;;  %v3830_v28 = vld [vmem:[%s4592_s5 + $0x1c8] sm:$0xff]   ;;  %v3841_v61 = vld [vmem:[%s4592_s5 + $0x160] sm:$0xff]   ;;  %v2550_v49 = vrot.slane %v4434_v14, %v4381_v31 }
 0x227   : > { %v2472_v42 = vcombine.low %v3860_v60, %v3864_v30  ;;  %v2429_v18 = vadd.f32 %v2428_v8, %v2427_v25  ;;  %v2554_v25 = vrot.slane %v4434_v14, %v4384_v54 }
 0x228   : > { %v2479_v47 = vmul.f32 %v2471_v32, %v4392_v39  ;;  %v2417_v33 = vadd.f32 %v2416_v4, %v2415_v2  ;;  %v2423_v17 = vrot.slane %v2422_v6, 1  ;;  %v3843_v2 = vld [vmem:[%s4592_s5 + $0x120] sm:$0xff]   ;;  %v3846_v4 = vld [vmem:[%s4592_s5 + $0x1e8] sm:$0xff]  }
 0x229   : > { %v2480_v9 = vmul.f32 %v2472_v42, %v4394_v41  ;;  %v2433_v41 = vrot.slane %v2432_v1, 4  ;;  %v2430_v40 = vrot.slane %v2429_v18, 1 }
 0x22a   : > { %v2525_v56 = vmul.f32 %v2517_v34, %v2479_v47  ;;  %v2443_v23 = vmul.f32 0.25, %v2417_v33  ;;  %v2424_v0 = vadd.f32 %v2423_v17, %v2422_v6  ;;  %v3848_v33 = vld [vmem:[%s4592_s5 + $0x1a8] sm:$0xff]  }
 0x22b   : > { %v2526_v58 = vmul.f32 %v2518_v46, %v2480_v9  ;;  %v2434_v10 = vadd.f32 %v2433_v41, %v2432_v1  ;;  %v2431_v38 = vadd.f32 %v2430_v40, %v2429_v18  ;;  %v3832_v46 = vld [vmem:[%s4592_s5 + $0x188] sm:$0xff]   ;;  %v3835_v9 = vld [vmem:[%s4592_s5 + $0x110] sm:$0xff]   ;;  %v2508_v1 = vrot.slane %v4429_v12, %v4384_v54  ;;  %v3844_v41 = vld [vmem:[%s4592_s5 + $0x1a0] sm:$0xff]  }
 0x22c   : > { %v2571_v63 = vadd.f32 %v2563_v50, %v2525_v56  ;;  %v2451_v30 = vadd.f32 1e-05, %v2443_v23  ;;  %v2444_v34 = vmul.f32 0.25, %v2424_v0  ;;  %v3834_v50 = vld [vmem:[%s4592_s5 + $0x1d0] sm:$0xff]   ;;  %v3838_v56 = vld [vmem:[%s4592_s5 + $0x1d8] sm:$0xff]   ;;  %v2512_v54 = vrot.slane %v4429_v12, %v4387_v36 }
 0x22d   : > { %v2572_v39 = vadd.f32 %v2564_v45, %v2526_v58  ;;  %v2435_v24 = vrot.slane %v2434_v10, 2  ;;  %v2445_v47 = vmul.f32 0.25, %v2431_v38  ;;  %v3839_v58 = vld [vmem:[%s4592_s5 + $0x118] sm:$0xff]  }
 0x22e   : > { %vm2575_vm1 = vcmp.gt.f32.partialorder %v2571_v63, 0.0  ;;  %v2579_v3 = vmul.f32 0.2, %v2571_v63  ;;  %v2452_v44 = vadd.f32 1e-05, %v2444_v34  ;;  %3865 = vrsqrt.f32 %v2451_v30  ;;  %v3855_v0 = vld [vmem:[%s4592_s5 + $0x138] sm:$0xff]  }
 0x22f   : > { %vm2576_vm2 = vcmp.gt.f32.partialorder %v2572_v39, 0.0  ;;  %v2580_v5 = vmul.f32 0.2, %v2572_v39  ;;  %v2436_v32 = vadd.f32 %v2435_v24, %v2434_v10  ;;  %v2453_v51 = vadd.f32 1e-05, %v2445_v47  ;;  %v3847_v10 = vld [vmem:[%s4592_s5 + $0x128] sm:$0xff]  }
 0x230   : > { %v2583_v7 = vsel %vm2575_vm1, %v2571_v63, %v2579_v3  ;;  %3867 = vrsqrt.f32 %v2452_v44  ;;  %v2504_v63 = vrot.slane %v4429_v12, %v4381_v31 }
 0x231   : > { %v2591_v11 = vcombine.high %v2583_v7, %v2583_v7  ;;  %v2584_v13 = vsel %vm2576_vm2, %v2572_v39, %v2580_v5  ;;  %v2599_v15 = vpack.c.bf16 %v2583_v7, %v2583_v7  ;;  %v2437_v42 = vrot.slane %v2436_v32, 1  ;;  %v3845_v5 = vld [vmem:[%s4592_s5 + $0x168] sm:$0xff]  }
 0x232   : > { %v2592_v16 = vcombine.high %v2584_v13, %v2584_v13  ;;  %v2601_v21 = vpack.c.bf16 %v2584_v13, %v2584_v13  ;;  %3869 = vrsqrt.f32 %v2453_v51  ;;  %v2519_v6 = vcombine.low %v2504_v63, %v2508_v1 }
 0x233   : > { %v2600_v20 = vpack.c.bf16 %v2591_v11, %v2591_v11  ;;  %v2438_v45 = vadd.f32 %v2437_v42, %v2436_v32  ;;  %v2516_v7 = vrot.slane %v4429_v12, %v4390_v37  ;;  %v2565_v13 = vcombine.low %v2550_v49, %v2554_v25 }
 0x234   : > { %v2602_v60 = vpack.c.bf16 %v2592_v16, %v2592_v16  ;;  %v2558_v12 = vrot.slane %v4434_v14, %v4387_v36  ;;  %v2562_v16 = vrot.slane %v4434_v14, %v4390_v37  ;;  %v3852_v36 = vld [vmem:[%s4592_s5 + $0x1b0] sm:$0xff]   ;;  %v3853_v37 = vld [vmem:[%s4592_s5 + $0x178] sm:$0xff]  }
 0x235   : > { %3158 = vmatprep.mubr.bf16.mxu0 %v2600_v20  ;;  %v2446_v52 = vmul.f32 0.25, %v2438_v45 }
 0x236   : > { %3198 = vmatprep.mubr.bf16.mxu1 %v2602_v60  ;;  %3159 = vmatmul.mubr.bf16.vlgmr.msra.gmra.mrb[0].mxu0 %v2599_v15  ;;  %v3849_v15 = vld [vmem:[%s4592_s5 + $0x170] sm:$0xff]   ;;  %v2566_v24 = vcombine.low %v2558_v12, %v2562_v16  ;;  %v3854_v60 = vld [vmem:[%s4592_s5 + $0x1f8] sm:$0xff]  }
 0x237   : > { %3199 = vmatmul.mubr.bf16.vlgmr.msra.gmra.mrb[0].mxu1 %v2601_v21  ;;  %3723 = vmatpush3.bf16.msra.mxu0 %v3827_v22  ;;  %v2454_v57 = vadd.f32 1e-05, %v2446_v52  ;;  %v2520_v21 = vcombine.low %v2512_v54, %v2516_v7  ;;  %v3851_v22 = vld [vmem:[%s4592_s5 + $0x130] sm:$0xff]  }
 0x238   : > { %3745 = vmatpush3.bf16.msra.mxu1 %v3828_v26  ;;  %3724 = vmatprep.subr.bf16.mxu0 %v3829_v27  ;;  %v3866_v39 = vpop.eup %3865 }
 0x239   : > { %3746 = vmatprep.subr.bf16.mxu1 %v3830_v28  ;;  %3871 = vrsqrt.f32 %v2454_v57 }
 0x23a   : > { %v3868_v3 = vpop.eup %3867 }
 0x23b   : > { %3725 = vmatpush3.bf16.msra.mxu0 %v3831_v43  ;;  %v2473_v31 = vcombine.low %v3866_v39, %v3868_v3 }
 0x23c   : > { %3747 = vmatpush3.bf16.msra.mxu1 %v3832_v46  ;;  %3726 = vmatprep.subr.bf16.mxu0 %v3833_v48  ;;  %v3870_v8 = vpop.eup %3869 }
 0x23d   : > { %3748 = vmatprep.subr.bf16.mxu1 %v3834_v50  ;;  %v2481_v11 = vmul.f32 %v2473_v31, %v4441_v19  ;;  %v3850_v19 = vld [vmem:[%s4592_s5 + $0x1f0] sm:$0xff]   ;;  %v3609_v50 = vld [vmem:[%s4593_s6] ss:$0 sm:$0xff] }
 0x23f   : > { %3727 = vmatpush3.bf16.msra.mxu0 %v3835_v9  ;;  %v2527_v18 = vmul.f32 %v2519_v6, %v2481_v11 }
 0x240   : > { %3749 = vmatpush3.bf16.msra.mxu1 %v3836_v53  ;;  %3728 = vmatprep.subr.bf16.mxu0 %v3837_v55 }
 0x241   : > { %3750 = vmatprep.subr.bf16.mxu1 %v3838_v56  ;;  %v2573_v23 = vadd.f32 %v2565_v13, %v2527_v18 }
 0x243   : > { %3729 = vmatpush3.bf16.msra.mxu0 %v3839_v58  ;;  %v3872_v17 = vpop.eup %3871  ;;  %vm2577_vm3 = vcmp.gt.f32.partialorder %v2573_v23, 0.0  ;;  %v2581_v26 = vmul.f32 0.2, %v2573_v23 }
 0x244   : > { %3751 = vmatpush3.bf16.msra.mxu1 %v3840_v59  ;;  %3730 = vmatprep.subr.bf16.mxu0 %v3841_v61  ;;  %v2474_v20 = vcombine.low %v3870_v8, %v3872_v17 }
 0x245   : > { %3752 = vmatprep.subr.bf16.mxu1 %v3842_v62  ;;  %v2585_v40 = vsel %vm2577_vm3, %v2573_v23, %v2581_v26 }
 0x246   : > { %v2482_v14 = vmul.f32 %v2474_v20, %v4458_v29  ;;  %v3856_v29 = vld [vmem:[%s4592_s5 + $0x1b8] sm:$0xff]   ;;  %v2593_v28 = vcombine.high %v2585_v40, %v2585_v40  ;;  %v2603_v32 = vpack.c.bf16 %v2585_v40, %v2585_v40 }
 0x247   : > { %3731 = vmatpush3.bf16.msra.mxu0 %v3843_v2  ;;  %v3287_v2 = vand.u32 127, %v566_v35 }
 0x248   : > { %3753 = vmatpush3.bf16.msra.mxu1 %v3844_v41  ;;  %3732 = vmatprep.subr.bf16.mxu0 %v3845_v5  ;;  %v2528_v27 = vmul.f32 %v2520_v21, %v2482_v14  ;;  %v2604_v34 = vpack.c.bf16 %v2593_v28, %v2593_v28 }
 0x249   : > { %3754 = vmatprep.subr.bf16.mxu1 %v3846_v4  ;;  %vm3288_vm5 = vcmp.eq.s32.totalorder %v3287_v2, 1  ;;  %vm3299_vm6 = vcmp.eq.s32.totalorder %v3287_v2, 13 }
 0x24a   : > { %v2574_v30 = vadd.f32 %v2566_v24, %v2528_v27  ;;  %3238 = vmatprep.mubr.bf16.mxu0 %v2604_v34 }
 0x24b   : > { %3733 = vmatpush3.bf16.msra.mxu0 %v3847_v10 }
 0x24c   : > { %3755 = vmatpush3.bf16.msra.mxu1 %v3848_v33  ;;  %3734 = vmatprep.subr.bf16.mxu0 %v3849_v15  ;;  %vm2578_vm4 = vcmp.gt.f32.partialorder %v2574_v30, 0.0  ;;  %v2582_v38 = vmul.f32 0.2, %v2574_v30 }
 0x24d   : > { %3756 = vmatprep.subr.bf16.mxu1 %v3850_v19 }
 0x24e   : > { %v2586_v43 = vsel %vm2578_vm4, %v2574_v30, %v2582_v38 }
 0x24f   : > { %3735 = vmatpush3.bf16.msra.mxu0 %v3851_v22  ;;  %v2594_v42 = vcombine.high %v2586_v43, %v2586_v43  ;;  %v2605_v46 = vpack.c.bf16 %v2586_v43, %v2586_v43 }
 0x250   : > { %3757 = vmatpush3.bf16.msra.mxu1 %v3852_v36  ;;  %3736 = vmatprep.subr.bf16.mxu0 %v3853_v37 }
 0x251   : > { %3758 = vmatprep.subr.bf16.mxu1 %v3854_v60  ;;  %v2606_v48 = vpack.c.bf16 %v2594_v42, %v2594_v42 }
 0x253   : > { %3737 = vmatpush3.bf16.msra.mxu0 %v3855_v0  ;;  %3278 = vmatprep.mubr.bf16.mxu1 %v2606_v48 }
 0x254   : > { %3759 = vmatpush3.bf16.msra.mxu1 %v3856_v29 }
 0x256   : > { %3239 = vmatmul.mubr.bf16.vlgmr.msra.gmra.mrb[4].mxu0 %v2603_v32 }
 0x257   : > { %3279 = vmatmul.mubr.bf16.vlgmr.msra.gmra.mrb[4].mxu1 %v2605_v46 }
 0x309   : > { %v3694_v44 = vpop.f32.mrb[0].mxu0 }
 0x30a   : > { %v3716_v47 = vpop.f32.mrb[0].mxu1  ;;  %v3695_v45 = vpop.f32.mrb[1].mxu0 }
 0x30b   : > { %v3696_v51 = vadd.f32 %v3695_v45, %v3694_v44  ;;  %v3717_v9 = vpop.f32.mrb[1].mxu1  ;;  %v3697_v52 = vpop.f32.mrb[2].mxu0 }
 0x30c   : > { %v3718_v53 = vadd.f32 %v3717_v9, %v3716_v47  ;;  %v3719_v55 = vpop.f32.mrb[2].mxu1  ;;  %v3698_v56 = vpop.f32.mrb[3].mxu0 }
 0x30d   : > { %v3161_v57 = vadd.f32 %v3696_v51, %v3609_v50  ;;  %v3720_v58 = vpop.f32.mrb[3].mxu1 }
 0x30f   : > { %v3201_v59 = vadd.f32 %v3718_v53, %v3161_v57 }
 0x329   : > { %v3738_v61 = vpop.f32.mrb[4].mxu0 }
 0x32a   : > { %v3739_v62 = vpop.f32.mrb[5].mxu0  ;;  %v3760_v49 = vpop.f32.mrb[4].mxu1 }
 0x32b   : > { %v3740_v63 = vadd.f32 %v3739_v62, %v3738_v61  ;;  %v3741_v1 = vpop.f32.mrb[6].mxu0  ;;  %v3761_v3 = vpop.f32.mrb[5].mxu1 }
 0x32c   : > { %v3742_v39 = vpop.f32.mrb[7].mxu0  ;;  %v3762_v41 = vadd.f32 %v3761_v3, %v3760_v49  ;;  %v3763_v5 = vpop.f32.mrb[6].mxu1 }
 0x32d   : > { %v3241_v25 = vadd.f32 %v3740_v63, %v3201_v59  ;;  %v3764_v4 = vpop.f32.mrb[7].mxu1 }
 0x32f   : > { %v3281_v31 = vadd.f32 %v3762_v41, %v3241_v25 }
 0x331   : > { %v3289_v6 = vsel %vm3288_vm5, %v3281_v31, 0.0 }
 0x332   : > { %v3290_v54 = vsel %vm2281_vm0, %v3289_v6, 0.0 }
 0x333   : > { %3291 = vadd.xlane.f32.xlu0 %v3290_v54 }
 0x3c0   : > { %v3292_v7 = vpop.xlane.xlu0 %3291 }
 0x3c1   : > { %v3674_v8 = vmul.f32 -1.442695, %v3292_v7 }
 0x3c3   : > { %3873 = vpow2.f32 %v3674_v8 }
 0x3cd   : > { %v3874_v10 = vpop.eup %3873 }
 0x3ce   : > { %v3296_v11 = vadd.f32 1.0, %v3874_v10 }
 0x3d0   : > { %3875 = vrcp.f32 %v3296_v11 }
 0x3da   : > { %v3876_v35 = vpop.eup %3875 }
 0x3db   : > { %v3300_v13 = vsel %vm3299_vm6, %v3876_v35, %v3281_v31 }
 0x3dc   : > { %3301 = vst [vmem:[%s4594_s7] sm:$0xf] %v3300_v13 }
 0x3dd PF: > { %s17_s24 = sadd.s32 1, %s3883_s24  }
 0x3de   : > { %p14_p7 = scmp.ge.s32.totalorder %s17_s24, 6  }
 0x3e0   :  { %16 = sbr.rel (!%p14_p7) target bundleno = 1 (0x1), region = 85 }

</bundles_post_ra>
